<compile_context>
chip_gen: v7x
topology: tpu7x:2x2x1
jax: 0.10.0
libtpu: 0.0.40
codegen_flags: <defaults>
</compile_context>

<pallas_src>
import math
from functools import partial

import jax
import jax.numpy as jnp
from jax.experimental import pallas as pl
from jax.experimental.pallas import tpu as pltpu  # noqa: F401  (kept for TPU-specific tuning hooks)


# ----------------------------- in-kernel helpers -----------------------------

def _layernorm(y, g, b):
    """LayerNorm over the last dim, eps=1e-5 (PyTorch), f32 math."""
    mu = jnp.mean(y, axis=-1, keepdims=True)
    var = jnp.mean((y - mu) * (y - mu), axis=-1, keepdims=True)
    return (y - mu) * jax.lax.rsqrt(var + 1e-5) * g + b


# -------------------- fused TransformerEncoderLayer kernel -------------------

def _tf_layer_kernel(x_ref, qkv_w_ref, qkv_b_ref, out_w_ref, out_b_ref,
                     ln1_w_ref, ln1_b_ref, ff1_w_ref, ff1_b_ref,
                     ff2_w_ref, ff2_b_ref, ln2_w_ref, ln2_b_ref,
                     o_ref, *, batch, seq):
    """Post-norm nn.TransformerEncoderLayer (nhead=1, ReLU FFN, eval mode).

    x_ref: (B*S, D) rows ordered (b, s).  All weights pre-transposed (Din, Dout).
    """
    D = x_ref.shape[-1]
    x = x_ref[...]                                                    # (B*S, D) f32

    # --- merged QKV projection: one (B*S, D) @ (D, 3D) GEMM ---
    qkv = jnp.dot(x, qkv_w_ref[...],
                  preferred_element_type=jnp.float32) + qkv_b_ref[...]
    q = qkv[:, :D].reshape(batch, seq, D)
    k = qkv[:, D:2 * D].reshape(batch, seq, D)
    v = qkv[:, 2 * D:].reshape(batch, seq, D)

    # --- single-head attention, batched over B inside one invocation ---
    scale = 1.0 / math.sqrt(D)
    s = jnp.einsum('bqd,bkd->bqk', q, k,
                   preferred_element_type=jnp.float32) * scale         # (B, S, S)
    s = s - jnp.max(s, axis=-1, keepdims=True)
    p = jnp.exp(s)
    p = p / jnp.sum(p, axis=-1, keepdims=True)
    ctx = jnp.einsum('bqk,bkd->bqd', p, v,
                     preferred_element_type=jnp.float32)               # (B, S, D)
    attn = jnp.dot(ctx.reshape(batch * seq, D), out_w_ref[...],
                   preferred_element_type=jnp.float32) + out_b_ref[...]

    # --- residual + LN1 ---
    h = _layernorm(x + attn, ln1_w_ref[...], ln1_b_ref[...])

    # --- FFN (linear -> ReLU -> linear) ---
    f = jnp.maximum(jnp.dot(h, ff1_w_ref[...],
                            preferred_element_type=jnp.float32) + ff1_b_ref[...], 0.0)
    f = jnp.dot(f, ff2_w_ref[...],
                preferred_element_type=jnp.float32) + ff2_b_ref[...]

    # --- residual + LN2 ---
    o_ref[...] = _layernorm(h + f, ln2_w_ref[...], ln2_b_ref[...]).astype(o_ref.dtype)


def transformer_layer(x2, p, *, batch, seq):
    """x2: (B*S, D) rows ordered (b, s) -> (B*S, D)."""
    N, D = x2.shape
    return pl.pallas_call(
        partial(_tf_layer_kernel, batch=batch, seq=seq),
        out_shape=jax.ShapeDtypeStruct((N, D), x2.dtype),
    )(x2, p["qkv_w"], p["qkv_b"], p["out_w"], p["out_b"],
      p["ln1_w"], p["ln1_b"], p["ff1_w"], p["ff1_b"],
      p["ff2_w"], p["ff2_b"], p["ln2_w"], p["ln2_b"])


# -------- fused bottleneck: mlp_enc -> mu/logvar -> reparam -> mlp_dec --------

def _bottleneck_kernel(h_ref, eps_ref,
                       me1_w_ref, me1_b_ref, me2_w_ref, me2_b_ref,
                       mu_w_ref, mu_b_ref, lv_w_ref, lv_b_ref,
                       md1_w_ref, md1_b_ref, md2_w_ref, md2_b_ref,
                       dec_ref, mu_ref, lv_ref):
    h = h_ref[...]                                                     # (S, B*D)
    # mlp_enc: fc1 -> relu -> fc2
    e = jnp.maximum(jnp.dot(h, me1_w_ref[...],
                            preferred_element_type=jnp.float32) + me1_b_ref[...], 0.0)
    lat = jnp.dot(e, me2_w_ref[...],
                  preferred_element_type=jnp.float32) + me2_b_ref[...]  # (S, B*L)
    # mu / logvar: block-diagonal (B*L, B*L) weights == per-batch (L -> L) linear
    mu = jnp.dot(lat, mu_w_ref[...],
                 preferred_element_type=jnp.float32) + mu_b_ref[...]
    lv = jnp.dot(lat, lv_w_ref[...],
                 preferred_element_type=jnp.float32) + lv_b_ref[...]
    # reparameterize (lane-dense (S, B*L))
    z = mu + eps_ref[...] * jnp.exp(0.5 * lv)
    # mlp_dec: fc1 -> relu -> fc2
    d = jnp.maximum(jnp.dot(z, md1_w_ref[...],
                            preferred_element_type=jnp.float32) + md1_b_ref[...], 0.0)
    dec = jnp.dot(d, md2_w_ref[...],
                  preferred_element_type=jnp.float32) + md2_b_ref[...]  # (S, B*D)
    dec_ref[...] = dec.astype(dec_ref.dtype)
    mu_ref[...] = mu.astype(mu_ref.dtype)
    lv_ref[...] = lv.astype(lv_ref.dtype)


def bottleneck(h_flat, eps_flat, p):
    S = h_flat.shape[0]
    BD = p["md2_w"].shape[1]
    BL = p["mu_w"].shape[1]
    return pl.pallas_call(
        _bottleneck_kernel,
        out_shape=(jax.ShapeDtypeStruct((S, BD), h_flat.dtype),
                   jax.ShapeDtypeStruct((S, BL), h_flat.dtype),
                   jax.ShapeDtypeStruct((S, BL), h_flat.dtype)),
    )(h_flat, eps_flat,
      p["me1_w"], p["me1_b"], p["me2_w"], p["me2_b"],
      p["mu_w"], p["mu_b"], p["lv_w"], p["lv_b"],
      p["md1_w"], p["md1_b"], p["md2_w"], p["md2_b"])


# --------------------------------- forward -----------------------------------

def vae_forward(params, x, eps):
    """Mirrors VAE.forward: returns (reconstructed, mu, logvar).

    x:   (S, B, D)  sequence-first (batch_first=False)
    eps: (S, B, L)  standard-normal noise for the reparameterization
    """
    S, B, D = x.shape
    L = eps.shape[-1]

    # encoder transformer layer: (B*S, D) layout so S (multiple of 8) stays sublane-aligned
    xb = jnp.transpose(x, (1, 0, 2)).reshape(B * S, D)
    hb = transformer_layer(xb, params["enc_tf"], batch=B, seq=S)        # (B*S, D)

    # PyTorch mlp_enc flattening: (S, B, D) -> (S, B*D)
    h_flat = jnp.transpose(hb.reshape(B, S, D), (1, 0, 2)).reshape(S, B * D)
    dec_in, mu_f, lv_f = bottleneck(h_flat, eps.reshape(S, B * L), params)

    # decoder transformer layer
    db = jnp.transpose(dec_in.reshape(S, B, D), (1, 0, 2)).reshape(B * S, D)
    rb = transformer_layer(db, params["dec_tf"], batch=B, seq=S)        # (B*S, D)
    recon = jnp.transpose(rb.reshape(B, S, D), (1, 0, 2))               # (S, B, D)

    return recon, mu_f.reshape(S, B, L), lv_f.reshape(S, B, L)


# ------------------------- deterministic parameters ---------------------------

def init_params(key, batch_size, d_model, ff_dim, mlp_hidden, latent_dim):
    B, D, F, H, L = batch_size, d_model, ff_dim, mlp_hidden, latent_dim
    keys = iter(jax.random.split(key, 64))

    def dense_t(din, dout):
        """Pre-transposed weight (din, dout) and (1, dout) bias."""
        w = 0.05 * jax.random.normal(next(keys), (din, dout), jnp.float32)
        b = 0.05 * jax.random.normal(next(keys), (1, dout), jnp.float32)
        return w, b

    def tf_layer():
        qkv_w, qkv_b = dense_t(D, 3 * D)          # merged QKV projection
        out_w, out_b = dense_t(D, D)
        ff1_w, ff1_b = dense_t(D, F)
        ff2_w, ff2_b = dense_t(F, D)
        ones = jnp.ones((1, D), jnp.float32)
        zeros = jnp.zeros((1, D), jnp.float32)
        return dict(qkv_w=qkv_w, qkv_b=qkv_b, out_w=out_w, out_b=out_b,
                    ff1_w=ff1_w, ff1_b=ff1_b, ff2_w=ff2_w, ff2_b=ff2_b,
                    ln1_w=ones, ln1_b=zeros, ln2_w=ones, ln2_b=zeros)

    params = dict(enc_tf=tf_layer(), dec_tf=tf_layer())

    # mlp_enc: (B*D -> H -> B*L)
    params["me1_w"], params["me1_b"] = dense_t(B * D, H)
    params["me2_w"], params["me2_b"] = dense_t(H, B * L)

    # fc1 / fc2 (L -> L, applied per batch element) as block-diagonal (B*L, B*L)
    fc1_w, fc1_b = dense_t(L, L)
    fc2_w, fc2_b = dense_t(L, L)
    eye = jnp.eye(B, dtype=jnp.float32)
    params["mu_w"] = jnp.kron(eye, fc1_w)
    params["mu_b"] = jnp.tile(fc1_b, (1, B))
    params["lv_w"] = jnp.kron(eye, fc2_w)
    params["lv_b"] = jnp.tile(fc2_b, (1, B))

    # mlp_dec: (B*L -> H -> B*D)
    params["md1_w"], params["md1_b"] = dense_t(B * L, H)
    params["md2_w"], params["md2_b"] = dense_t(H, B * D)
    return params


# ----------------------------------- main -------------------------------------

if __name__ == "__main__":
    # Small shapes consistent with the module (d_model/ffn scaled down from 4096/2048).
    S, B = 8, 2
    D, F, H, L = 256, 512, 256, 64

    key = jax.random.PRNGKey(0)
    k_params, k_x, k_eps = jax.random.split(key, 3)
    params = init_params(k_params, B, D, F, H, L)
    x = jax.random.normal(k_x, (S, B, D), jnp.float32)       # (seq, batch, d_model)
    eps = jax.random.normal(k_eps, (S, B, L), jnp.float32)   # torch.randn_like(std)

    fwd = jax.jit(vae_forward)
    recon, mu, logvar = fwd(params, x, eps)
    jax.block_until_ready((recon, mu, logvar))

    assert recon.shape == (S, B, D)
    assert mu.shape == (S, B, L)
    assert logvar.shape == (S, B, L)
    assert bool(jnp.all(jnp.isfinite(recon)))
    assert bool(jnp.all(jnp.isfinite(mu))) and bool(jnp.all(jnp.isfinite(logvar)))
    print("KERNEL_OK")
</pallas_src>

<mosaic_0001>
module attributes {stable_mosaic.version = 11 : i64} {
  func.func @_tf_layer_kernel(%arg0: memref<16x256xf32, #tpu.memory_space<vmem>>, %arg1: memref<256x768xf32, #tpu.memory_space<vmem>>, %arg2: memref<1x768xf32, #tpu.memory_space<vmem>>, %arg3: memref<256x256xf32, #tpu.memory_space<vmem>>, %arg4: memref<1x256xf32, #tpu.memory_space<vmem>>, %arg5: memref<1x256xf32, #tpu.memory_space<vmem>>, %arg6: memref<1x256xf32, #tpu.memory_space<vmem>>, %arg7: memref<256x512xf32, #tpu.memory_space<vmem>>, %arg8: memref<1x512xf32, #tpu.memory_space<vmem>>, %arg9: memref<512x256xf32, #tpu.memory_space<vmem>>, %arg10: memref<1x256xf32, #tpu.memory_space<vmem>>, %arg11: memref<1x256xf32, #tpu.memory_space<vmem>>, %arg12: memref<1x256xf32, #tpu.memory_space<vmem>>, %arg13: memref<16x256xf32, #tpu.memory_space<vmem>>) attributes {dimension_semantics = [], scalar_prefetch = 0 : i64, scratch_operands = 0 : i64, tpu.core_type = #tpu.core_type<tc>} {
    %c0 = arith.constant 0 : index
    %c0_0 = arith.constant 0 : index
    %0 = vector.load %arg0[%c0, %c0_0] : memref<16x256xf32, #tpu.memory_space<vmem>>, vector<16x256xf32>
    %c0_1 = arith.constant 0 : index
    %c0_2 = arith.constant 0 : index
    %1 = vector.load %arg1[%c0_1, %c0_2] : memref<256x768xf32, #tpu.memory_space<vmem>>, vector<256x768xf32>
    %cst = arith.constant dense<0.000000e+00> : vector<16x768xf32>
    %2 = tpu.matmul %0, %1, %cst {dimension_numbers = #tpu.dot_dimension_numbers<[1], [0], [0], [1], [0, 0, 1, 1], [], []>} : vector<16x256xf32>, vector<256x768xf32>, vector<16x768xf32> -> vector<16x768xf32>
    %c0_3 = arith.constant 0 : index
    %c0_4 = arith.constant 0 : index
    %3 = vector.load %arg2[%c0_3, %c0_4] : memref<1x768xf32, #tpu.memory_space<vmem>>, vector<1x768xf32>
    %4 = vector.broadcast %3 : vector<1x768xf32> to vector<16x768xf32>
    %5 = arith.addf %2, %4 : vector<16x768xf32>
    %6 = vector.extract_strided_slice %5 {offsets = [0, 0], sizes = [16, 256], strides = [1, 1]} : vector<16x768xf32> to vector<16x256xf32>
    %7 = vector.shape_cast %6 : vector<16x256xf32> to vector<2x8x256xf32>
    %8 = vector.extract_strided_slice %5 {offsets = [0, 256], sizes = [16, 256], strides = [1, 1]} : vector<16x768xf32> to vector<16x256xf32>
    %9 = vector.shape_cast %8 : vector<16x256xf32> to vector<2x8x256xf32>
    %10 = vector.extract_strided_slice %5 {offsets = [0, 512], sizes = [16, 256], strides = [1, 1]} : vector<16x768xf32> to vector<16x256xf32>
    %11 = vector.shape_cast %10 : vector<16x256xf32> to vector<2x8x256xf32>
    "tpu.trace_start"() <{level = 10 : i32, message = "bqd,bkd->bqk"}> : () -> ()
    %cst_5 = arith.constant dense<0.000000e+00> : vector<2x8x8xf32>
    %12 = tpu.matmul %7, %9, %cst_5 {dimension_numbers = #tpu.dot_dimension_numbers<[2], [2], [1], [1], [0, 0, 0, 1, 1, 1], [0], [0]>} : vector<2x8x256xf32>, vector<2x8x256xf32>, vector<2x8x8xf32> -> vector<2x8x8xf32>
    "tpu.trace_stop"() : () -> ()
    %cst_6 = arith.constant 6.250000e-02 : f32
    %13 = vector.broadcast %cst_6 : f32 to vector<2x8x8xf32>
    %14 = arith.mulf %12, %13 : vector<2x8x8xf32>
    %cst_7 = arith.constant dense<0xFF800000> : vector<2x8xf32>
    %15 = vector.multi_reduction <maximumf>, %14, %cst_7 [2] : vector<2x8x8xf32> to vector<2x8xf32>
    %16 = vector.shape_cast %15 : vector<2x8xf32> to vector<2x8x1xf32>
    %17 = vector.broadcast %16 : vector<2x8x1xf32> to vector<2x8x8xf32>
    %18 = arith.subf %14, %17 : vector<2x8x8xf32>
    %19 = math.exp %18 : vector<2x8x8xf32>
    %cst_8 = arith.constant dense<0.000000e+00> : vector<2x8xf32>
    %20 = vector.multi_reduction <add>, %19, %cst_8 [2] : vector<2x8x8xf32> to vector<2x8xf32>
    %21 = vector.shape_cast %20 : vector<2x8xf32> to vector<2x8x1xf32>
    %22 = vector.broadcast %21 : vector<2x8x1xf32> to vector<2x8x8xf32>
    %23 = arith.divf %19, %22 : vector<2x8x8xf32>
    "tpu.trace_start"() <{level = 10 : i32, message = "bqk,bkd->bqd"}> : () -> ()
    %cst_9 = arith.constant dense<0.000000e+00> : vector<2x8x256xf32>
    %24 = tpu.matmul %23, %11, %cst_9 {dimension_numbers = #tpu.dot_dimension_numbers<[2], [1], [1], [2], [0, 0, 0, 1, 1, 2], [0], [0]>} : vector<2x8x8xf32>, vector<2x8x256xf32>, vector<2x8x256xf32> -> vector<2x8x256xf32>
    "tpu.trace_stop"() : () -> ()
    %25 = vector.shape_cast %24 : vector<2x8x256xf32> to vector<16x256xf32>
    %c0_10 = arith.constant 0 : index
    %c0_11 = arith.constant 0 : index
    %26 = vector.load %arg3[%c0_10, %c0_11] : memref<256x256xf32, #tpu.memory_space<vmem>>, vector<256x256xf32>
    %cst_12 = arith.constant dense<0.000000e+00> : vector<16x256xf32>
    %27 = tpu.matmul %25, %26, %cst_12 {dimension_numbers = #tpu.dot_dimension_numbers<[1], [0], [0], [1], [0, 0, 1, 1], [], []>} : vector<16x256xf32>, vector<256x256xf32>, vector<16x256xf32> -> vector<16x256xf32>
    %c0_13 = arith.constant 0 : index
    %c0_14 = arith.constant 0 : index
    %28 = vector.load %arg4[%c0_13, %c0_14] : memref<1x256xf32, #tpu.memory_space<vmem>>, vector<1x256xf32>
    %29 = vector.broadcast %28 : vector<1x256xf32> to vector<16x256xf32>
    %30 = arith.addf %27, %29 : vector<16x256xf32>
    %31 = arith.addf %0, %30 : vector<16x256xf32>
    %c0_15 = arith.constant 0 : index
    %c0_16 = arith.constant 0 : index
    %32 = vector.load %arg5[%c0_15, %c0_16] : memref<1x256xf32, #tpu.memory_space<vmem>>, vector<1x256xf32>
    %c0_17 = arith.constant 0 : index
    %c0_18 = arith.constant 0 : index
    %33 = vector.load %arg6[%c0_17, %c0_18] : memref<1x256xf32, #tpu.memory_space<vmem>>, vector<1x256xf32>
    %cst_19 = arith.constant dense<0.000000e+00> : vector<16xf32>
    %34 = vector.multi_reduction <add>, %31, %cst_19 [1] : vector<16x256xf32> to vector<16xf32>
    %35 = vector.shape_cast %34 : vector<16xf32> to vector<16x1xf32>
    %cst_20 = arith.constant 2.560000e+02 : f32
    %36 = vector.broadcast %cst_20 : f32 to vector<16x1xf32>
    %37 = arith.divf %35, %36 : vector<16x1xf32>
    %38 = vector.broadcast %37 : vector<16x1xf32> to vector<16x256xf32>
    %39 = arith.subf %31, %38 : vector<16x256xf32>
    %40 = vector.broadcast %37 : vector<16x1xf32> to vector<16x256xf32>
    %41 = arith.subf %31, %40 : vector<16x256xf32>
    %42 = arith.mulf %39, %41 : vector<16x256xf32>
    %cst_21 = arith.constant dense<0.000000e+00> : vector<16xf32>
    %43 = vector.multi_reduction <add>, %42, %cst_21 [1] : vector<16x256xf32> to vector<16xf32>
    %44 = vector.shape_cast %43 : vector<16xf32> to vector<16x1xf32>
    %cst_22 = arith.constant 2.560000e+02 : f32
    %45 = vector.broadcast %cst_22 : f32 to vector<16x1xf32>
    %46 = arith.divf %44, %45 : vector<16x1xf32>
    %47 = vector.broadcast %37 : vector<16x1xf32> to vector<16x256xf32>
    %48 = arith.subf %31, %47 : vector<16x256xf32>
    %cst_23 = arith.constant 9.99999974E-6 : f32
    %49 = vector.broadcast %cst_23 : f32 to vector<16x1xf32>
    %50 = arith.addf %46, %49 : vector<16x1xf32>
    %51 = math.rsqrt %50 : vector<16x1xf32>
    %52 = vector.broadcast %51 : vector<16x1xf32> to vector<16x256xf32>
    %53 = arith.mulf %48, %52 : vector<16x256xf32>
    %54 = vector.broadcast %32 : vector<1x256xf32> to vector<16x256xf32>
    %55 = arith.mulf %53, %54 : vector<16x256xf32>
    %56 = vector.broadcast %33 : vector<1x256xf32> to vector<16x256xf32>
    %57 = arith.addf %55, %56 : vector<16x256xf32>
    %c0_24 = arith.constant 0 : index
    %c0_25 = arith.constant 0 : index
    %58 = vector.load %arg7[%c0_24, %c0_25] : memref<256x512xf32, #tpu.memory_space<vmem>>, vector<256x512xf32>
    %cst_26 = arith.constant dense<0.000000e+00> : vector<16x512xf32>
    %59 = tpu.matmul %57, %58, %cst_26 {dimension_numbers = #tpu.dot_dimension_numbers<[1], [0], [0], [1], [0, 0, 1, 1], [], []>} : vector<16x256xf32>, vector<256x512xf32>, vector<16x512xf32> -> vector<16x512xf32>
    %c0_27 = arith.constant 0 : index
    %c0_28 = arith.constant 0 : index
    %60 = vector.load %arg8[%c0_27, %c0_28] : memref<1x512xf32, #tpu.memory_space<vmem>>, vector<1x512xf32>
    %61 = vector.broadcast %60 : vector<1x512xf32> to vector<16x512xf32>
    %62 = arith.addf %59, %61 : vector<16x512xf32>
    %cst_29 = arith.constant 0.000000e+00 : f32
    %63 = vector.broadcast %cst_29 : f32 to vector<16x512xf32>
    %64 = arith.maximumf %62, %63 : vector<16x512xf32>
    %c0_30 = arith.constant 0 : index
    %c0_31 = arith.constant 0 : index
    %65 = vector.load %arg9[%c0_30, %c0_31] : memref<512x256xf32, #tpu.memory_space<vmem>>, vector<512x256xf32>
    %cst_32 = arith.constant dense<0.000000e+00> : vector<16x256xf32>
    %66 = tpu.matmul %64, %65, %cst_32 {dimension_numbers = #tpu.dot_dimension_numbers<[1], [0], [0], [1], [0, 0, 1, 1], [], []>} : vector<16x512xf32>, vector<512x256xf32>, vector<16x256xf32> -> vector<16x256xf32>
    %c0_33 = arith.constant 0 : index
    %c0_34 = arith.constant 0 : index
    %67 = vector.load %arg10[%c0_33, %c0_34] : memref<1x256xf32, #tpu.memory_space<vmem>>, vector<1x256xf32>
    %68 = vector.broadcast %67 : vector<1x256xf32> to vector<16x256xf32>
    %69 = arith.addf %66, %68 : vector<16x256xf32>
    %70 = arith.addf %57, %69 : vector<16x256xf32>
    %c0_35 = arith.constant 0 : index
    %c0_36 = arith.constant 0 : index
    %71 = vector.load %arg11[%c0_35, %c0_36] : memref<1x256xf32, #tpu.memory_space<vmem>>, vector<1x256xf32>
    %c0_37 = arith.constant 0 : index
    %c0_38 = arith.constant 0 : index
    %72 = vector.load %arg12[%c0_37, %c0_38] : memref<1x256xf32, #tpu.memory_space<vmem>>, vector<1x256xf32>
    %cst_39 = arith.constant dense<0.000000e+00> : vector<16xf32>
    %73 = vector.multi_reduction <add>, %70, %cst_39 [1] : vector<16x256xf32> to vector<16xf32>
    %74 = vector.shape_cast %73 : vector<16xf32> to vector<16x1xf32>
    %cst_40 = arith.constant 2.560000e+02 : f32
    %75 = vector.broadcast %cst_40 : f32 to vector<16x1xf32>
    %76 = arith.divf %74, %75 : vector<16x1xf32>
    %77 = vector.broadcast %76 : vector<16x1xf32> to vector<16x256xf32>
    %78 = arith.subf %70, %77 : vector<16x256xf32>
    %79 = vector.broadcast %76 : vector<16x1xf32> to vector<16x256xf32>
    %80 = arith.subf %70, %79 : vector<16x256xf32>
    %81 = arith.mulf %78, %80 : vector<16x256xf32>
    %cst_41 = arith.constant dense<0.000000e+00> : vector<16xf32>
    %82 = vector.multi_reduction <add>, %81, %cst_41 [1] : vector<16x256xf32> to vector<16xf32>
    %83 = vector.shape_cast %82 : vector<16xf32> to vector<16x1xf32>
    %cst_42 = arith.constant 2.560000e+02 : f32
    %84 = vector.broadcast %cst_42 : f32 to vector<16x1xf32>
    %85 = arith.divf %83, %84 : vector<16x1xf32>
    %86 = vector.broadcast %76 : vector<16x1xf32> to vector<16x256xf32>
    %87 = arith.subf %70, %86 : vector<16x256xf32>
    %cst_43 = arith.constant 9.99999974E-6 : f32
    %88 = vector.broadcast %cst_43 : f32 to vector<16x1xf32>
    %89 = arith.addf %85, %88 : vector<16x1xf32>
    %90 = math.rsqrt %89 : vector<16x1xf32>
    %91 = vector.broadcast %90 : vector<16x1xf32> to vector<16x256xf32>
    %92 = arith.mulf %87, %91 : vector<16x256xf32>
    %93 = vector.broadcast %71 : vector<1x256xf32> to vector<16x256xf32>
    %94 = arith.mulf %92, %93 : vector<16x256xf32>
    %95 = vector.broadcast %72 : vector<1x256xf32> to vector<16x256xf32>
    %96 = arith.addf %94, %95 : vector<16x256xf32>
    %c0_44 = arith.constant 0 : index
    %c0_45 = arith.constant 0 : index
    %97 = vector.load %arg13[%c0_44, %c0_45] : memref<16x256xf32, #tpu.memory_space<vmem>>, vector<16x256xf32>
    tpu.vector_store %arg13[%c0_44, %c0_45], %96 {strides = array<i32>} : memref<16x256xf32, #tpu.memory_space<vmem>>, vector<16x256xf32>,
    return
  }
}

module attributes {stable_mosaic.version = 11 : i64} {
  func.func @_bottleneck_kernel(%arg0: memref<8x512xf32, #tpu.memory_space<vmem>>, %arg1: memref<8x128xf32, #tpu.memory_space<vmem>>, %arg2: memref<512x256xf32, #tpu.memory_space<vmem>>, %arg3: memref<1x256xf32, #tpu.memory_space<vmem>>, %arg4: memref<256x128xf32, #tpu.memory_space<vmem>>, %arg5: memref<1x128xf32, #tpu.memory_space<vmem>>, %arg6: memref<128x128xf32, #tpu.memory_space<vmem>>, %arg7: memref<1x128xf32, #tpu.memory_space<vmem>>, %arg8: memref<128x128xf32, #tpu.memory_space<vmem>>, %arg9: memref<1x128xf32, #tpu.memory_space<vmem>>, %arg10: memref<128x256xf32, #tpu.memory_space<vmem>>, %arg11: memref<1x256xf32, #tpu.memory_space<vmem>>, %arg12: memref<256x512xf32, #tpu.memory_space<vmem>>, %arg13: memref<1x512xf32, #tpu.memory_space<vmem>>, %arg14: memref<8x512xf32, #tpu.memory_space<vmem>>, %arg15: memref<8x128xf32, #tpu.memory_space<vmem>>, %arg16: memref<8x128xf32, #tpu.memory_space<vmem>>) attributes {dimension_semantics = [], scalar_prefetch = 0 : i64, scratch_operands = 0 : i64, tpu.core_type = #tpu.core_type<tc>} {
    %c0 = arith.constant 0 : index
    %c0_0 = arith.constant 0 : index
    %0 = vector.load %arg0[%c0, %c0_0] : memref<8x512xf32, #tpu.memory_space<vmem>>, vector<8x512xf32>
    %c0_1 = arith.constant 0 : index
    %c0_2 = arith.constant 0 : index
    %1 = vector.load %arg2[%c0_1, %c0_2] : memref<512x256xf32, #tpu.memory_space<vmem>>, vector<512x256xf32>
    %cst = arith.constant dense<0.000000e+00> : vector<8x256xf32>
    %2 = tpu.matmul %0, %1, %cst {dimension_numbers = #tpu.dot_dimension_numbers<[1], [0], [0], [1], [0, 0, 1, 1], [], []>} : vector<8x512xf32>, vector<512x256xf32>, vector<8x256xf32> -> vector<8x256xf32>
    %c0_3 = arith.constant 0 : index
    %c0_4 = arith.constant 0 : index
    %3 = vector.load %arg3[%c0_3, %c0_4] : memref<1x256xf32, #tpu.memory_space<vmem>>, vector<1x256xf32>
    %4 = vector.broadcast %3 : vector<1x256xf32> to vector<8x256xf32>
    %5 = arith.addf %2, %4 : vector<8x256xf32>
    %cst_5 = arith.constant 0.000000e+00 : f32
    %6 = vector.broadcast %cst_5 : f32 to vector<8x256xf32>
    %7 = arith.maximumf %5, %6 : vector<8x256xf32>
    %c0_6 = arith.constant 0 : index
    %c0_7 = arith.constant 0 : index
    %8 = vector.load %arg4[%c0_6, %c0_7] : memref<256x128xf32, #tpu.memory_space<vmem>>, vector<256x128xf32>
    %cst_8 = arith.constant dense<0.000000e+00> : vector<8x128xf32>
    %9 = tpu.matmul %7, %8, %cst_8 {dimension_numbers = #tpu.dot_dimension_numbers<[1], [0], [0], [1], [0, 0, 1, 1], [], []>} : vector<8x256xf32>, vector<256x128xf32>, vector<8x128xf32> -> vector<8x128xf32>
    %c0_9 = arith.constant 0 : index
    %c0_10 = arith.constant 0 : index
    %10 = vector.load %arg5[%c0_9, %c0_10] : memref<1x128xf32, #tpu.memory_space<vmem>>, vector<1x128xf32>
    %11 = vector.broadcast %10 : vector<1x128xf32> to vector<8x128xf32>
    %12 = arith.addf %9, %11 : vector<8x128xf32>
    %c0_11 = arith.constant 0 : index
    %c0_12 = arith.constant 0 : index
    %13 = vector.load %arg6[%c0_11, %c0_12] : memref<128x128xf32, #tpu.memory_space<vmem>>, vector<128x128xf32>
    %cst_13 = arith.constant dense<0.000000e+00> : vector<8x128xf32>
    %14 = tpu.matmul %12, %13, %cst_13 {dimension_numbers = #tpu.dot_dimension_numbers<[1], [0], [0], [1], [0, 0, 1, 1], [], []>} : vector<8x128xf32>, vector<128x128xf32>, vector<8x128xf32> -> vector<8x128xf32>
    %c0_14 = arith.constant 0 : index
    %c0_15 = arith.constant 0 : index
    %15 = vector.load %arg7[%c0_14, %c0_15] : memref<1x128xf32, #tpu.memory_space<vmem>>, vector<1x128xf32>
    %16 = vector.broadcast %15 : vector<1x128xf32> to vector<8x128xf32>
    %17 = arith.addf %14, %16 : vector<8x128xf32>
    %c0_16 = arith.constant 0 : index
    %c0_17 = arith.constant 0 : index
    %18 = vector.load %arg8[%c0_16, %c0_17] : memref<128x128xf32, #tpu.memory_space<vmem>>, vector<128x128xf32>
    %cst_18 = arith.constant dense<0.000000e+00> : vector<8x128xf32>
    %19 = tpu.matmul %12, %18, %cst_18 {dimension_numbers = #tpu.dot_dimension_numbers<[1], [0], [0], [1], [0, 0, 1, 1], [], []>} : vector<8x128xf32>, vector<128x128xf32>, vector<8x128xf32> -> vector<8x128xf32>
    %c0_19 = arith.constant 0 : index
    %c0_20 = arith.constant 0 : index
    %20 = vector.load %arg9[%c0_19, %c0_20] : memref<1x128xf32, #tpu.memory_space<vmem>>, vector<1x128xf32>
    %21 = vector.broadcast %20 : vector<1x128xf32> to vector<8x128xf32>
    %22 = arith.addf %19, %21 : vector<8x128xf32>
    %c0_21 = arith.constant 0 : index
    %c0_22 = arith.constant 0 : index
    %23 = vector.load %arg1[%c0_21, %c0_22] : memref<8x128xf32, #tpu.memory_space<vmem>>, vector<8x128xf32>
    %cst_23 = arith.constant 5.000000e-01 : f32
    %24 = vector.broadcast %cst_23 : f32 to vector<8x128xf32>
    %25 = arith.mulf %24, %22 : vector<8x128xf32>
    %26 = math.exp %25 : vector<8x128xf32>
    %27 = arith.mulf %23, %26 : vector<8x128xf32>
    %28 = arith.addf %17, %27 : vector<8x128xf32>
    %c0_24 = arith.constant 0 : index
    %c0_25 = arith.constant 0 : index
    %29 = vector.load %arg10[%c0_24, %c0_25] : memref<128x256xf32, #tpu.memory_space<vmem>>, vector<128x256xf32>
    %cst_26 = arith.constant dense<0.000000e+00> : vector<8x256xf32>
    %30 = tpu.matmul %28, %29, %cst_26 {dimension_numbers = #tpu.dot_dimension_numbers<[1], [0], [0], [1], [0, 0, 1, 1], [], []>} : vector<8x128xf32>, vector<128x256xf32>, vector<8x256xf32> -> vector<8x256xf32>
    %c0_27 = arith.constant 0 : index
    %c0_28 = arith.constant 0 : index
    %31 = vector.load %arg11[%c0_27, %c0_28] : memref<1x256xf32, #tpu.memory_space<vmem>>, vector<1x256xf32>
    %32 = vector.broadcast %31 : vector<1x256xf32> to vector<8x256xf32>
    %33 = arith.addf %30, %32 : vector<8x256xf32>
    %cst_29 = arith.constant 0.000000e+00 : f32
    %34 = vector.broadcast %cst_29 : f32 to vector<8x256xf32>
    %35 = arith.maximumf %33, %34 : vector<8x256xf32>
    %c0_30 = arith.constant 0 : index
    %c0_31 = arith.constant 0 : index
    %36 = vector.load %arg12[%c0_30, %c0_31] : memref<256x512xf32, #tpu.memory_space<vmem>>, vector<256x512xf32>
    %cst_32 = arith.constant dense<0.000000e+00> : vector<8x512xf32>
    %37 = tpu.matmul %35, %36, %cst_32 {dimension_numbers = #tpu.dot_dimension_numbers<[1], [0], [0], [1], [0, 0, 1, 1], [], []>} : vector<8x256xf32>, vector<256x512xf32>, vector<8x512xf32> -> vector<8x512xf32>
    %c0_33 = arith.constant 0 : index
    %c0_34 = arith.constant 0 : index
    %38 = vector.load %arg13[%c0_33, %c0_34] : memref<1x512xf32, #tpu.memory_space<vmem>>, vector<1x512xf32>
    %39 = vector.broadcast %38 : vector<1x512xf32> to vector<8x512xf32>
    %40 = arith.addf %37, %39 : vector<8x512xf32>
    %c0_35 = arith.constant 0 : index
    %c0_36 = arith.constant 0 : index
    %41 = vector.load %arg14[%c0_35, %c0_36] : memref<8x512xf32, #tpu.memory_space<vmem>>, vector<8x512xf32>
    tpu.vector_store %arg14[%c0_35, %c0_36], %40 {strides = array<i32>} : memref<8x512xf32, #tpu.memory_space<vmem>>, vector<8x512xf32>,
    %c0_37 = arith.constant 0 : index
    %c0_38 = arith.constant 0 : index
    %42 = vector.load %arg15[%c0_37, %c0_38] : memref<8x128xf32, #tpu.memory_space<vmem>>, vector<8x128xf32>
    tpu.vector_store %arg15[%c0_37, %c0_38], %17 {strides = array<i32>} : memref<8x128xf32, #tpu.memory_space<vmem>>, vector<8x128xf32>,
    %c0_39 = arith.constant 0 : index
    %c0_40 = arith.constant 0 : index
    %43 = vector.load %arg16[%c0_39, %c0_40] : memref<8x128xf32, #tpu.memory_space<vmem>>, vector<8x128xf32>
    tpu.vector_store %arg16[%c0_39, %c0_40], %22 {strides = array<i32>} : memref<8x128xf32, #tpu.memory_space<vmem>>, vector<8x128xf32>,
    return
  }
}

module attributes {stable_mosaic.version = 11 : i64} {
  func.func @_tf_layer_kernel(%arg0: memref<16x256xf32, #tpu.memory_space<vmem>>, %arg1: memref<256x768xf32, #tpu.memory_space<vmem>>, %arg2: memref<1x768xf32, #tpu.memory_space<vmem>>, %arg3: memref<256x256xf32, #tpu.memory_space<vmem>>, %arg4: memref<1x256xf32, #tpu.memory_space<vmem>>, %arg5: memref<1x256xf32, #tpu.memory_space<vmem>>, %arg6: memref<1x256xf32, #tpu.memory_space<vmem>>, %arg7: memref<256x512xf32, #tpu.memory_space<vmem>>, %arg8: memref<1x512xf32, #tpu.memory_space<vmem>>, %arg9: memref<512x256xf32, #tpu.memory_space<vmem>>, %arg10: memref<1x256xf32, #tpu.memory_space<vmem>>, %arg11: memref<1x256xf32, #tpu.memory_space<vmem>>, %arg12: memref<1x256xf32, #tpu.memory_space<vmem>>, %arg13: memref<16x256xf32, #tpu.memory_space<vmem>>) attributes {dimension_semantics = [], scalar_prefetch = 0 : i64, scratch_operands = 0 : i64, tpu.core_type = #tpu.core_type<tc>} {
    %c0 = arith.constant 0 : index
    %c0_0 = arith.constant 0 : index
    %0 = vector.load %arg0[%c0, %c0_0] : memref<16x256xf32, #tpu.memory_space<vmem>>, vector<16x256xf32>
    %c0_1 = arith.constant 0 : index
    %c0_2 = arith.constant 0 : index
    %1 = vector.load %arg1[%c0_1, %c0_2] : memref<256x768xf32, #tpu.memory_space<vmem>>, vector<256x768xf32>
    %cst = arith.constant dense<0.000000e+00> : vector<16x768xf32>
    %2 = tpu.matmul %0, %1, %cst {dimension_numbers = #tpu.dot_dimension_numbers<[1], [0], [0], [1], [0, 0, 1, 1], [], []>} : vector<16x256xf32>, vector<256x768xf32>, vector<16x768xf32> -> vector<16x768xf32>
    %c0_3 = arith.constant 0 : index
    %c0_4 = arith.constant 0 : index
    %3 = vector.load %arg2[%c0_3, %c0_4] : memref<1x768xf32, #tpu.memory_space<vmem>>, vector<1x768xf32>
    %4 = vector.broadcast %3 : vector<1x768xf32> to vector<16x768xf32>
    %5 = arith.addf %2, %4 : vector<16x768xf32>
    %6 = vector.extract_strided_slice %5 {offsets = [0, 0], sizes = [16, 256], strides = [1, 1]} : vector<16x768xf32> to vector<16x256xf32>
    %7 = vector.shape_cast %6 : vector<16x256xf32> to vector<2x8x256xf32>
    %8 = vector.extract_strided_slice %5 {offsets = [0, 256], sizes = [16, 256], strides = [1, 1]} : vector<16x768xf32> to vector<16x256xf32>
    %9 = vector.shape_cast %8 : vector<16x256xf32> to vector<2x8x256xf32>
    %10 = vector.extract_strided_slice %5 {offsets = [0, 512], sizes = [16, 256], strides = [1, 1]} : vector<16x768xf32> to vector<16x256xf32>
    %11 = vector.shape_cast %10 : vector<16x256xf32> to vector<2x8x256xf32>
    "tpu.trace_start"() <{level = 10 : i32, message = "bqd,bkd->bqk"}> : () -> ()
    %cst_5 = arith.constant dense<0.000000e+00> : vector<2x8x8xf32>
    %12 = tpu.matmul %7, %9, %cst_5 {dimension_numbers = #tpu.dot_dimension_numbers<[2], [2], [1], [1], [0, 0, 0, 1, 1, 1], [0], [0]>} : vector<2x8x256xf32>, vector<2x8x256xf32>, vector<2x8x8xf32> -> vector<2x8x8xf32>
    "tpu.trace_stop"() : () -> ()
    %cst_6 = arith.constant 6.250000e-02 : f32
    %13 = vector.broadcast %cst_6 : f32 to vector<2x8x8xf32>
    %14 = arith.mulf %12, %13 : vector<2x8x8xf32>
    %cst_7 = arith.constant dense<0xFF800000> : vector<2x8xf32>
    %15 = vector.multi_reduction <maximumf>, %14, %cst_7 [2] : vector<2x8x8xf32> to vector<2x8xf32>
    %16 = vector.shape_cast %15 : vector<2x8xf32> to vector<2x8x1xf32>
    %17 = vector.broadcast %16 : vector<2x8x1xf32> to vector<2x8x8xf32>
    %18 = arith.subf %14, %17 : vector<2x8x8xf32>
    %19 = math.exp %18 : vector<2x8x8xf32>
    %cst_8 = arith.constant dense<0.000000e+00> : vector<2x8xf32>
    %20 = vector.multi_reduction <add>, %19, %cst_8 [2] : vector<2x8x8xf32> to vector<2x8xf32>
    %21 = vector.shape_cast %20 : vector<2x8xf32> to vector<2x8x1xf32>
    %22 = vector.broadcast %21 : vector<2x8x1xf32> to vector<2x8x8xf32>
    %23 = arith.divf %19, %22 : vector<2x8x8xf32>
    "tpu.trace_start"() <{level = 10 : i32, message = "bqk,bkd->bqd"}> : () -> ()
    %cst_9 = arith.constant dense<0.000000e+00> : vector<2x8x256xf32>
    %24 = tpu.matmul %23, %11, %cst_9 {dimension_numbers = #tpu.dot_dimension_numbers<[2], [1], [1], [2], [0, 0, 0, 1, 1, 2], [0], [0]>} : vector<2x8x8xf32>, vector<2x8x256xf32>, vector<2x8x256xf32> -> vector<2x8x256xf32>
    "tpu.trace_stop"() : () -> ()
    %25 = vector.shape_cast %24 : vector<2x8x256xf32> to vector<16x256xf32>
    %c0_10 = arith.constant 0 : index
    %c0_11 = arith.constant 0 : index
    %26 = vector.load %arg3[%c0_10, %c0_11] : memref<256x256xf32, #tpu.memory_space<vmem>>, vector<256x256xf32>
    %cst_12 = arith.constant dense<0.000000e+00> : vector<16x256xf32>
    %27 = tpu.matmul %25, %26, %cst_12 {dimension_numbers = #tpu.dot_dimension_numbers<[1], [0], [0], [1], [0, 0, 1, 1], [], []>} : vector<16x256xf32>, vector<256x256xf32>, vector<16x256xf32> -> vector<16x256xf32>
    %c0_13 = arith.constant 0 : index
    %c0_14 = arith.constant 0 : index
    %28 = vector.load %arg4[%c0_13, %c0_14] : memref<1x256xf32, #tpu.memory_space<vmem>>, vector<1x256xf32>
    %29 = vector.broadcast %28 : vector<1x256xf32> to vector<16x256xf32>
    %30 = arith.addf %27, %29 : vector<16x256xf32>
    %31 = arith.addf %0, %30 : vector<16x256xf32>
    %c0_15 = arith.constant 0 : index
    %c0_16 = arith.constant 0 : index
    %32 = vector.load %arg5[%c0_15, %c0_16] : memref<1x256xf32, #tpu.memory_space<vmem>>, vector<1x256xf32>
    %c0_17 = arith.constant 0 : index
    %c0_18 = arith.constant 0 : index
    %33 = vector.load %arg6[%c0_17, %c0_18] : memref<1x256xf32, #tpu.memory_space<vmem>>, vector<1x256xf32>
    %cst_19 = arith.constant dense<0.000000e+00> : vector<16xf32>
    %34 = vector.multi_reduction <add>, %31, %cst_19 [1] : vector<16x256xf32> to vector<16xf32>
    %35 = vector.shape_cast %34 : vector<16xf32> to vector<16x1xf32>
    %cst_20 = arith.constant 2.560000e+02 : f32
    %36 = vector.broadcast %cst_20 : f32 to vector<16x1xf32>
    %37 = arith.divf %35, %36 : vector<16x1xf32>
    %38 = vector.broadcast %37 : vector<16x1xf32> to vector<16x256xf32>
    %39 = arith.subf %31, %38 : vector<16x256xf32>
    %40 = vector.broadcast %37 : vector<16x1xf32> to vector<16x256xf32>
    %41 = arith.subf %31, %40 : vector<16x256xf32>
    %42 = arith.mulf %39, %41 : vector<16x256xf32>
    %cst_21 = arith.constant dense<0.000000e+00> : vector<16xf32>
    %43 = vector.multi_reduction <add>, %42, %cst_21 [1] : vector<16x256xf32> to vector<16xf32>
    %44 = vector.shape_cast %43 : vector<16xf32> to vector<16x1xf32>
    %cst_22 = arith.constant 2.560000e+02 : f32
    %45 = vector.broadcast %cst_22 : f32 to vector<16x1xf32>
    %46 = arith.divf %44, %45 : vector<16x1xf32>
    %47 = vector.broadcast %37 : vector<16x1xf32> to vector<16x256xf32>
    %48 = arith.subf %31, %47 : vector<16x256xf32>
    %cst_23 = arith.constant 9.99999974E-6 : f32
    %49 = vector.broadcast %cst_23 : f32 to vector<16x1xf32>
    %50 = arith.addf %46, %49 : vector<16x1xf32>
    %51 = math.rsqrt %50 : vector<16x1xf32>
    %52 = vector.broadcast %51 : vector<16x1xf32> to vector<16x256xf32>
    %53 = arith.mulf %48, %52 : vector<16x256xf32>
    %54 = vector.broadcast %32 : vector<1x256xf32> to vector<16x256xf32>
    %55 = arith.mulf %53, %54 : vector<16x256xf32>
    %56 = vector.broadcast %33 : vector<1x256xf32> to vector<16x256xf32>
    %57 = arith.addf %55, %56 : vector<16x256xf32>
    %c0_24 = arith.constant 0 : index
    %c0_25 = arith.constant 0 : index
    %58 = vector.load %arg7[%c0_24, %c0_25] : memref<256x512xf32, #tpu.memory_space<vmem>>, vector<256x512xf32>
    %cst_26 = arith.constant dense<0.000000e+00> : vector<16x512xf32>
    %59 = tpu.matmul %57, %58, %cst_26 {dimension_numbers = #tpu.dot_dimension_numbers<[1], [0], [0], [1], [0, 0, 1, 1], [], []>} : vector<16x256xf32>, vector<256x512xf32>, vector<16x512xf32> -> vector<16x512xf32>
    %c0_27 = arith.constant 0 : index
    %c0_28 = arith.constant 0 : index
    %60 = vector.load %arg8[%c0_27, %c0_28] : memref<1x512xf32, #tpu.memory_space<vmem>>, vector<1x512xf32>
    %61 = vector.broadcast %60 : vector<1x512xf32> to vector<16x512xf32>
    %62 = arith.addf %59, %61 : vector<16x512xf32>
    %cst_29 = arith.constant 0.000000e+00 : f32
    %63 = vector.broadcast %cst_29 : f32 to vector<16x512xf32>
    %64 = arith.maximumf %62, %63 : vector<16x512xf32>
    %c0_30 = arith.constant 0 : index
    %c0_31 = arith.constant 0 : index
    %65 = vector.load %arg9[%c0_30, %c0_31] : memref<512x256xf32, #tpu.memory_space<vmem>>, vector<512x256xf32>
    %cst_32 = arith.constant dense<0.000000e+00> : vector<16x256xf32>
    %66 = tpu.matmul %64, %65, %cst_32 {dimension_numbers = #tpu.dot_dimension_numbers<[1], [0], [0], [1], [0, 0, 1, 1], [], []>} : vector<16x512xf32>, vector<512x256xf32>, vector<16x256xf32> -> vector<16x256xf32>
    %c0_33 = arith.constant 0 : index
    %c0_34 = arith.constant 0 : index
    %67 = vector.load %arg10[%c0_33, %c0_34] : memref<1x256xf32, #tpu.memory_space<vmem>>, vector<1x256xf32>
    %68 = vector.broadcast %67 : vector<1x256xf32> to vector<16x256xf32>
    %69 = arith.addf %66, %68 : vector<16x256xf32>
    %70 = arith.addf %57, %69 : vector<16x256xf32>
    %c0_35 = arith.constant 0 : index
    %c0_36 = arith.constant 0 : index
    %71 = vector.load %arg11[%c0_35, %c0_36] : memref<1x256xf32, #tpu.memory_space<vmem>>, vector<1x256xf32>
    %c0_37 = arith.constant 0 : index
    %c0_38 = arith.constant 0 : index
    %72 = vector.load %arg12[%c0_37, %c0_38] : memref<1x256xf32, #tpu.memory_space<vmem>>, vector<1x256xf32>
    %cst_39 = arith.constant dense<0.000000e+00> : vector<16xf32>
    %73 = vector.multi_reduction <add>, %70, %cst_39 [1] : vector<16x256xf32> to vector<16xf32>
    %74 = vector.shape_cast %73 : vector<16xf32> to vector<16x1xf32>
    %cst_40 = arith.constant 2.560000e+02 : f32
    %75 = vector.broadcast %cst_40 : f32 to vector<16x1xf32>
    %76 = arith.divf %74, %75 : vector<16x1xf32>
    %77 = vector.broadcast %76 : vector<16x1xf32> to vector<16x256xf32>
    %78 = arith.subf %70, %77 : vector<16x256xf32>
    %79 = vector.broadcast %76 : vector<16x1xf32> to vector<16x256xf32>
    %80 = arith.subf %70, %79 : vector<16x256xf32>
    %81 = arith.mulf %78, %80 : vector<16x256xf32>
    %cst_41 = arith.constant dense<0.000000e+00> : vector<16xf32>
    %82 = vector.multi_reduction <add>, %81, %cst_41 [1] : vector<16x256xf32> to vector<16xf32>
    %83 = vector.shape_cast %82 : vector<16xf32> to vector<16x1xf32>
    %cst_42 = arith.constant 2.560000e+02 : f32
    %84 = vector.broadcast %cst_42 : f32 to vector<16x1xf32>
    %85 = arith.divf %83, %84 : vector<16x1xf32>
    %86 = vector.broadcast %76 : vector<16x1xf32> to vector<16x256xf32>
    %87 = arith.subf %70, %86 : vector<16x256xf32>
    %cst_43 = arith.constant 9.99999974E-6 : f32
    %88 = vector.broadcast %cst_43 : f32 to vector<16x1xf32>
    %89 = arith.addf %85, %88 : vector<16x1xf32>
    %90 = math.rsqrt %89 : vector<16x1xf32>
    %91 = vector.broadcast %90 : vector<16x1xf32> to vector<16x256xf32>
    %92 = arith.mulf %87, %91 : vector<16x256xf32>
    %93 = vector.broadcast %71 : vector<1x256xf32> to vector<16x256xf32>
    %94 = arith.mulf %92, %93 : vector<16x256xf32>
    %95 = vector.broadcast %72 : vector<1x256xf32> to vector<16x256xf32>
    %96 = arith.addf %94, %95 : vector<16x256xf32>
    %c0_44 = arith.constant 0 : index
    %c0_45 = arith.constant 0 : index
    %97 = vector.load %arg13[%c0_44, %c0_45] : memref<16x256xf32, #tpu.memory_space<vmem>>, vector<16x256xf32>
    tpu.vector_store %arg13[%c0_44, %c0_45], %96 {strides = array<i32>} : memref<16x256xf32, #tpu.memory_space<vmem>>, vector<16x256xf32>,
    return
  }
}

</mosaic_0001>

<bundles_post_ra>
// kernel: vae_forward.4
= control target key start
LH: loop header
LB: loop body
LE: loop exit
PB: predicated region body
PF: predicated region fallthrough
CT: control target
= control target key end

     0   :  { %s2823_s0 = inlined_call_operand.vmem [shape: f32[8,512], index: 0, kind: input, shape index: {}]   ;;  %s2824_s1 = inlined_call_operand.vmem [shape: f32[8,128], index: 1, kind: input, shape index: {}]   ;;  %s2825_s2 = inlined_call_operand.vmem [shape: f32[512,256], index: 2, kind: input, shape index: {}]   ;;  %s2826_s3 = inlined_call_operand.vmem [shape: f32[1,256], index: 3, kind: input, shape index: {}]   ;;  %s2827_s4 = inlined_call_operand.vmem [shape: f32[256,128], index: 4, kind: input, shape index: {}]   ;;  %s2828_s5 = inlined_call_operand.vmem [shape: f32[1,128], index: 5, kind: input, shape index: {}]   ;;  %s2829_s6 = inlined_call_operand.vmem [shape: f32[128,128], index: 6, kind: input, shape index: {}]   ;;  %s2830_s7 = inlined_call_operand.vmem [shape: f32[1,128], index: 7, kind: input, shape index: {}]   ;;  %s2831_s8 = inlined_call_operand.hbm [shape: f32[128,128], index: 8, kind: input, shape index: {}]   ;;  %s2832_s9 = inlined_call_operand.vmem [shape: f32[1,128], index: 9, kind: input, shape index: {}]   ;;  %s2833_s10 = inlined_call_operand.vmem [shape: f32[128,256], index: 10, kind: input, shape index: {}]   ;;  %s2834_s11 = inlined_call_operand.vmem [shape: f32[1,256], index: 11, kind: input, shape index: {}]   ;;  %s2835_s12 = inlined_call_operand.vmem [shape: f32[256,512], index: 12, kind: input, shape index: {}]   ;;  %s2836_s13 = inlined_call_operand.vmem [shape: f32[1,512], index: 13, kind: input, shape index: {}]   ;;  %s2837_s14 = inlined_call_operand.vmem [shape: f32[8,512], index: 14, kind: output, shape index: {0}]   ;;  %s2838_s15 = inlined_call_operand.vmem [shape: f32[8,128], index: 15, kind: output, shape index: {1}]   ;;  %s2839_s16 = inlined_call_operand.vmem [shape: f32[8,128], index: 16, kind: output, shape index: {2}]  }
   0x1   :  { %2841 = sst [smem:[#allocation5_spill]] %s2823_s0 }
   0x2   :  { %22 = vsyncpa [#allocation3], 0  ;;  %s1627_s21 = smov [#allocation2]   ;;  %s1603_s25 = scalar_lea.hbm %s2831_s8, 2048 }
   0x3   :  { %s44_s22 = sshll.u32 %s1627_s21, 4  ;;  %p1604_p0 = scmp.ne.s32.totalorder %s2831_s8, %s1603_s25  ;;  %s45_s22 = int_to_ptr.vmem [resolvable:$true] %s44_s22 }
   0x4   :  { %p1607_p1 = scmp.lt.u32.totalorder %s1603_s25, %s2831_s8 }
   0x6   :  { %p1609_p2 = pnand %p1607_p1, %p1604_p0 }
   0x8   :  { %1612 = shalt.err (!%p1609_p2)
}
   0x9   :  { %s1613_s30 = scalar_lea.vmem %s45_s22, 2048  ;;  %p1618_p4 = scmp.lt.s32.totalorder %s45_s22, %s45_s22 }
   0xa   :  { %p1614_p3 = scmp.ne.s32.totalorder %s45_s22, %s1613_s30  ;;  %p1619_p5 = scmp.lt.s32.totalorder %s1613_s30, %s1613_s30 }
   0xc   :  { %p1620_p6 = por %p1619_p5, %p1618_p4 }
   0xe   :  { %p1621_p7 = pnand %p1620_p6, %p1614_p3 }
  0x10   :  { %1624 = shalt.err (!%p1621_p7)
}
  0x11   :  { %s1628_s0 = smov 128   ;;  %s1629_s17 = smov 8  }
  0x12   :  { %50 = dma.hbm_to_vmem [thread:$0]  %s2831_s8, 2048, %s45_s22, [#allocation3], %s1628_s0, %s1628_s0, %s1629_s17  }
  0x13   :  { %1625 = dma.done.wait [#allocation3], 2048  }
  0x14   :  { %1626 = vsyncadd [#allocation3], 4294965248  ;;  %v69_v0 = vld [vmem:[%s2825_s2 + $0x8] sm:$0xff]  ;;  %v71_v1 = vld [vmem:[%s2825_s2 + $0x18] sm:$0xff]  ;;  %s2842_s29 = sld [smem:[#allocation5_spill]]  ;;  %vm1631_vm0 = vmmov 0  }
  0x15   :  { %v68_v2 = vld [vmem:[%s2825_s2] sm:$0xff]  ;;  %v1223_v3 = vpack.c.bf16 %v71_v1, %v69_v0  ;;  %v70_v4 = vld [vmem:[%s2825_s2 + $0x10] sm:$0xff]  ;;  %v73_v5 = vld [vmem:[%s2825_s2 + $0x28] sm:$0xff] }
  0x16   :  { %v75_v6 = vld [vmem:[%s2825_s2 + $0x38] sm:$0xff]  ;;  %v1225_v7 = vpack.c.bf16 %v70_v4, %v68_v2  ;;  %v72_v9 = vld [vmem:[%s2825_s2 + $0x20] sm:$0xff]  ;;  %v74_v10 = vld [vmem:[%s2825_s2 + $0x30] sm:$0xff] }
  0x17   :  { %v1227_v8 = vpack.c.bf16 %v75_v6, %v73_v5  ;;  %v77_v11 = vld [vmem:[%s2825_s2 + $0x48] sm:$0xff]  ;;  %1224 = vmatprep.subr.bf16.mxu0 %v1223_v3  ;;  %v79_v12 = vld [vmem:[%s2825_s2 + $0x58] sm:$0xff]  ;;  %v1229_v13 = vpack.c.bf16 %v74_v10, %v72_v9  ;;  %v76_v15 = vld [vmem:[%s2825_s2 + $0x40] sm:$0xff] }
  0x18   :  { %1226 = vmatpush1.bf16.msra.mxu0 %v1225_v7  ;;  %v1231_v14 = vpack.c.bf16 %v79_v12, %v77_v11  ;;  %v78_v16 = vld [vmem:[%s2825_s2 + $0x50] sm:$0xff]  ;;  %v81_v17 = vld [vmem:[%s2825_s2 + $0x68] sm:$0xff]  ;;  %v83_v18 = vld [vmem:[%s2825_s2 + $0x78] sm:$0xff] }
  0x19   :  { %1228 = vmatprep.subr.bf16.mxu0 %v1227_v8  ;;  %v1233_v19 = vpack.c.bf16 %v78_v16, %v76_v15  ;;  %v1235_v20 = vpack.c.bf16 %v83_v18, %v81_v17  ;;  %v80_v21 = vld [vmem:[%s2825_s2 + $0x60] sm:$0xff]  ;;  %v82_v22 = vld [vmem:[%s2825_s2 + $0x70] sm:$0xff]  ;;  %v85_v23 = vld [vmem:[%s2825_s2 + $0x88] sm:$0xff] }
  0x1a   :  { %v87_v24 = vld [vmem:[%s2825_s2 + $0x98] sm:$0xff]  ;;  %v1237_v25 = vpack.c.bf16 %v82_v22, %v80_v21  ;;  %v84_v27 = vld [vmem:[%s2825_s2 + $0x80] sm:$0xff]  ;;  %v86_v28 = vld [vmem:[%s2825_s2 + $0x90] sm:$0xff] }
  0x1b   :  { %v1239_v26 = vpack.c.bf16 %v87_v24, %v85_v23  ;;  %v89_v29 = vld [vmem:[%s2825_s2 + $0xa8] sm:$0xff]  ;;  %v91_v30 = vld [vmem:[%s2825_s2 + $0xb8] sm:$0xff]  ;;  %v1241_v31 = vpack.c.bf16 %v86_v28, %v84_v27  ;;  %v88_v33 = vld [vmem:[%s2825_s2 + $0xa0] sm:$0xff] }
  0x1c   :  { %1230 = vmatpush1.bf16.msra.mxu0 %v1229_v13  ;;  %v1243_v32 = vpack.c.bf16 %v91_v30, %v89_v29  ;;  %v90_v34 = vld [vmem:[%s2825_s2 + $0xb0] sm:$0xff]  ;;  %v93_v35 = vld [vmem:[%s2825_s2 + $0xc8] sm:$0xff]  ;;  %v95_v36 = vld [vmem:[%s2825_s2 + $0xd8] sm:$0xff] }
  0x1d   :  { %1232 = vmatprep.subr.bf16.mxu0 %v1231_v14  ;;  %v1245_v37 = vpack.c.bf16 %v90_v34, %v88_v33  ;;  %v1247_v38 = vpack.c.bf16 %v95_v36, %v93_v35  ;;  %v92_v39 = vld [vmem:[%s2825_s2 + $0xc0] sm:$0xff]  ;;  %v94_v40 = vld [vmem:[%s2825_s2 + $0xd0] sm:$0xff]  ;;  %v65_v41 = vld [vmem:[%s2842_s29 + $0x8] sm:$0xff] }
  0x1e   :  { %v97_v42 = vld [vmem:[%s2825_s2 + $0xe8] sm:$0xff]  ;;  %v99_v43 = vld [vmem:[%s2825_s2 + $0xf8] sm:$0xff]  ;;  %272 = vmatprep.mubr.f32.mxu0 %v65_v41  ;;  %v1249_v44 = vpack.c.bf16 %v94_v40, %v92_v39  ;;  %v96_v46 = vld [vmem:[%s2825_s2 + $0xe0] sm:$0xff] }
  0x1f   :  { %v1251_v45 = vpack.c.bf16 %v99_v43, %v97_v42  ;;  %v98_v47 = vld [vmem:[%s2825_s2 + $0xf0] sm:$0xff]  ;;  %v101_v48 = vld [vmem:[%s2825_s2 + $0x108] sm:$0xff]  ;;  %v103_v49 = vld [vmem:[%s2825_s2 + $0x118] sm:$0xff] }
  0x20   :  { %1234 = vmatpush1.bf16.msra.mxu0 %v1233_v19  ;;  %v1253_v50 = vpack.c.bf16 %v98_v47, %v96_v46  ;;  %v1255_v51 = vpack.c.bf16 %v103_v49, %v101_v48  ;;  %v100_v52 = vld [vmem:[%s2825_s2 + $0x100] sm:$0xff]  ;;  %v102_v53 = vld [vmem:[%s2825_s2 + $0x110] sm:$0xff]  ;;  %v105_v54 = vld [vmem:[%s2825_s2 + $0x128] sm:$0xff] }
  0x21   :  { %1236 = vmatprep.subr.bf16.mxu0 %v1235_v20  ;;  %v107_v55 = vld [vmem:[%s2825_s2 + $0x138] sm:$0xff]  ;;  %v1257_v56 = vpack.c.bf16 %v102_v53, %v100_v52  ;;  %v104_v58 = vld [vmem:[%s2825_s2 + $0x120] sm:$0xff]  ;;  %v106_v59 = vld [vmem:[%s2825_s2 + $0x130] sm:$0xff] }
  0x22   :  { %v1259_v57 = vpack.c.bf16 %v107_v55, %v105_v54  ;;  %v109_v60 = vld [vmem:[%s2825_s2 + $0x148] sm:$0xff]  ;;  %v111_v61 = vld [vmem:[%s2825_s2 + $0x158] sm:$0xff]  ;;  %v1261_v62 = vpack.c.bf16 %v106_v59, %v104_v58  ;;  %v108_v0 = vld [vmem:[%s2825_s2 + $0x140] sm:$0xff] }
  0x23   :  { %v1263_v63 = vpack.c.bf16 %v111_v61, %v109_v60  ;;  %v110_v1 = vld [vmem:[%s2825_s2 + $0x150] sm:$0xff]  ;;  %v113_v2 = vld [vmem:[%s2825_s2 + $0x168] sm:$0xff]  ;;  %v115_v3 = vld [vmem:[%s2825_s2 + $0x178] sm:$0xff] }
  0x24   :  { %1238 = vmatpush1.bf16.msra.mxu0 %v1237_v25  ;;  %v1265_v4 = vpack.c.bf16 %v110_v1, %v108_v0  ;;  %v1267_v5 = vpack.c.bf16 %v115_v3, %v113_v2  ;;  %v112_v6 = vld [vmem:[%s2825_s2 + $0x160] sm:$0xff]  ;;  %v114_v7 = vld [vmem:[%s2825_s2 + $0x170] sm:$0xff]  ;;  %v117_v8 = vld [vmem:[%s2825_s2 + $0x188] sm:$0xff] }
  0x25   :  { %1240 = vmatprep.subr.bf16.mxu0 %v1239_v26  ;;  %v119_v9 = vld [vmem:[%s2825_s2 + $0x198] sm:$0xff]  ;;  %v116_v10 = vld [vmem:[%s2825_s2 + $0x180] sm:$0xff]  ;;  %v118_v11 = vld [vmem:[%s2825_s2 + $0x190] sm:$0xff]  ;;  %v1269_v12 = vpack.c.bf16 %v114_v7, %v112_v6 }
  0x26   :  { %v121_v13 = vld [vmem:[%s2825_s2 + $0x1a8] sm:$0xff]  ;;  %v123_v14 = vld [vmem:[%s2825_s2 + $0x1b8] sm:$0xff]  ;;  %v368_v15 = vld [vmem:[%s2827_s4 + $0x80] sm:$0xff]  ;;  %v1271_v18 = vpack.c.bf16 %v119_v9, %v117_v8  ;;  %v1273_v29 = vpack.c.bf16 %v118_v11, %v116_v10 }
  0x27   :  { %v369_v16 = vld [vmem:[%s2827_s4 + $0x88] sm:$0xff]  ;;  %v352_v17 = vld [vmem:[%s2827_s4] sm:$0xff]  ;;  %v370_v21 = vld [vmem:[%s2827_s4 + $0x90] sm:$0xff]  ;;  %v1275_v33 = vpack.c.bf16 %v123_v14, %v121_v13 }
  0x28   :  { %1242 = vmatpush1.bf16.msra.mxu0 %v1241_v31  ;;  %v1351_v19 = vpack.c.bf16 %v369_v16, %v368_v15  ;;  %v353_v20 = vld [vmem:[%s2827_s4 + $0x8] sm:$0xff]  ;;  %v371_v22 = vld [vmem:[%s2827_s4 + $0x98] sm:$0xff]  ;;  %v354_v25 = vld [vmem:[%s2827_s4 + $0x10] sm:$0xff] }
  0x29   :  { %1244 = vmatprep.subr.bf16.mxu0 %v1243_v32  ;;  %v1353_v23 = vpack.c.bf16 %v353_v20, %v352_v17  ;;  %v1355_v24 = vpack.c.bf16 %v371_v22, %v370_v21  ;;  %v355_v26 = vld [vmem:[%s2827_s4 + $0x18] sm:$0xff]  ;;  %v372_v27 = vld [vmem:[%s2827_s4 + $0xa0] sm:$0xff]  ;;  %v373_v28 = vld [vmem:[%s2827_s4 + $0xa8] sm:$0xff] }
  0x2a   :  { %1352 = vmatprep.subr.bf16.mxu1 %v1351_v19  ;;  %v120_v30 = vld [vmem:[%s2825_s2 + $0x1a0] sm:$0xff]  ;;  %v122_v31 = vld [vmem:[%s2825_s2 + $0x1b0] sm:$0xff]  ;;  %v1357_v32 = vpack.c.bf16 %v355_v26, %v354_v25  ;;  %v125_v34 = vld [vmem:[%s2825_s2 + $0x1c8] sm:$0xff]  ;;  %v1359_v35 = vpack.c.bf16 %v373_v28, %v372_v27 }
  0x2b   :  { %1354 = vmatpush3.bf16.msra.mxu1 %v1353_v23  ;;  %v356_v36 = vld [vmem:[%s2827_s4 + $0x20] sm:$0xff]  ;;  %v374_v39 = vld [vmem:[%s2827_s4 + $0xb0] sm:$0xff]  ;;  %v375_v40 = vld [vmem:[%s2827_s4 + $0xb8] sm:$0xff]  ;;  %v1277_v41 = vpack.c.bf16 %v122_v31, %v120_v30 }
  0x2c   :  { %1246 = vmatpush1.bf16.msra.mxu0 %v1245_v37  ;;  %1356 = vmatprep.subr.bf16.mxu1 %v1355_v24  ;;  %v357_v37 = vld [vmem:[%s2827_s4 + $0x28] sm:$0xff]  ;;  %v124_v42 = vld [vmem:[%s2825_s2 + $0x1c0] sm:$0xff]  ;;  %v126_v43 = vld [vmem:[%s2825_s2 + $0x1d0] sm:$0xff]  ;;  %v1363_v47 = vpack.c.bf16 %v375_v40, %v374_v39 }
  0x2d   :  { %1248 = vmatprep.subr.bf16.mxu0 %v1247_v38  ;;  %v127_v38 = vld [vmem:[%s2825_s2 + $0x1d8] sm:$0xff]  ;;  %v129_v46 = vld [vmem:[%s2825_s2 + $0x1e8] sm:$0xff]  ;;  %v358_v48 = vld [vmem:[%s2827_s4 + $0x30] sm:$0xff]  ;;  %v1281_v53 = vpack.c.bf16 %v126_v43, %v124_v42 }
  0x2e   :  { %v359_v49 = vld [vmem:[%s2827_s4 + $0x38] sm:$0xff]  ;;  %v377_v52 = vld [vmem:[%s2827_s4 + $0xc8] sm:$0xff]  ;;  %v128_v54 = vld [vmem:[%s2825_s2 + $0x1e0] sm:$0xff] }
  0x2f   :  { %1358 = vmatpush3.bf16.msra.mxu1 %v1357_v32  ;;  %v130_v55 = vld [vmem:[%s2825_s2 + $0x1f0] sm:$0xff]  ;;  %v133_v58 = vld [vmem:[%s2825_s2 + $0x208] sm:$0xff]  ;;  %v360_v60 = vld [vmem:[%s2827_s4 + $0x40] sm:$0xff] }
  0x30   :  { %1250 = vmatpush1.bf16.msra.mxu0 %v1249_v44  ;;  %v1361_v44 = vpack.c.bf16 %v357_v37, %v356_v36  ;;  %1360 = vmatprep.subr.bf16.mxu1 %v1359_v35  ;;  %v361_v61 = vld [vmem:[%s2827_s4 + $0x48] sm:$0xff]  ;;  %v379_v0 = vld [vmem:[%s2827_s4 + $0xd8] sm:$0xff]  ;;  %v1285_v1 = vpack.c.bf16 %v130_v55, %v128_v54  ;;  %v362_v9 = vld [vmem:[%s2827_s4 + $0x50] sm:$0xff] }
  0x31   :  { %1252 = vmatprep.subr.bf16.mxu0 %v1251_v45  ;;  %v1279_v45 = vpack.c.bf16 %v127_v38, %v125_v34  ;;  %v1369_v2 = vpack.c.bf16 %v361_v61, %v360_v60  ;;  %v137_v6 = vld [vmem:[%s2825_s2 + $0x228] sm:$0xff]  ;;  %v139_v8 = vld [vmem:[%s2825_s2 + $0x238] sm:$0xff]  ;;  %v380_v11 = vld [vmem:[%s2827_s4 + $0xe0] sm:$0xff] }
  0x32   :  { %v363_v10 = vld [vmem:[%s2827_s4 + $0x58] sm:$0xff]  ;;  %v64_v13 = vld [vmem:[%s2842_s29] sm:$0xff]  ;;  %v1291_v15 = vpack.c.bf16 %v139_v8, %v137_v6  ;;  %v138_v17 = vld [vmem:[%s2825_s2 + $0x230] sm:$0xff] }
  0x33   :  { %1362 = vmatpush3.bf16.msra.mxu1 %v1361_v44  ;;  %v136_v16 = vld [vmem:[%s2825_s2 + $0x220] sm:$0xff]  ;;  %v1373_v19 = vpack.c.bf16 %v363_v10, %v362_v9  ;;  %v141_v20 = vld [vmem:[%s2825_s2 + $0x248] sm:$0xff]  ;;  %v143_v21 = vld [vmem:[%s2825_s2 + $0x258] sm:$0xff] }
  0x34   :  { %1254 = vmatpush1.bf16.msra.mxu0 %v1253_v50  ;;  %v131_v50 = vld [vmem:[%s2825_s2 + $0x1f8] sm:$0xff]  ;;  %1364 = vmatprep.subr.bf16.mxu1 %v1363_v47  ;;  %v1293_v23 = vpack.c.bf16 %v138_v17, %v136_v16  ;;  %v1295_v24 = vpack.c.bf16 %v143_v21, %v141_v20  ;;  %v140_v25 = vld [vmem:[%s2825_s2 + $0x240] sm:$0xff]  ;;  %v142_v26 = vld [vmem:[%s2825_s2 + $0x250] sm:$0xff] }
  0x35   :  { %1256 = vmatprep.subr.bf16.mxu0 %v1255_v51  ;;  %v376_v51 = vld [vmem:[%s2827_s4 + $0xc0] sm:$0xff]  ;;  %v145_v27 = vld [vmem:[%s2825_s2 + $0x268] sm:$0xff]  ;;  %v147_v28 = vld [vmem:[%s2825_s2 + $0x278] sm:$0xff] }
  0x36   :  { %v1367_v59 = vpack.c.bf16 %v377_v52, %v376_v51  ;;  %v1299_v30 = vpack.c.bf16 %v147_v28, %v145_v27  ;;  %v144_v31 = vld [vmem:[%s2825_s2 + $0x260] sm:$0xff]  ;;  %v146_v32 = vld [vmem:[%s2825_s2 + $0x270] sm:$0xff]  ;;  %v151_v34 = vld [vmem:[%s2825_s2 + $0x298] sm:$0xff] }
  0x37   :  { %v1301_v35 = vpack.c.bf16 %v146_v32, %v144_v31  ;;  %v148_v37 = vld [vmem:[%s2825_s2 + $0x280] sm:$0xff]  ;;  %v150_v38 = vld [vmem:[%s2825_s2 + $0x290] sm:$0xff]  ;;  %v153_v39 = vld [vmem:[%s2825_s2 + $0x2a8] sm:$0xff] }
  0x38   :  { %1258 = vmatpush1.bf16.msra.mxu0 %v1257_v56  ;;  %v1365_v56 = vpack.c.bf16 %v359_v49, %v358_v48  ;;  %v155_v40 = vld [vmem:[%s2825_s2 + $0x2b8] sm:$0xff]  ;;  %v152_v43 = vld [vmem:[%s2825_s2 + $0x2a0] sm:$0xff]  ;;  %v154_v44 = vld [vmem:[%s2825_s2 + $0x2b0] sm:$0xff] }
  0x39   :  { %1260 = vmatprep.subr.bf16.mxu0 %v1259_v57  ;;  %v1283_v57 = vpack.c.bf16 %v131_v50, %v129_v46  ;;  %v1307_v42 = vpack.c.bf16 %v155_v40, %v153_v39  ;;  %v159_v46 = vld [vmem:[%s2825_s2 + $0x2d8] sm:$0xff]  ;;  %v1309_v47 = vpack.c.bf16 %v154_v44, %v152_v43  ;;  %v156_v49 = vld [vmem:[%s2825_s2 + $0x2c0] sm:$0xff]  ;;  %v158_v50 = vld [vmem:[%s2825_s2 + $0x2d0] sm:$0xff] }
  0x3a   :  { %1366 = vmatpush3.bf16.msra.mxu1 %v1365_v56  ;;  %v161_v51 = vld [vmem:[%s2825_s2 + $0x2e8] sm:$0xff]  ;;  %v163_v52 = vld [vmem:[%s2825_s2 + $0x2f8] sm:$0xff]  ;;  %v160_v55 = vld [vmem:[%s2825_s2 + $0x2e0] sm:$0xff] }
  0x3b   :  { %1368 = vmatprep.subr.bf16.mxu1 %v1367_v59  ;;  %v1315_v54 = vpack.c.bf16 %v163_v52, %v161_v51  ;;  %v162_v56 = vld [vmem:[%s2825_s2 + $0x2f0] sm:$0xff]  ;;  %v164_v61 = vld [vmem:[%s2825_s2 + $0x300] sm:$0xff]  ;;  %v175_v6 = vld [vmem:[%s2825_s2 + $0x358] sm:$0xff]  ;;  %v1630_v52 = vmov 0.0|0.0  }
  0x3c   :  { %1262 = vmatpush1.bf16.msra.mxu0 %v1261_v62  ;;  %v135_v62 = vld [vmem:[%s2825_s2 + $0x218] sm:$0xff]  ;;  %v1317_v59 = vpack.c.bf16 %v162_v56, %v160_v55  ;;  %v172_v9 = vld [vmem:[%s2825_s2 + $0x340] sm:$0xff]  ;;  %v174_v10 = vld [vmem:[%s2825_s2 + $0x350] sm:$0xff] }
  0x3d   :  { %1264 = vmatprep.subr.bf16.mxu0 %v1263_v63  ;;  %v378_v63 = vld [vmem:[%s2827_s4 + $0xd0] sm:$0xff]  ;;  %v1287_v3 = vpack.c.bf16 %v135_v62, %v133_v58  ;;  %v167_v58 = vld [vmem:[%s2825_s2 + $0x318] sm:$0xff]  ;;  %v181_v17 = vld [vmem:[%s2825_s2 + $0x388] sm:$0xff] }
  0x3e   :  { %v1371_v7 = vpack.c.bf16 %v379_v0, %v378_v63  ;;  %1370 = vmatpush3.bf16.msra.mxu1 %v1369_v2  ;;  %v166_v62 = vld [vmem:[%s2825_s2 + $0x310] sm:$0xff]  ;;  %v169_v63 = vld [vmem:[%s2825_s2 + $0x328] sm:$0xff]  ;;  %v171_v0 = vld [vmem:[%s2825_s2 + $0x338] sm:$0xff] }
  0x3f   :  { %v1323_v2 = vpack.c.bf16 %v171_v0, %v169_v63  ;;  %v178_v16 = vld [vmem:[%s2825_s2 + $0x370] sm:$0xff]  ;;  %v180_v21 = vld [vmem:[%s2825_s2 + $0x380] sm:$0xff]  ;;  %v365_v44 = vld [vmem:[%s2827_s4 + $0x68] sm:$0xff] }
  0x40   :  { %1266 = vmatpush1.bf16.msra.mxu0 %v1265_v4  ;;  %v132_v4 = vld [vmem:[%s2825_s2 + $0x200] sm:$0xff]  ;;  %1372 = vmatprep.subr.bf16.mxu1 %v1371_v7  ;;  %v186_v28 = vld [vmem:[%s2825_s2 + $0x3b0] sm:$0xff]  ;;  %v462_v0 = vld [vmem:[%s2829_s6 + $0x8] sm:$0xff] }
  0x41   :  { %1268 = vmatprep.subr.bf16.mxu0 %v1267_v5  ;;  %v134_v5 = vld [vmem:[%s2825_s2 + $0x210] sm:$0xff]  ;;  %v184_v27 = vld [vmem:[%s2825_s2 + $0x3a0] sm:$0xff] }
  0x42   :  { %v1289_v14 = vpack.c.bf16 %v134_v5, %v132_v4  ;;  %1374 = vmatpush3.bf16.msra.mxu1 %v1373_v19  ;;  %v170_v4 = vld [vmem:[%s2825_s2 + $0x330] sm:$0xff]  ;;  %v173_v5 = vld [vmem:[%s2825_s2 + $0x348] sm:$0xff]  ;;  %v1341_v31 = vpack.c.bf16 %v186_v28, %v184_v27  ;;  %v192_v39 = vld [vmem:[%s2825_s2 + $0x3e0] sm:$0xff] }
  0x43   :  { %v1327_v8 = vpack.c.bf16 %v175_v6, %v173_v5  ;;  %v194_v40 = vld [vmem:[%s2825_s2 + $0x3f0] sm:$0xff]  ;;  %v364_v43 = vld [vmem:[%s2827_s4 + $0x60] sm:$0xff]  ;;  %v464_v6 = vld [vmem:[%s2829_s6 + $0x18] sm:$0xff] }
  0x44   :  { %1270 = vmatpush1.bf16.msra.mxu0 %v1269_v12  ;;  %v381_v12 = vld [vmem:[%s2827_s4 + $0xe8] sm:$0xff]  ;;  %v196_v56 = vld [vmem:[%s2826_s3] sm:$0x3]  ;;  %v463_v5 = vld [vmem:[%s2829_s6 + $0x10] sm:$0xff] }
  0x45   :  { %1272 = vmatprep.subr.bf16.mxu0 %v1271_v18  ;;  %v67_v18 = vld [vmem:[%s2842_s29 + $0x18] sm:$0xff]  ;;  %v1375_v22 = vpack.c.bf16 %v381_v12, %v380_v11  ;;  %v177_v11 = vld [vmem:[%s2825_s2 + $0x368] sm:$0xff]  ;;  %v461_v63 = vld [vmem:[%s2829_s6] sm:$0xff] }
  0x46   :  { %v179_v12 = vld [vmem:[%s2825_s2 + $0x378] sm:$0xff]  ;;  %v554_v28 = vld [vmem:[#allocation2] sm:$0xff] }
  0x47   :  { %1376 = vmatprep.subr.bf16.mxu1 %v1375_v22  ;;  %v182_v22 = vld [vmem:[%s2825_s2 + $0x390] sm:$0xff] }
  0x48   :  { %1274 = vmatpush1.bf16.msra.mxu0 %v1273_v29  ;;  %v1297_v29 = vpack.c.bf16 %v142_v26, %v140_v25  ;;  %v1337_v25 = vpack.c.bf16 %v182_v22, %v180_v21  ;;  %v474_v21 = vld [vmem:[%s2829_s6 + $0x68] sm:$0xff] }
  0x49   :  { %1276 = vmatprep.subr.bf16.mxu0 %v1275_v33  ;;  %v149_v33 = vld [vmem:[%s2825_s2 + $0x288] sm:$0xff] }
  0x4a   :  { %v1303_v36 = vpack.c.bf16 %v151_v34, %v149_v33  ;;  %v188_v33 = vld [vmem:[%s2825_s2 + $0x3c0] sm:$0xff]  ;;  %v190_v34 = vld [vmem:[%s2825_s2 + $0x3d0] sm:$0xff] }
  0x4c   :  { %1278 = vmatpush1.bf16.msra.mxu0 %v1277_v41  ;;  %v1305_v41 = vpack.c.bf16 %v150_v38, %v148_v37  ;;  %v1345_v37 = vpack.c.bf16 %v190_v34, %v188_v33 }
  0x4d   :  { %1280 = vmatprep.subr.bf16.mxu0 %v1279_v45  ;;  %v157_v45 = vld [vmem:[%s2825_s2 + $0x2c8] sm:$0xff] }
  0x4e   :  { %v1311_v48 = vpack.c.bf16 %v159_v46, %v157_v45  ;;  %v1377_v45 = vpack.c.bf16 %v365_v44, %v364_v43  ;;  %v382_v46 = vld [vmem:[%s2827_s4 + $0xf0] sm:$0xff]  ;;  %v562_v44 = vld [vmem:[#allocation2 + $0x40] sm:$0xff] }
  0x50   :  { %1282 = vmatpush1.bf16.msra.mxu0 %v1281_v53  ;;  %v1313_v53 = vpack.c.bf16 %v158_v50, %v156_v49  ;;  %1378 = vmatpush3.bf16.msra.mxu1 %v1377_v45  ;;  %v366_v49 = vld [vmem:[%s2827_s4 + $0x70] sm:$0xff]  ;;  %v367_v50 = vld [vmem:[%s2827_s4 + $0x78] sm:$0xff]  ;;  %v563_v45 = vld [vmem:[#allocation2 + $0x48] sm:$0xff] }
  0x51   :  { %1284 = vmatprep.subr.bf16.mxu0 %v1283_v57  ;;  %v165_v57 = vld [vmem:[%s2825_s2 + $0x308] sm:$0xff]  ;;  %v1381_v51 = vpack.c.bf16 %v367_v50, %v366_v49  ;;  %v566_v50 = vld [vmem:[#allocation2 + $0x60] sm:$0xff] }
  0x52   :  { %v1319_v60 = vpack.c.bf16 %v167_v58, %v165_v57 }
  0x54   :  { %1286 = vmatpush1.bf16.msra.mxu0 %v1285_v1  ;;  %v1321_v1 = vpack.c.bf16 %v166_v62, %v164_v61 }
  0x55   :  { %1288 = vmatprep.subr.bf16.mxu0 %v1287_v3  ;;  %v168_v3 = vld [vmem:[%s2825_s2 + $0x320] sm:$0xff] }
  0x56   :  { %v1325_v7 = vpack.c.bf16 %v170_v4, %v168_v3  ;;  %v1384_v3 = vpack.c.bf16 %v462_v0, %v461_v63  ;;  %v658_v0 = vld [vmem:[%s2833_s10 + $0x28] sm:$0xff] }
  0x57   :  { %273 = vmatmul.mubr.f32.vlgmr.msra.gmra.mrb[0].mxu0 %v64_v13  ;;  %v1329_v13 = vpack.c.bf16 %v174_v10, %v172_v9  ;;  %v466_v9 = vld [vmem:[%s2829_s6 + $0x28] sm:$0xff] }
  0x58   :  { %1290 = vmatpush1.bf16.msra.mxu0 %v1289_v14  ;;  %343 = vmatprep.mubr.f32.mxu0 %v67_v18  ;;  %v1331_v14 = vpack.c.bf16 %v179_v12, %v177_v11  ;;  %v183_v18 = vld [vmem:[%s2825_s2 + $0x398] sm:$0xff]  ;;  %v467_v11 = vld [vmem:[%s2829_s6 + $0x30] sm:$0xff] }
  0x59   :  { %1292 = vmatprep.subr.bf16.mxu0 %v1291_v15  ;;  %v176_v15 = vld [vmem:[%s2825_s2 + $0x360] sm:$0xff]  ;;  %v1335_v20 = vpack.c.bf16 %v183_v18, %v181_v17  ;;  %v468_v12 = vld [vmem:[%s2829_s6 + $0x38] sm:$0xff]  ;;  %v471_v17 = vld [vmem:[%s2829_s6 + $0x50] sm:$0xff] }
  0x5a   :  { %v1333_v19 = vpack.c.bf16 %v178_v16, %v176_v15  ;;  %v470_v15 = vld [vmem:[%s2829_s6 + $0x48] sm:$0xff]  ;;  %v472_v18 = vld [vmem:[%s2829_s6 + $0x58] sm:$0xff] }
  0x5c   :  { %1294 = vmatpush1.bf16.msra.mxu0 %v1293_v23  ;;  %v185_v23 = vld [vmem:[%s2825_s2 + $0x3a8] sm:$0xff] }
  0x5d   :  { %1296 = vmatprep.subr.bf16.mxu0 %v1295_v24  ;;  %v187_v24 = vld [vmem:[%s2825_s2 + $0x3b8] sm:$0xff] }
  0x5e   :  { %v1339_v26 = vpack.c.bf16 %v187_v24, %v185_v23  ;;  %v475_v23 = vld [vmem:[%s2829_s6 + $0x70] sm:$0xff]  ;;  %v476_v24 = vld [vmem:[%s2829_s6 + $0x78] sm:$0xff] }
  0x60   :  { %1298 = vmatpush1.bf16.msra.mxu0 %v1297_v29  ;;  %v189_v29 = vld [vmem:[%s2825_s2 + $0x3c8] sm:$0xff] }
  0x61   :  { %1300 = vmatprep.subr.bf16.mxu0 %v1299_v30  ;;  %v191_v30 = vld [vmem:[%s2825_s2 + $0x3d8] sm:$0xff] }
  0x62   :  { %v1343_v32 = vpack.c.bf16 %v191_v30, %v189_v29  ;;  %v555_v29 = vld [vmem:[#allocation2 + $0x8] sm:$0xff]  ;;  %v1081_v30 = vld [vmem:[%s2828_s5] ss:$0 sm:$0xff] }
  0x63   :  { %v1408_v33 = vpack.c.bf16 %v555_v29, %v554_v28  ;;  %v675_v29 = vld [vmem:[%s2833_s10 + $0xb0] sm:$0xff] }
  0x64   :  { %1302 = vmatpush1.bf16.msra.mxu0 %v1301_v35  ;;  %v193_v35 = vld [vmem:[%s2825_s2 + $0x3e8] sm:$0xff] }
  0x65   :  { %1304 = vmatprep.subr.bf16.mxu0 %v1303_v36  ;;  %v195_v36 = vld [vmem:[%s2825_s2 + $0x3f8] sm:$0xff] }
  0x66   :  { %v1347_v38 = vpack.c.bf16 %v195_v36, %v193_v35  ;;  %v556_v35 = vld [vmem:[#allocation2 + $0x10] sm:$0xff]  ;;  %v557_v36 = vld [vmem:[#allocation2 + $0x18] sm:$0xff] }
  0x68   :  { %1306 = vmatpush1.bf16.msra.mxu0 %v1305_v41  ;;  %v1349_v41 = vpack.c.bf16 %v194_v40, %v192_v39  ;;  %v559_v39 = vld [vmem:[#allocation2 + $0x28] sm:$0xff] }
  0x69   :  { %1308 = vmatprep.subr.bf16.mxu0 %v1307_v42  ;;  %v66_v42 = vld [vmem:[%s2842_s29 + $0x10] sm:$0xff] }
  0x6c   :  { %1310 = vmatpush1.bf16.msra.mxu0 %v1309_v47  ;;  %v383_v47 = vld [vmem:[%s2827_s4 + $0xf8] sm:$0xff] }
  0x6d   :  { %1312 = vmatprep.subr.bf16.mxu0 %v1311_v48  ;;  %v1379_v48 = vpack.c.bf16 %v383_v47, %v382_v46  ;;  %v1420_v46 = vpack.c.bf16 %v563_v45, %v562_v44  ;;  %v564_v47 = vld [vmem:[#allocation2 + $0x50] sm:$0xff]  ;;  %v775_v44 = vld [vmem:[%s2835_s12 + $0x28] sm:$0xff]  ;;  %v773_v45 = vld [vmem:[%s2835_s12 + $0x18] sm:$0xff] }
  0x6f   :  { %1380 = vmatprep.subr.bf16.mxu1 %v1379_v48  ;;  %v565_v48 = vld [vmem:[#allocation2 + $0x58] sm:$0xff] }
  0x70   :  { %1314 = vmatpush1.bf16.msra.mxu0 %v1313_v53  ;;  %1382 = vmatpush3.bf16.msra.mxu1 %v1381_v51  ;;  %v198_v53 = vlaneseq  ;;  %v1423_v49 = vpack.c.bf16 %v565_v48, %v564_v47  ;;  %v567_v51 = vld [vmem:[#allocation2 + $0x68] sm:$0xff]  ;;  %v777_v47 = vld [vmem:[%s2835_s12 + $0x38] sm:$0xff]  ;;  %v770_v48 = vld [vmem:[%s2835_s12] sm:$0xff] }
  0x71   :  { %1316 = vmatprep.subr.bf16.mxu0 %v1315_v54  ;;  %1383 = vmatprep.subr.bf16.mxu1 %v1630_v52 }
  0x72   :  { %v2223_v54 = vshrl.u32 %v198_v53, 7  ;;  %v1426_v53 = vpack.c.bf16 %v567_v51, %v566_v50  ;;  %v1527_v50 = vpack.c.bf16 %v777_v47, %v773_v45  ;;  %v851_v45 = vld [vmem:[%s2835_s12 + $0x288] sm:$0xff] }
  0x74   :  { %1318 = vmatpush1.bf16.msra.mxu0 %v1317_v59  ;;  %v2226_v55 = vsub.s32 0, %v2223_v54  ;;  %v2232_v57 = vsub.s32 1, %v2223_v54 }
  0x75   :  { %1320 = vmatprep.subr.bf16.mxu0 %v1319_v60 }
  0x76   :  { %v201_v58 = vrot.slane %v196_v56, %v2226_v55  ;;  %v205_v59 = vrot.slane %v196_v56, %v2232_v57  ;;  %v568_v56 = vld [vmem:[#allocation2 + $0x70] sm:$0xff] }
  0x78   :  { %1322 = vmatpush1.bf16.msra.mxu0 %v1321_v1 }
  0x79   :  { %1324 = vmatprep.subr.bf16.mxu0 %v1323_v2 }
  0x7c   :  { %1326 = vmatpush1.bf16.msra.mxu0 %v1325_v7  ;;  %v1387_v7 = vpack.c.bf16 %v464_v6, %v463_v5  ;;  %v659_v5 = vld [vmem:[%s2833_s10 + $0x30] sm:$0xff]  ;;  %v662_v6 = vld [vmem:[%s2833_s10 + $0x48] sm:$0xff] }
  0x7d   :  { %1328 = vmatprep.subr.bf16.mxu0 %v1327_v8  ;;  %v465_v8 = vld [vmem:[%s2829_s6 + $0x20] sm:$0xff] }
  0x7e   :  { %v1390_v10 = vpack.c.bf16 %v466_v9, %v465_v8 }
  0x80   :  { %1330 = vmatpush1.bf16.msra.mxu0 %v1329_v13  ;;  %v1393_v13 = vpack.c.bf16 %v468_v12, %v467_v11  ;;  %v663_v11 = vld [vmem:[%s2833_s10 + $0x50] sm:$0xff] }
  0x81   :  { %1332 = vmatprep.subr.bf16.mxu0 %v1331_v14  ;;  %v469_v14 = vld [vmem:[%s2829_s6 + $0x40] sm:$0xff] }
  0x82   :  { %v1396_v16 = vpack.c.bf16 %v470_v15, %v469_v14  ;;  %v668_v14 = vld [vmem:[%s2833_s10 + $0x78] sm:$0xff] }
  0x84   :  { %1334 = vmatpush1.bf16.msra.mxu0 %v1333_v19  ;;  %v1399_v19 = vpack.c.bf16 %v472_v18, %v471_v17  ;;  %v667_v17 = vld [vmem:[%s2833_s10 + $0x70] sm:$0xff] }
  0x85   :  { %1336 = vmatprep.subr.bf16.mxu0 %v1335_v20  ;;  %v473_v20 = vld [vmem:[%s2829_s6 + $0x60] sm:$0xff] }
  0x86   :  { %v1402_v22 = vpack.c.bf16 %v474_v21, %v473_v20  ;;  %v672_v20 = vld [vmem:[%s2833_s10 + $0x98] sm:$0xff] }
  0x88   :  { %1338 = vmatpush1.bf16.msra.mxu0 %v1337_v25  ;;  %v1405_v25 = vpack.c.bf16 %v476_v24, %v475_v23  ;;  %v671_v23 = vld [vmem:[%s2833_s10 + $0x90] sm:$0xff] }
  0x89   :  { %1340 = vmatprep.subr.bf16.mxu0 %v1339_v26  ;;  %v1632_v26 = vmov 0.0  }
  0x8c   :  { %1342 = vmatpush1.bf16.msra.mxu0 %v1341_v31 }
  0x8d   :  { %1344 = vmatprep.subr.bf16.mxu0 %v1343_v32 }
  0x90   :  { %1346 = vmatpush1.bf16.msra.mxu0 %v1345_v37  ;;  %v1411_v37 = vpack.c.bf16 %v557_v36, %v556_v35  ;;  %v679_v35 = vld [vmem:[%s2833_s10 + $0xd0] sm:$0xff]  ;;  %v682_v36 = vld [vmem:[%s2833_s10 + $0xe8] sm:$0xff] }
  0x91   :  { %1348 = vmatprep.subr.bf16.mxu0 %v1347_v38  ;;  %v558_v38 = vld [vmem:[#allocation2 + $0x20] sm:$0xff] }
  0x92   :  { %v1414_v40 = vpack.c.bf16 %v559_v39, %v558_v38 }
  0x94   :  { %1350 = vmatpush1.bf16.msra.mxu0 %v1349_v41  ;;  %v560_v41 = vld [vmem:[#allocation2 + $0x30] sm:$0xff] }
  0x97   :  { %344 = vmatmul.mubr.f32.vlgmr.msra.gmra.mrb[0].mxu0 %v66_v42  ;;  %v561_v42 = vld [vmem:[#allocation2 + $0x38] sm:$0xff] }
  0x98   :  { %v1417_v43 = vpack.c.bf16 %v561_v42, %v560_v41  ;;  %v683_v41 = vld [vmem:[%s2833_s10 + $0xf0] sm:$0xff] }
 0x16a   :  { %v345_v60 = vpop.f32.mrb[0].mxu0 }
 0x16b   :  { %v1591_v61 = vadd.f32 %v345_v60, %v201_v58  ;;  %v347_v62 = vpop.f32.mrb[1].mxu0  ;;  %v569_v58 = vld [vmem:[#allocation2 + $0x78] sm:$0xff]  ;;  %v654_v60 = vld [vmem:[%s2833_s10 + $0x8] sm:$0xff] }
 0x16c   :  { %v1592_v1 = vadd.f32 %v347_v62, %v205_v59  ;;  %v1429_v59 = vpack.c.bf16 %v569_v58, %v568_v56  ;;  %v653_v62 = vld [vmem:[%s2833_s10] sm:$0xff]  ;;  %v783_v56 = vld [vmem:[%s2835_s12 + $0x68] sm:$0xff] }
 0x16d   :  { %v350_v4 = vmax.f32 %v1591_v61, 0.0  ;;  %v656_v61 = vld [vmem:[%s2833_s10 + $0x18] sm:$0xff] }
 0x16e   :  { %v351_v2 = vmax.f32 %v1592_v1, 0.0  ;;  %v1431_v63 = vpack.c.bf16 %v656_v61, %v654_v60  ;;  %v660_v1 = vld [vmem:[%s2833_s10 + $0x38] sm:$0xff]  ;;  %v782_v60 = vld [vmem:[%s2835_s12 + $0x60] sm:$0xff] }
 0x170   :  { %455 = vmatprep.mubr.f32.mxu1 %v351_v2 }
 0x171   :  { %456 = vmatmul.mubr.f32.vlgmr.msra.gmra.mrb[0].mxu1 %v350_v4  ;;  %v657_v4 = vld [vmem:[%s2833_s10 + $0x20] sm:$0xff] }
 0x172   :  { %1385 = vmatpush3.bf16.msra.mxu1 %v1384_v3  ;;  %1185 = vmatprep.mubr.msk.f32.mxu1 %vm1631_vm0, %v1632_v26  ;;  %v1435_v3 = vpack.c.bf16 %v660_v1, %v658_v0  ;;  %v1437_v8 = vpack.c.bf16 %v659_v5, %v657_v4  ;;  %v786_v0 = vld [vmem:[%s2835_s12 + $0x80] sm:$0xff]  ;;  %v799_v4 = vld [vmem:[%s2835_s12 + $0xe8] sm:$0xff] }
 0x173   :  { %1386 = vmatprep.subr.bf16.mxu1 %v1630_v52  ;;  %v790_v1 = vld [vmem:[%s2835_s12 + $0xa0] sm:$0xff] }
 0x176   :  { %1388 = vmatpush3.bf16.msra.mxu1 %v1387_v7  ;;  %v664_v7 = vld [vmem:[%s2833_s10 + $0x58] sm:$0xff] }
 0x177   :  { %1389 = vmatprep.subr.bf16.mxu1 %v1630_v52  ;;  %v1439_v9 = vpack.c.bf16 %v664_v7, %v662_v6  ;;  %v794_v6 = vld [vmem:[%s2835_s12 + $0xc0] sm:$0xff] }
 0x178   :  { %v798_v7 = vld [vmem:[%s2835_s12 + $0xe0] sm:$0xff] }
 0x17a   :  { %1391 = vmatpush3.bf16.msra.mxu1 %v1390_v10  ;;  %v661_v10 = vld [vmem:[%s2833_s10 + $0x40] sm:$0xff] }
 0x17b   :  { %1392 = vmatprep.subr.bf16.mxu1 %v1630_v52  ;;  %v1441_v12 = vpack.c.bf16 %v663_v11, %v661_v10  ;;  %v807_v10 = vld [vmem:[%s2835_s12 + $0x128] sm:$0xff] }
 0x17e   :  { %1394 = vmatpush3.bf16.msra.mxu1 %v1393_v13  ;;  %v666_v13 = vld [vmem:[%s2833_s10 + $0x68] sm:$0xff] }
 0x17f   :  { %1395 = vmatprep.subr.bf16.mxu1 %v1630_v52  ;;  %v1443_v15 = vpack.c.bf16 %v668_v14, %v666_v13  ;;  %v806_v13 = vld [vmem:[%s2835_s12 + $0x120] sm:$0xff] }
 0x182   :  { %1397 = vmatpush3.bf16.msra.mxu1 %v1396_v16  ;;  %v665_v16 = vld [vmem:[%s2833_s10 + $0x60] sm:$0xff] }
 0x183   :  { %1398 = vmatprep.subr.bf16.mxu1 %v1630_v52  ;;  %v1445_v18 = vpack.c.bf16 %v667_v17, %v665_v16  ;;  %v815_v16 = vld [vmem:[%s2835_s12 + $0x168] sm:$0xff] }
 0x186   :  { %1400 = vmatpush3.bf16.msra.mxu1 %v1399_v19  ;;  %v670_v19 = vld [vmem:[%s2833_s10 + $0x88] sm:$0xff] }
 0x187   :  { %1401 = vmatprep.subr.bf16.mxu1 %v1630_v52  ;;  %v1447_v21 = vpack.c.bf16 %v672_v20, %v670_v19  ;;  %v814_v19 = vld [vmem:[%s2835_s12 + $0x160] sm:$0xff] }
 0x18a   :  { %1403 = vmatpush3.bf16.msra.mxu1 %v1402_v22  ;;  %v669_v22 = vld [vmem:[%s2833_s10 + $0x80] sm:$0xff] }
 0x18b   :  { %1404 = vmatprep.subr.bf16.mxu1 %v1630_v52  ;;  %v1449_v24 = vpack.c.bf16 %v671_v23, %v669_v22  ;;  %v823_v22 = vld [vmem:[%s2835_s12 + $0x1a8] sm:$0xff] }
 0x18e   :  { %1406 = vmatpush3.bf16.msra.mxu1 %v1405_v25  ;;  %v674_v25 = vld [vmem:[%s2833_s10 + $0xa8] sm:$0xff] }
 0x18f   :  { %1407 = vmatprep.subr.bf16.mxu1 %v1630_v52 }
 0x244   :  { %v1116_v27 = vpop.f32.mrb[0].mxu1 }
 0x245   :  { %v1117_v31 = vpop.f32.mrb[1].mxu1 }
 0x246   :  { %v1118_v32 = vadd.f32 %v1117_v31, %v1116_v27  ;;  %v673_v27 = vld [vmem:[%s2833_s10 + $0xa0] sm:$0xff]  ;;  %v680_v31 = vld [vmem:[%s2833_s10 + $0xd8] sm:$0xff] }
 0x248   :  { %v458_v34 = vadd.f32 %v1118_v32, %v1081_v30  ;;  %v678_v30 = vld [vmem:[%s2833_s10 + $0xc8] sm:$0xff]  ;;  %v1453_v32 = vpack.c.bf16 %v675_v29, %v673_v27 }
 0x249   :  { %v827_v27 = vld [vmem:[%s2835_s12 + $0x1c8] sm:$0xff] }
 0x24a   :  { %1186 = vmatmul.mubr.f32.vlgmr.msra.gmra.mrb[2].mxu1 %v458_v34 }
 0x24b   :  { %1409 = vmatpush3.bf16.msra.mxu1 %v1408_v33  ;;  %1220 = vmatprep.mubr.msk.f32.mxu1 %vm1631_vm0, %v1632_v26  ;;  %v1455_v33 = vpack.c.bf16 %v680_v31, %v678_v30  ;;  %v826_v30 = vld [vmem:[%s2835_s12 + $0x1c0] sm:$0xff] }
 0x24c   :  { %1410 = vmatprep.subr.bf16.mxu1 %v1630_v52  ;;  %v830_v31 = vld [vmem:[%s2835_s12 + $0x1e0] sm:$0xff] }
 0x24f   :  { %1412 = vmatpush3.bf16.msra.mxu1 %v1411_v37  ;;  %v684_v37 = vld [vmem:[%s2833_s10 + $0xf8] sm:$0xff] }
 0x250   :  { %1413 = vmatprep.subr.bf16.mxu1 %v1630_v52  ;;  %v1459_v39 = vpack.c.bf16 %v684_v37, %v682_v36  ;;  %v834_v36 = vld [vmem:[%s2835_s12 + $0x200] sm:$0xff] }
 0x251   :  { %v838_v37 = vld [vmem:[%s2835_s12 + $0x220] sm:$0xff] }
 0x253   :  { %1415 = vmatpush3.bf16.msra.mxu1 %v1414_v40  ;;  %v681_v40 = vld [vmem:[%s2833_s10 + $0xe0] sm:$0xff] }
 0x254   :  { %1416 = vmatprep.subr.bf16.mxu1 %v1630_v52  ;;  %v1461_v42 = vpack.c.bf16 %v683_v41, %v681_v40  ;;  %v847_v40 = vld [vmem:[%s2835_s12 + $0x268] sm:$0xff] }
 0x257   :  { %1418 = vmatpush3.bf16.msra.mxu1 %v1417_v43  ;;  %v771_v43 = vld [vmem:[%s2835_s12 + $0x8] sm:$0xff] }
 0x258   :  { %1419 = vmatprep.subr.bf16.mxu1 %v1630_v52 }
 0x25b   :  { %1421 = vmatpush3.bf16.msra.mxu1 %v1420_v46  ;;  %v1463_v46 = vpack.c.bf16 %v775_v44, %v771_v43  ;;  %v846_v43 = vld [vmem:[%s2835_s12 + $0x260] sm:$0xff] }
 0x25c   :  { %1422 = vmatprep.subr.bf16.mxu1 %v1630_v52 }
 0x25d   :  { %1464 = vmatprep.subr.bf16.mxu0 %v1463_v46  ;;  %v855_v46 = vld [vmem:[%s2835_s12 + $0x2a8] sm:$0xff] }
 0x25e   :  { %v1503_v47 = vpack.c.bf16 %v855_v46, %v851_v45  ;;  %v805_v45 = vld [vmem:[%s2835_s12 + $0x118] sm:$0xff] }
 0x25f   :  { %1424 = vmatpush3.bf16.msra.mxu1 %v1423_v49  ;;  %v774_v49 = vld [vmem:[%s2835_s12 + $0x20] sm:$0xff]  ;;  %v809_v46 = vld [vmem:[%s2835_s12 + $0x138] sm:$0xff] }
 0x260   :  { %1425 = vmatprep.subr.bf16.mxu1 %v1630_v52  ;;  %v1465_v51 = vpack.c.bf16 %v774_v49, %v770_v48  ;;  %v850_v48 = vld [vmem:[%s2835_s12 + $0x280] sm:$0xff] }
 0x261   :  { %v854_v49 = vld [vmem:[%s2835_s12 + $0x2a0] sm:$0xff] }
 0x262   :  { %1466 = vmatpush1.bf16.msra.mxu0 %v1465_v51  ;;  %v859_v51 = vld [vmem:[%s2835_s12 + $0x2c8] sm:$0xff] }
 0x263   :  { %1427 = vmatpush3.bf16.msra.mxu1 %v1426_v53  ;;  %v779_v53 = vld [vmem:[%s2835_s12 + $0x48] sm:$0xff] }
 0x264   :  { %1428 = vmatprep.subr.bf16.mxu1 %v1630_v52  ;;  %v655_v52 = vld [vmem:[%s2833_s10 + $0x10] sm:$0xff]  ;;  %v1467_v58 = vpack.c.bf16 %v783_v56, %v779_v53  ;;  %v863_v53 = vld [vmem:[%s2835_s12 + $0x2e8] sm:$0xff] }
 0x265   :  { %v1433_v2 = vpack.c.bf16 %v655_v52, %v653_v62  ;;  %v787_v62 = vld [vmem:[%s2835_s12 + $0x88] sm:$0xff]  ;;  %v1507_v56 = vpack.c.bf16 %v863_v53, %v859_v51  ;;  %v813_v51 = vld [vmem:[%s2835_s12 + $0x158] sm:$0xff] }
 0x266   :  { %1468 = vmatprep.subr.bf16.mxu0 %v1467_v58  ;;  %v858_v58 = vld [vmem:[%s2835_s12 + $0x2c0] sm:$0xff]  ;;  %v817_v53 = vld [vmem:[%s2835_s12 + $0x178] sm:$0xff] }
 0x267   :  { %1430 = vmatpush3.bf16.msra.mxu1 %v1429_v59  ;;  %v778_v59 = vld [vmem:[%s2835_s12 + $0x40] sm:$0xff] }
 0x268   :  { %1432 = vmatprep.subr.bf16.mxu1 %v1431_v63  ;;  %v1469_v61 = vpack.c.bf16 %v782_v60, %v778_v59  ;;  %v791_v63 = vld [vmem:[%s2835_s12 + $0xa8] sm:$0xff]  ;;  %v862_v59 = vld [vmem:[%s2835_s12 + $0x2e0] sm:$0xff] }
 0x269   :  { %v1471_v52 = vpack.c.bf16 %v791_v63, %v787_v62  ;;  %v1509_v60 = vpack.c.bf16 %v862_v59, %v858_v58  ;;  %v871_v62 = vld [vmem:[%s2835_s12 + $0x328] sm:$0xff]  ;;  %v1547_v58 = vpack.c.bf16 %v817_v53, %v813_v51  ;;  %v812_v59 = vld [vmem:[%s2835_s12 + $0x150] sm:$0xff] }
 0x26a   :  { %1221 = vmatmul.mubr.f32.vlgmr.msra.gmra.mrb[4].mxu1 %v458_v34  ;;  %v677_v34 = vld [vmem:[%s2833_s10 + $0xc0] sm:$0xff]  ;;  %1470 = vmatpush1.bf16.msra.mxu0 %v1469_v61  ;;  %v867_v61 = vld [vmem:[%s2835_s12 + $0x308] sm:$0xff]  ;;  %v888_v53 = vld [vmem:[%s2835_s12 + $0x3b0] sm:$0xff] }
 0x26b   :  { %761 = vmatprep.mubr.f32.mxu1 %v1632_v26  ;;  %1434 = vmatpush1.bf16.msra.mxu1 %v1433_v2  ;;  %v676_v26 = vld [vmem:[%s2833_s10 + $0xb8] sm:$0xff]  ;;  %v1457_v38 = vpack.c.bf16 %v679_v35, %v677_v34  ;;  %v1473_v2 = vpack.c.bf16 %v790_v1, %v786_v0  ;;  %v839_v34 = vld [vmem:[%s2835_s12 + $0x228] sm:$0xff]  ;;  %v1511_v63 = vpack.c.bf16 %v871_v62, %v867_v61  ;;  %v870_v0 = vld [vmem:[%s2835_s12 + $0x320] sm:$0xff] }
 0x26c   :  { %1436 = vmatprep.subr.bf16.mxu1 %v1435_v3  ;;  %v1451_v28 = vpack.c.bf16 %v676_v26, %v674_v25  ;;  %1472 = vmatprep.subr.bf16.mxu0 %v1471_v52  ;;  %v795_v3 = vld [vmem:[%s2835_s12 + $0xc8] sm:$0xff]  ;;  %v822_v25 = vld [vmem:[%s2835_s12 + $0x1a0] sm:$0xff]  ;;  %v821_v61 = vld [vmem:[%s2835_s12 + $0x198] sm:$0xff] }
 0x26d   :  { %v1475_v5 = vpack.c.bf16 %v799_v4, %v795_v3  ;;  %v866_v52 = vld [vmem:[%s2835_s12 + $0x300] sm:$0xff]  ;;  %v879_v3 = vld [vmem:[%s2835_s12 + $0x368] sm:$0xff]  ;;  %v825_v62 = vld [vmem:[%s2835_s12 + $0x1b8] sm:$0xff] }
 0x26e   :  { %1474 = vmatpush1.bf16.msra.mxu0 %v1473_v2  ;;  %v1513_v1 = vpack.c.bf16 %v870_v0, %v866_v52  ;;  %v875_v2 = vld [vmem:[%s2835_s12 + $0x348] sm:$0xff]  ;;  %v1551_v52 = vpack.c.bf16 %v825_v62, %v821_v61  ;;  %v820_v0 = vld [vmem:[%s2835_s12 + $0x190] sm:$0xff]  ;;  %v897_v62 = vld [vmem:[%s2835_s12 + $0x3f8] sm:$0xff] }
 0x26f   :  { %1438 = vmatpush1.bf16.msra.mxu1 %v1437_v8  ;;  %v1477_v8 = vpack.c.bf16 %v798_v7, %v794_v6  ;;  %1476 = vmatprep.subr.bf16.mxu0 %v1475_v5  ;;  %v1515_v4 = vpack.c.bf16 %v879_v3, %v875_v2  ;;  %v874_v5 = vld [vmem:[%s2835_s12 + $0x340] sm:$0xff]  ;;  %v829_v2 = vld [vmem:[%s2835_s12 + $0x1d8] sm:$0xff] }
 0x270   :  { %1440 = vmatprep.subr.bf16.mxu1 %v1439_v9  ;;  %v803_v9 = vld [vmem:[%s2835_s12 + $0x108] sm:$0xff]  ;;  %v878_v6 = vld [vmem:[%s2835_s12 + $0x360] sm:$0xff]  ;;  %v833_v3 = vld [vmem:[%s2835_s12 + $0x1f8] sm:$0xff] }
 0x271   :  { %v1479_v11 = vpack.c.bf16 %v807_v10, %v803_v9  ;;  %v1517_v7 = vpack.c.bf16 %v878_v6, %v874_v5  ;;  %v887_v9 = vld [vmem:[%s2835_s12 + $0x3a8] sm:$0xff]  ;;  %v1555_v5 = vpack.c.bf16 %v833_v3, %v829_v2  ;;  %v828_v6 = vld [vmem:[%s2835_s12 + $0x1d0] sm:$0xff] }
 0x272   :  { %1478 = vmatpush1.bf16.msra.mxu0 %v1477_v8  ;;  %v883_v8 = vld [vmem:[%s2835_s12 + $0x388] sm:$0xff]  ;;  %v892_v2 = vld [vmem:[%s2835_s12 + $0x3d0] sm:$0xff] }
 0x273   :  { %1442 = vmatpush1.bf16.msra.mxu1 %v1441_v12  ;;  %v802_v12 = vld [vmem:[%s2835_s12 + $0x100] sm:$0xff]  ;;  %1480 = vmatprep.subr.bf16.mxu0 %v1479_v11  ;;  %v1519_v10 = vpack.c.bf16 %v887_v9, %v883_v8  ;;  %v837_v8 = vld [vmem:[%s2835_s12 + $0x218] sm:$0xff]  ;;  %v896_v3 = vld [vmem:[%s2835_s12 + $0x3f0] sm:$0xff] }
 0x274   :  { %1444 = vmatprep.subr.bf16.mxu1 %v1443_v15  ;;  %v1481_v14 = vpack.c.bf16 %v806_v13, %v802_v12  ;;  %v811_v15 = vld [vmem:[%s2835_s12 + $0x148] sm:$0xff]  ;;  %v1082_v11 = vld [vmem:[%s2830_s7] ss:$0 sm:$0xff]  ;;  %v841_v9 = vld [vmem:[%s2835_s12 + $0x238] sm:$0xff] }
 0x275   :  { %v1483_v17 = vpack.c.bf16 %v815_v16, %v811_v15  ;;  %v1083_v15 = vld [vmem:[%s2832_s9] ss:$0 sm:$0xff] }
 0x276   :  { %1482 = vmatpush1.bf16.msra.mxu0 %v1481_v14 }
 0x277   :  { %1446 = vmatpush1.bf16.msra.mxu1 %v1445_v18  ;;  %v810_v18 = vld [vmem:[%s2835_s12 + $0x140] sm:$0xff]  ;;  %1484 = vmatprep.subr.bf16.mxu0 %v1483_v17 }
 0x278   :  { %1448 = vmatprep.subr.bf16.mxu1 %v1447_v21  ;;  %v1485_v20 = vpack.c.bf16 %v814_v19, %v810_v18  ;;  %v819_v21 = vld [vmem:[%s2835_s12 + $0x188] sm:$0xff] }
 0x279   :  { %v1487_v23 = vpack.c.bf16 %v823_v22, %v819_v21  ;;  %v647_v21 = vld [vmem:[%s2824_s1] sm:$0xff]  ;;  %v772_v22 = vld [vmem:[%s2835_s12 + $0x10] sm:$0xff] }
 0x27a   :  { %1486 = vmatpush1.bf16.msra.mxu0 %v1485_v20 }
 0x27b   :  { %1450 = vmatpush1.bf16.msra.mxu1 %v1449_v24  ;;  %v818_v24 = vld [vmem:[%s2835_s12 + $0x180] sm:$0xff]  ;;  %1488 = vmatprep.subr.bf16.mxu0 %v1487_v23  ;;  %v776_v23 = vld [vmem:[%s2835_s12 + $0x30] sm:$0xff] }
 0x27c   :  { %1452 = vmatprep.subr.bf16.mxu1 %v1451_v28  ;;  %v1489_v26 = vpack.c.bf16 %v822_v25, %v818_v24  ;;  %v831_v28 = vld [vmem:[%s2835_s12 + $0x1e8] sm:$0xff]  ;;  %v781_v25 = vld [vmem:[%s2835_s12 + $0x58] sm:$0xff] }
 0x27d   :  { %v1491_v29 = vpack.c.bf16 %v831_v28, %v827_v27  ;;  %v1529_v28 = vpack.c.bf16 %v776_v23, %v772_v22 }
 0x27e   :  { %1490 = vmatpush1.bf16.msra.mxu0 %v1489_v26  ;;  %v785_v26 = vld [vmem:[%s2835_s12 + $0x78] sm:$0xff] }
 0x27f   :  { %1454 = vmatpush1.bf16.msra.mxu1 %v1453_v32  ;;  %v1493_v32 = vpack.c.bf16 %v830_v31, %v826_v30  ;;  %1492 = vmatprep.subr.bf16.mxu0 %v1491_v29  ;;  %v1531_v30 = vpack.c.bf16 %v785_v26, %v781_v25  ;;  %v780_v31 = vld [vmem:[%s2835_s12 + $0x50] sm:$0xff]  ;;  %v861_v26 = vld [vmem:[%s2835_s12 + $0x2d8] sm:$0xff] }
 0x280   :  { %1456 = vmatprep.subr.bf16.mxu1 %v1455_v33  ;;  %v835_v33 = vld [vmem:[%s2835_s12 + $0x208] sm:$0xff]  ;;  %v856_v25 = vld [vmem:[%s2835_s12 + $0x2b0] sm:$0xff] }
 0x281   :  { %v1495_v35 = vpack.c.bf16 %v839_v34, %v835_v33  ;;  %v789_v33 = vld [vmem:[%s2835_s12 + $0x98] sm:$0xff] }
 0x282   :  { %1494 = vmatpush1.bf16.msra.mxu0 %v1493_v32  ;;  %v784_v32 = vld [vmem:[%s2835_s12 + $0x70] sm:$0xff]  ;;  %v793_v34 = vld [vmem:[%s2835_s12 + $0xb8] sm:$0xff] }
 0x283   :  { %1458 = vmatpush1.bf16.msra.mxu1 %v1457_v38  ;;  %v1497_v38 = vpack.c.bf16 %v838_v37, %v834_v36  ;;  %1496 = vmatprep.subr.bf16.mxu0 %v1495_v35  ;;  %v1533_v35 = vpack.c.bf16 %v784_v32, %v780_v31  ;;  %v1535_v36 = vpack.c.bf16 %v793_v34, %v789_v33  ;;  %v788_v37 = vld [vmem:[%s2835_s12 + $0x90] sm:$0xff]  ;;  %v869_v32 = vld [vmem:[%s2835_s12 + $0x318] sm:$0xff] }
 0x284   :  { %1460 = vmatprep.subr.bf16.mxu1 %v1459_v39  ;;  %v843_v39 = vld [vmem:[%s2835_s12 + $0x248] sm:$0xff]  ;;  %v864_v31 = vld [vmem:[%s2835_s12 + $0x2f0] sm:$0xff]  ;;  %v873_v33 = vld [vmem:[%s2835_s12 + $0x338] sm:$0xff] }
 0x285   :  { %v1499_v41 = vpack.c.bf16 %v847_v40, %v843_v39  ;;  %v797_v39 = vld [vmem:[%s2835_s12 + $0xd8] sm:$0xff] }
 0x286   :  { %1498 = vmatpush1.bf16.msra.mxu0 %v1497_v38  ;;  %v792_v38 = vld [vmem:[%s2835_s12 + $0xb0] sm:$0xff]  ;;  %v801_v40 = vld [vmem:[%s2835_s12 + $0xf8] sm:$0xff] }
 0x287   :  { %1462 = vmatpush1.bf16.msra.mxu1 %v1461_v42  ;;  %v842_v42 = vld [vmem:[%s2835_s12 + $0x240] sm:$0xff]  ;;  %1500 = vmatprep.subr.bf16.mxu0 %v1499_v41  ;;  %v1537_v41 = vpack.c.bf16 %v792_v38, %v788_v37  ;;  %v872_v37 = vld [vmem:[%s2835_s12 + $0x330] sm:$0xff]  ;;  %v877_v38 = vld [vmem:[%s2835_s12 + $0x358] sm:$0xff] }
 0x288   :  { %1528 = vmatprep.subr.bf16.mxu1 %v1527_v50  ;;  %v1501_v44 = vpack.c.bf16 %v846_v43, %v842_v42  ;;  %v1505_v50 = vpack.c.bf16 %v854_v49, %v850_v48  ;;  %v1539_v42 = vpack.c.bf16 %v801_v40, %v797_v39  ;;  %v796_v43 = vld [vmem:[%s2835_s12 + $0xd0] sm:$0xff]  ;;  %v1543_v48 = vpack.c.bf16 %v809_v46, %v805_v45  ;;  %v881_v39 = vld [vmem:[%s2835_s12 + $0x378] sm:$0xff] }
 0x289   :  { %v804_v49 = vld [vmem:[%s2835_s12 + $0x110] sm:$0xff]  ;;  %v889_v45 = vld [vmem:[%s2835_s12 + $0x3b8] sm:$0xff] }
 0x28a   :  { %1502 = vmatpush1.bf16.msra.mxu0 %v1501_v44  ;;  %v800_v44 = vld [vmem:[%s2835_s12 + $0xf0] sm:$0xff] }
 0x28b   :  { %1504 = vmatprep.subr.bf16.mxu0 %v1503_v47  ;;  %v1541_v47 = vpack.c.bf16 %v800_v44, %v796_v43  ;;  %v880_v43 = vld [vmem:[%s2835_s12 + $0x370] sm:$0xff]  ;;  %v885_v44 = vld [vmem:[%s2835_s12 + $0x398] sm:$0xff] }
 0x28e   :  { %1506 = vmatpush1.bf16.msra.mxu0 %v1505_v50  ;;  %v808_v50 = vld [vmem:[%s2835_s12 + $0x130] sm:$0xff] }
 0x28f   :  { %1508 = vmatprep.subr.bf16.mxu0 %v1507_v56  ;;  %v1545_v56 = vpack.c.bf16 %v808_v50, %v804_v49  ;;  %v886_v49 = vld [vmem:[%s2835_s12 + $0x3a0] sm:$0xff]  ;;  %v884_v50 = vld [vmem:[%s2835_s12 + $0x390] sm:$0xff] }
 0x292   :  { %1510 = vmatpush1.bf16.msra.mxu0 %v1509_v60  ;;  %v816_v60 = vld [vmem:[%s2835_s12 + $0x170] sm:$0xff] }
 0x293   :  { %1512 = vmatprep.subr.bf16.mxu0 %v1511_v63  ;;  %v1549_v63 = vpack.c.bf16 %v816_v60, %v812_v59  ;;  %v895_v59 = vld [vmem:[%s2835_s12 + $0x3e8] sm:$0xff]  ;;  %v893_v60 = vld [vmem:[%s2835_s12 + $0x3d8] sm:$0xff] }
 0x296   :  { %1514 = vmatpush1.bf16.msra.mxu0 %v1513_v1  ;;  %v824_v1 = vld [vmem:[%s2835_s12 + $0x1b0] sm:$0xff] }
 0x297   :  { %1516 = vmatprep.subr.bf16.mxu0 %v1515_v4  ;;  %v1553_v4 = vpack.c.bf16 %v824_v1, %v820_v0  ;;  %v1587_v0 = vpack.c.bf16 %v897_v62, %v893_v60 }
 0x29a   :  { %1518 = vmatpush1.bf16.msra.mxu0 %v1517_v7  ;;  %v832_v7 = vld [vmem:[%s2835_s12 + $0x1f0] sm:$0xff] }
 0x29b   :  { %1520 = vmatprep.subr.bf16.mxu0 %v1519_v10  ;;  %v1557_v10 = vpack.c.bf16 %v832_v7, %v828_v6 }
 0x31d   :  { %v550_v12 = vpop.f32.mrb[2].mxu1 }
 0x31e   :  { %v551_v13 = vadd.f32 %v1082_v11, %v550_v12  ;;  %v1187_v14 = vpop.f32.mrb[3].mxu1  ;;  %v1559_v11 = vpack.c.bf16 %v841_v9, %v837_v8  ;;  %v836_v12 = vld [vmem:[%s2835_s12 + $0x210] sm:$0xff] }
 0x31f   :  { %v845_v14 = vld [vmem:[%s2835_s12 + $0x258] sm:$0xff] }
 0x320   :  { %1066 = vst [vmem:[%s2838_s15] sm:$0xff] %v551_v13 }
 0x33d   :  { %v643_v16 = vpop.f32.mrb[4].mxu1 }
 0x33e   :  { %v644_v17 = vadd.f32 %v1083_v15, %v643_v16  ;;  %v1222_v18 = vpop.f32.mrb[5].mxu1  ;;  %v849_v15 = vld [vmem:[%s2835_s12 + $0x278] sm:$0xff] }
 0x33f   :  { %v844_v18 = vld [vmem:[%s2835_s12 + $0x250] sm:$0xff] }
 0x340   :  { %v648_v19 = vmul.f32 0.5, %v644_v17  ;;  %1067 = vst [vmem:[%s2839_s16] sm:$0xff] %v644_v17  ;;  %v1563_v17 = vpack.c.bf16 %v849_v15, %v845_v14  ;;  %v910_v14 = vsub.s32 2, %v2223_v54  ;;  %v898_v15 = vld [vmem:[%s2836_s13] sm:$0xf] }
 0x342   :  { %v649_v20 = vmul.f32 1.442695, %v648_v19  ;;  %v848_v19 = vld [vmem:[%s2835_s12 + $0x270] sm:$0xff] }
 0x343   :  { %v1565_v22 = vpack.c.bf16 %v848_v19, %v844_v18  ;;  %v911_v18 = vrot.slane %v898_v15, %v910_v14  ;;  %v907_v19 = vrot.slane %v898_v15, %v2232_v57 }
 0x344   :  { %1601 = vpow2.f32 %v649_v20  ;;  %v853_v20 = vld [vmem:[%s2835_s12 + $0x298] sm:$0xff] }
 0x34e   :  { %v1602_v24 = vpop.eup %1601 }
 0x34f   :  { %v651_v27 = vmul.f32 %v1602_v24, %v647_v21  ;;  %v857_v21 = vld [vmem:[%s2835_s12 + $0x2b8] sm:$0xff]  ;;  %v852_v24 = vld [vmem:[%s2835_s12 + $0x290] sm:$0xff] }
 0x350   :  { %v1567_v23 = vpack.c.bf16 %v857_v21, %v853_v20 }
 0x351   :  { %v652_v29 = vadd.f32 %v651_v27, %v551_v13  ;;  %v840_v13 = vld [vmem:[%s2835_s12 + $0x230] sm:$0xff]  ;;  %v865_v27 = vld [vmem:[%s2835_s12 + $0x2f8] sm:$0xff] }
 0x352   :  { %v1561_v16 = vpack.c.bf16 %v840_v13, %v836_v12 }
 0x353   :  { %762 = vmatmul.mubr.f32.vlgmr.msra.gmra.mrb[6].mxu1 %v652_v29  ;;  %v1571_v29 = vpack.c.bf16 %v865_v27, %v861_v26 }
 0x354   :  { %1530 = vmatpush1.bf16.msra.mxu1 %v1529_v28  ;;  %v1569_v28 = vpack.c.bf16 %v856_v25, %v852_v24 }
 0x355   :  { %1532 = vmatprep.subr.bf16.mxu1 %v1531_v30  ;;  %v860_v30 = vld [vmem:[%s2835_s12 + $0x2d0] sm:$0xff] }
 0x356   :  { %v1573_v34 = vpack.c.bf16 %v864_v31, %v860_v30 }
 0x358   :  { %1534 = vmatpush1.bf16.msra.mxu1 %v1533_v35  ;;  %v1575_v35 = vpack.c.bf16 %v873_v33, %v869_v32 }
 0x359   :  { %1536 = vmatprep.subr.bf16.mxu1 %v1535_v36  ;;  %v868_v36 = vld [vmem:[%s2835_s12 + $0x310] sm:$0xff] }
 0x35a   :  { %v1577_v40 = vpack.c.bf16 %v872_v37, %v868_v36 }
 0x35c   :  { %1538 = vmatpush1.bf16.msra.mxu1 %v1537_v41  ;;  %v1579_v41 = vpack.c.bf16 %v881_v39, %v877_v38 }
 0x35d   :  { %1540 = vmatprep.subr.bf16.mxu1 %v1539_v42  ;;  %v876_v42 = vld [vmem:[%s2835_s12 + $0x350] sm:$0xff] }
 0x35e   :  { %v1581_v46 = vpack.c.bf16 %v880_v43, %v876_v42 }
 0x360   :  { %1542 = vmatpush1.bf16.msra.mxu1 %v1541_v47  ;;  %v1583_v47 = vpack.c.bf16 %v889_v45, %v885_v44 }
 0x361   :  { %1544 = vmatprep.subr.bf16.mxu1 %v1543_v48  ;;  %v882_v48 = vld [vmem:[%s2835_s12 + $0x380] sm:$0xff] }
 0x362   :  { %v1521_v51 = vpack.c.bf16 %v886_v49, %v882_v48 }
 0x364   :  { %1546 = vmatpush1.bf16.msra.mxu1 %v1545_v56  ;;  %v1585_v56 = vpack.c.bf16 %v888_v53, %v884_v50  ;;  %1522 = vmatpush1.bf16.msra.mxu0 %v1521_v51 }
 0x365   :  { %1548 = vmatprep.subr.bf16.mxu1 %v1547_v58  ;;  %v891_v58 = vld [vmem:[%s2835_s12 + $0x3c8] sm:$0xff] }
 0x366   :  { %v1523_v61 = vpack.c.bf16 %v895_v59, %v891_v58 }
 0x368   :  { %1550 = vmatpush1.bf16.msra.mxu1 %v1549_v63  ;;  %v890_v63 = vld [vmem:[%s2835_s12 + $0x3c0] sm:$0xff]  ;;  %1524 = vmatprep.subr.bf16.mxu0 %v1523_v61 }
 0x369   :  { %1552 = vmatprep.subr.bf16.mxu1 %v1551_v52  ;;  %v894_v52 = vld [vmem:[%s2835_s12 + $0x3e0] sm:$0xff] }
 0x36a   :  { %v1525_v1 = vpack.c.bf16 %v894_v52, %v890_v63 }
 0x36c   :  { %1554 = vmatpush1.bf16.msra.mxu1 %v1553_v4  ;;  %v1589_v4 = vpack.c.bf16 %v896_v3, %v892_v2  ;;  %1526 = vmatpush1.bf16.msra.mxu0 %v1525_v1 }
 0x36d   :  { %1556 = vmatprep.subr.bf16.mxu1 %v1555_v5  ;;  %v685_v5 = vld [vmem:[%s2834_s11] sm:$0x3] }
 0x36e   :  { %v690_v6 = vrot.slane %v685_v5, %v2226_v55  ;;  %v694_v7 = vrot.slane %v685_v5, %v2232_v57 }
 0x370   :  { %1558 = vmatpush1.bf16.msra.mxu1 %v1557_v10 }
 0x371   :  { %1560 = vmatprep.subr.bf16.mxu1 %v1559_v11 }
 0x374   :  { %1562 = vmatpush1.bf16.msra.mxu1 %v1561_v16  ;;  %v914_v16 = vsub.s32 3, %v2223_v54 }
 0x375   :  { %1564 = vmatprep.subr.bf16.mxu1 %v1563_v17  ;;  %v903_v17 = vrot.slane %v898_v15, %v2226_v55 }
 0x376   :  { %v915_v20 = vrot.slane %v898_v15, %v914_v16 }
 0x378   :  { %1566 = vmatpush1.bf16.msra.mxu1 %v1565_v22 }
 0x379   :  { %1568 = vmatprep.subr.bf16.mxu1 %v1567_v23 }
 0x37c   :  { %1570 = vmatpush1.bf16.msra.mxu1 %v1569_v28 }
 0x37d   :  { %1572 = vmatprep.subr.bf16.mxu1 %v1571_v29 }
 0x380   :  { %1574 = vmatpush1.bf16.msra.mxu1 %v1573_v34 }
 0x381   :  { %1576 = vmatprep.subr.bf16.mxu1 %v1575_v35 }
 0x384   :  { %1578 = vmatpush1.bf16.msra.mxu1 %v1577_v40 }
 0x385   :  { %1580 = vmatprep.subr.bf16.mxu1 %v1579_v41 }
 0x388   :  { %1582 = vmatpush1.bf16.msra.mxu1 %v1581_v46 }
 0x389   :  { %1584 = vmatprep.subr.bf16.mxu1 %v1583_v47 }
 0x38c   :  { %1586 = vmatpush1.bf16.msra.mxu1 %v1585_v56 }
 0x38d   :  { %1588 = vmatprep.subr.bf16.mxu1 %v1587_v0 }
 0x390   :  { %1590 = vmatpush1.bf16.msra.mxu1 %v1589_v4 }
 0x426   :  { %v763_v8 = vpop.f32.mrb[6].mxu1 }
 0x427   :  { %v764_v9 = vadd.f32 %v763_v8, %v690_v6  ;;  %v765_v10 = vpop.f32.mrb[7].mxu1 }
 0x428   :  { %v766_v11 = vadd.f32 %v765_v10, %v694_v7 }
 0x429   :  { %v768_v13 = vmax.f32 %v764_v9, 0.0 }
 0x42a   :  { %v769_v12 = vmax.f32 %v766_v11, 0.0 }
 0x42c   :  { %984 = vmatprep.mubr.f32.mxu0 %v769_v12  ;;  %1055 = vmatprep.mubr.f32.mxu1 %v769_v12 }
 0x42d   :  { %985 = vmatmul.mubr.f32.vlgmr.msra.gmra.mrb[2].mxu0 %v768_v13  ;;  %1056 = vmatmul.mubr.f32.vlgmr.msra.gmra.mrb[8].mxu1 %v768_v13 }
 0x500   :  { %v986_v21 = vpop.f32.mrb[2].mxu0  ;;  %v1057_v22 = vpop.f32.mrb[8].mxu1 }
 0x501   :  { %v987_v23 = vadd.f32 %v986_v21, %v903_v17  ;;  %v1058_v24 = vadd.f32 %v1057_v22, %v911_v18  ;;  %v988_v25 = vpop.f32.mrb[3].mxu0  ;;  %v1059_v26 = vpop.f32.mrb[9].mxu1 }
 0x502   :  { %v989_v27 = vadd.f32 %v988_v25, %v907_v19  ;;  %v1060_v28 = vadd.f32 %v1059_v26, %v915_v20 }
 0x503   :  { %1062 = vst [vmem:[%s2837_s14] sm:$0xff] %v987_v23  ;;  %1064 = vst [vmem:[%s2837_s14 + $0x10] sm:$0xff] %v1058_v24 }
 0x504   :  { %1063 = vst [vmem:[%s2837_s14 + $0x8] sm:$0xff] %v989_v27  ;;  %1065 = vst [vmem:[%s2837_s14 + $0x18] sm:$0xff] %v1060_v28 }
 0x505   :  { %1080 = vsyncpa [#allocation3], 1 }

// kernel: vae_forward.3
= control target key start
LH: loop header
LB: loop body
LE: loop exit
PB: predicated region body
PF: predicated region fallthrough
CT: control target
= control target key end

     0   :  { %18 = vsyncpa [#allocation3], 0  ;;  %s2751_s0 = inlined_call_operand.vmem [shape: f32[16,256], index: 0, kind: input, shape index: {}]   ;;  %s2752_s1 = inlined_call_operand.hbm [shape: f32[256,768], index: 1, kind: input, shape index: {}]   ;;  %s2753_s2 = inlined_call_operand.vmem [shape: f32[1,768], index: 2, kind: input, shape index: {}]   ;;  %s2754_s3 = inlined_call_operand.hbm [shape: f32[256,256], index: 3, kind: input, shape index: {}]   ;;  %s2755_s4 = inlined_call_operand.vmem [shape: f32[1,256], index: 4, kind: input, shape index: {}]   ;;  %s2756_s5 = inlined_call_operand.vmem [shape: f32[1,256], index: 5, kind: input, shape index: {}]   ;;  %s2757_s6 = inlined_call_operand.vmem [shape: f32[1,256], index: 6, kind: input, shape index: {}]   ;;  %s2758_s7 = inlined_call_operand.hbm [shape: f32[256,512], index: 7, kind: input, shape index: {}]   ;;  %s2759_s8 = inlined_call_operand.vmem [shape: f32[1,512], index: 8, kind: input, shape index: {}]   ;;  %s2760_s9 = inlined_call_operand.hbm [shape: f32[512,256], index: 9, kind: input, shape index: {}]   ;;  %s2761_s10 = inlined_call_operand.vmem [shape: f32[1,256], index: 10, kind: input, shape index: {}]   ;;  %s2762_s11 = inlined_call_operand.vmem [shape: f32[1,256], index: 11, kind: input, shape index: {}]   ;;  %s2763_s12 = inlined_call_operand.vmem [shape: f32[1,256], index: 12, kind: input, shape index: {}]   ;;  %s2764_s13 = inlined_call_operand.vmem [shape: f32[16,256], index: 13, kind: output, shape index: {}]  }
   0x1   :  { %19 = vsyncpa [#allocation5], 0 }
   0x2   :  { %20 = vsyncpa [#allocation8], 0  ;;  %s2422_s25 = smov [#allocation4]   ;;  %s2328_s29 = scalar_lea.hbm %s2754_s3, 8192 }
   0x3   :  { %s42_s26 = sshll.u32 %s2422_s25, 4  ;;  %p2329_p0 = scmp.ne.s32.totalorder %s2754_s3, %s2328_s29  ;;  %s43_s26 = int_to_ptr.vmem [resolvable:$true] %s42_s26 }
   0x4   :  { %p2332_p1 = scmp.lt.u32.totalorder %s2328_s29, %s2754_s3 }
   0x6   :  { %p2334_p2 = pnand %p2332_p1, %p2329_p0 }
   0x8   :  { %2337 = shalt.err (!%p2334_p2)
}
   0x9   :  { %s2338_s17 = scalar_lea.vmem %s43_s26, 8192  ;;  %p2343_p4 = scmp.lt.s32.totalorder %s43_s26, %s43_s26 }
   0xa   :  { %p2339_p3 = scmp.ne.s32.totalorder %s43_s26, %s2338_s17  ;;  %p2344_p5 = scmp.lt.s32.totalorder %s2338_s17, %s2338_s17 }
   0xc   :  { %p2345_p6 = por %p2344_p5, %p2343_p4 }
   0xe   :  { %p2346_p7 = pnand %p2345_p6, %p2339_p3 }
  0x10   :  { %2349 = shalt.err (!%p2346_p7)
}
  0x11   :  { %s2423_s18 = smov 256   ;;  %s2424_s19 = smov 16  }
  0x12   :  { %48 = dma.hbm_to_vmem [thread:$0]  %s2754_s3, 8192, %s43_s26, [#allocation5], %s2423_s18, %s2423_s18, %s2424_s19  }
  0x13   :  { %s2425_s22 = smov [#allocation2]   ;;  %s2350_s27 = scalar_lea.hbm %s2752_s1, 24576 }
  0x14   :  { %s28_s23 = sshll.u32 %s2425_s22, 4  ;;  %p2351_p8 = scmp.ne.s32.totalorder %s2752_s1, %s2350_s27  ;;  %s29_s23 = int_to_ptr.vmem [resolvable:$true] %s28_s23 }
  0x15   :  { %p2354_p9 = scmp.lt.u32.totalorder %s2350_s27, %s2752_s1 }
  0x17   :  { %p2356_p10 = pnand %p2354_p9, %p2351_p8 }
  0x19   :  { %2359 = shalt.err (!%p2356_p10)
}
  0x1a   :  { %s2360_s15 = scalar_lea.vmem %s29_s23, 24576  ;;  %p2365_p12 = scmp.lt.s32.totalorder %s29_s23, %s29_s23 }
  0x1b   :  { %p2361_p11 = scmp.ne.s32.totalorder %s29_s23, %s2360_s15  ;;  %p2366_p13 = scmp.lt.s32.totalorder %s2360_s15, %s2360_s15 }
  0x1d   :  { %p2367_p0 = por %p2366_p13, %p2365_p12 }
  0x1f   :  { %p2368_p1 = pnand %p2367_p0, %p2361_p11 }
  0x21   :  { %2371 = shalt.err (!%p2368_p1)
}
  0x22   :  { %s2426_s3 = smov 768   ;;  %s2427_s26 = smov 48  }
  0x23   :  { %34 = dma.hbm_to_vmem [thread:$0]  %s2752_s1, 24576, %s29_s23, [#allocation3], %s2426_s3, %s2426_s3, %s2427_s26  }
  0x24   :  { %s2428_s20 = smov [#allocation6]   ;;  %s2372_s25 = scalar_lea.hbm %s2758_s7, 16384 }
  0x25   :  { %s60_s21 = sshll.u32 %s2428_s20, 4  ;;  %p2373_p2 = scmp.ne.s32.totalorder %s2758_s7, %s2372_s25  ;;  %s61_s21 = int_to_ptr.vmem [resolvable:$true] %s60_s21 }
  0x26   :  { %p2376_p3 = scmp.lt.u32.totalorder %s2372_s25, %s2758_s7 }
  0x28   :  { %p2378_p4 = pnand %p2376_p3, %p2373_p2 }
  0x2a   :  { %2381 = shalt.err (!%p2378_p4)
}
  0x2b   :  { %s2382_s14 = scalar_lea.vmem %s61_s21, 16384  ;;  %p2387_p6 = scmp.lt.s32.totalorder %s61_s21, %s61_s21 }
  0x2c   :  { %p2383_p5 = scmp.ne.s32.totalorder %s61_s21, %s2382_s14  ;;  %p2388_p7 = scmp.lt.s32.totalorder %s2382_s14, %s2382_s14 }
  0x2e   :  { %p2389_p8 = por %p2388_p7, %p2387_p6 }
  0x30   :  { %p2390_p9 = pnand %p2389_p8, %p2383_p5 }
  0x32   :  { %2393 = shalt.err (!%p2390_p9)
}
  0x33   :  { %s2429_s1 = smov 512   ;;  %s2430_s23 = smov 32  }
  0x34   :  { %66 = dma.hbm_to_vmem [thread:$0]  %s2758_s7, 16384, %s61_s21, [#allocation5], %s2429_s1, %s2429_s1, %s2430_s23  }
  0x35   :  { %s2431_s26 = smov [#allocation7]   ;;  %s2394_s22 = scalar_lea.hbm %s2760_s9, 16384 }
  0x36   :  { %s74_s16 = sshll.u32 %s2431_s26, 4  ;;  %p2395_p10 = scmp.ne.s32.totalorder %s2760_s9, %s2394_s22  ;;  %s75_s16 = int_to_ptr.vmem [resolvable:$true] %s74_s16 }
  0x37   :  { %p2398_p11 = scmp.lt.u32.totalorder %s2394_s22, %s2760_s9 }
  0x39   :  { %p2400_p12 = pnand %p2398_p11, %p2395_p10 }
  0x3b   :  { %2403 = shalt.err (!%p2400_p12)
}
  0x3c   :  { %s2404_s29 = scalar_lea.vmem %s75_s16, 16384  ;;  %p2409_p0 = scmp.lt.s32.totalorder %s75_s16, %s75_s16 }
  0x3d   :  { %p2405_p13 = scmp.ne.s32.totalorder %s75_s16, %s2404_s29  ;;  %p2410_p1 = scmp.lt.s32.totalorder %s2404_s29, %s2404_s29 }
  0x3f   :  { %p2411_p2 = por %p2410_p1, %p2409_p0 }
  0x41   :  { %p2412_p3 = pnand %p2411_p2, %p2405_p13 }
  0x43   :  { %2415 = shalt.err (!%p2412_p3)
}
  0x44   :  { %80 = dma.hbm_to_vmem [thread:$0]  %s2760_s9, 16384, %s75_s16, [#allocation8], %s2423_s18, %s2423_s18, %s2424_s19  }
  0x45   :  { %2416 = dma.done.wait [#allocation3], 24576  }
  0x46   :  { %2417 = vsyncadd [#allocation3], 4294942720 }
  0x47   :  { %2418 = dma.done.wait [#allocation5], 24576  }
  0x48   :  { %2419 = vsyncadd [#allocation5], 4294942720 }
  0x49   :  { %2420 = dma.done.wait [#allocation8], 16384  }
  0x4a   :  { %2421 = vsyncadd [#allocation8], 4294950912  ;;  %v104_v0 = vld [vmem:[#allocation2 + $0x8] sm:$0xff]  ;;  %v110_v1 = vld [vmem:[#allocation2 + $0x38] sm:$0xff]  ;;  %vm700_vm0 = vcmask 64512  }
  0x4b   :  { %v103_v2 = vld [vmem:[#allocation2] sm:$0xff]  ;;  %v1780_v3 = vpack.c.bf16 %v110_v1, %v104_v0  ;;  %v109_v4 = vld [vmem:[#allocation2 + $0x30] sm:$0xff]  ;;  %v116_v5 = vld [vmem:[#allocation2 + $0x68] sm:$0xff] }
  0x4c   :  { %v122_v6 = vld [vmem:[#allocation2 + $0x98] sm:$0xff]  ;;  %v1782_v7 = vpack.c.bf16 %v109_v4, %v103_v2  ;;  %v115_v9 = vld [vmem:[#allocation2 + $0x60] sm:$0xff]  ;;  %v121_v10 = vld [vmem:[#allocation2 + $0x90] sm:$0xff] }
  0x4d   :  { %v1784_v8 = vpack.c.bf16 %v122_v6, %v116_v5  ;;  %v128_v11 = vld [vmem:[#allocation2 + $0xc8] sm:$0xff]  ;;  %1781 = vmatprep.subr.bf16.mxu1 %v1780_v3  ;;  %v134_v12 = vld [vmem:[#allocation2 + $0xf8] sm:$0xff]  ;;  %v1786_v13 = vpack.c.bf16 %v121_v10, %v115_v9  ;;  %v127_v15 = vld [vmem:[#allocation2 + $0xc0] sm:$0xff] }
  0x4e   :  { %1783 = vmatpush1.bf16.msra.mxu1 %v1782_v7  ;;  %v1788_v14 = vpack.c.bf16 %v134_v12, %v128_v11  ;;  %v133_v16 = vld [vmem:[#allocation2 + $0xf0] sm:$0xff]  ;;  %v140_v17 = vld [vmem:[#allocation2 + $0x128] sm:$0xff]  ;;  %v146_v18 = vld [vmem:[#allocation2 + $0x158] sm:$0xff] }
  0x4f   :  { %1785 = vmatprep.subr.bf16.mxu1 %v1784_v8  ;;  %v1790_v19 = vpack.c.bf16 %v133_v16, %v127_v15  ;;  %v1792_v20 = vpack.c.bf16 %v146_v18, %v140_v17  ;;  %v139_v21 = vld [vmem:[#allocation2 + $0x120] sm:$0xff]  ;;  %v145_v22 = vld [vmem:[#allocation2 + $0x150] sm:$0xff]  ;;  %v152_v23 = vld [vmem:[#allocation2 + $0x188] sm:$0xff] }
  0x50   :  { %v158_v24 = vld [vmem:[#allocation2 + $0x1b8] sm:$0xff]  ;;  %v1794_v25 = vpack.c.bf16 %v145_v22, %v139_v21  ;;  %v151_v27 = vld [vmem:[#allocation2 + $0x180] sm:$0xff]  ;;  %v157_v28 = vld [vmem:[#allocation2 + $0x1b0] sm:$0xff] }
  0x51   :  { %v1796_v26 = vpack.c.bf16 %v158_v24, %v152_v23  ;;  %v164_v29 = vld [vmem:[#allocation2 + $0x1e8] sm:$0xff]  ;;  %v170_v30 = vld [vmem:[#allocation2 + $0x218] sm:$0xff]  ;;  %v1798_v31 = vpack.c.bf16 %v157_v28, %v151_v27  ;;  %v163_v33 = vld [vmem:[#allocation2 + $0x1e0] sm:$0xff] }
  0x52   :  { %1787 = vmatpush1.bf16.msra.mxu1 %v1786_v13  ;;  %v1800_v32 = vpack.c.bf16 %v170_v30, %v164_v29  ;;  %v169_v34 = vld [vmem:[#allocation2 + $0x210] sm:$0xff]  ;;  %v176_v35 = vld [vmem:[#allocation2 + $0x248] sm:$0xff]  ;;  %v182_v36 = vld [vmem:[#allocation2 + $0x278] sm:$0xff] }
  0x53   :  { %1789 = vmatprep.subr.bf16.mxu1 %v1788_v14  ;;  %v1802_v37 = vpack.c.bf16 %v169_v34, %v163_v33  ;;  %v1804_v38 = vpack.c.bf16 %v182_v36, %v176_v35  ;;  %v175_v39 = vld [vmem:[#allocation2 + $0x240] sm:$0xff]  ;;  %v181_v40 = vld [vmem:[#allocation2 + $0x270] sm:$0xff]  ;;  %v2560_v41 = vld [vmem:[%s2751_s0 + $0x8] sm:$0xff] }
  0x54   :  { %v188_v42 = vld [vmem:[#allocation2 + $0x2a8] sm:$0xff]  ;;  %v194_v43 = vld [vmem:[#allocation2 + $0x2d8] sm:$0xff]  ;;  %391 = vmatprep.mubr.f32.mxu1 %v2560_v41  ;;  %545 = vmatprep.mubr.f32.mxu0 %v2560_v41  ;;  %v1806_v44 = vpack.c.bf16 %v181_v40, %v175_v39  ;;  %v187_v46 = vld [vmem:[#allocation2 + $0x2a0] sm:$0xff] }
  0x55   :  { %v1808_v45 = vpack.c.bf16 %v194_v43, %v188_v42  ;;  %v193_v47 = vld [vmem:[#allocation2 + $0x2d0] sm:$0xff]  ;;  %v200_v48 = vld [vmem:[#allocation2 + $0x308] sm:$0xff]  ;;  %v206_v49 = vld [vmem:[#allocation2 + $0x338] sm:$0xff] }
  0x56   :  { %1791 = vmatpush1.bf16.msra.mxu1 %v1790_v19  ;;  %v1810_v50 = vpack.c.bf16 %v193_v47, %v187_v46  ;;  %v1812_v51 = vpack.c.bf16 %v206_v49, %v200_v48  ;;  %v199_v52 = vld [vmem:[#allocation2 + $0x300] sm:$0xff]  ;;  %v205_v53 = vld [vmem:[#allocation2 + $0x330] sm:$0xff]  ;;  %v212_v54 = vld [vmem:[#allocation2 + $0x368] sm:$0xff] }
  0x57   :  { %1793 = vmatprep.subr.bf16.mxu1 %v1792_v20  ;;  %v218_v55 = vld [vmem:[#allocation2 + $0x398] sm:$0xff]  ;;  %v1814_v56 = vpack.c.bf16 %v205_v53, %v199_v52  ;;  %v211_v58 = vld [vmem:[#allocation2 + $0x360] sm:$0xff]  ;;  %v217_v59 = vld [vmem:[#allocation2 + $0x390] sm:$0xff] }
  0x58   :  { %v1816_v57 = vpack.c.bf16 %v218_v55, %v212_v54  ;;  %v224_v60 = vld [vmem:[#allocation2 + $0x3c8] sm:$0xff]  ;;  %v230_v61 = vld [vmem:[#allocation2 + $0x3f8] sm:$0xff]  ;;  %v1818_v62 = vpack.c.bf16 %v217_v59, %v211_v58  ;;  %v223_v0 = vld [vmem:[#allocation2 + $0x3c0] sm:$0xff] }
  0x59   :  { %v1820_v63 = vpack.c.bf16 %v230_v61, %v224_v60  ;;  %v229_v1 = vld [vmem:[#allocation2 + $0x3f0] sm:$0xff]  ;;  %v236_v2 = vld [vmem:[#allocation2 + $0x428] sm:$0xff]  ;;  %v242_v3 = vld [vmem:[#allocation2 + $0x458] sm:$0xff] }
  0x5a   :  { %1795 = vmatpush1.bf16.msra.mxu1 %v1794_v25  ;;  %v1822_v4 = vpack.c.bf16 %v229_v1, %v223_v0  ;;  %v1824_v5 = vpack.c.bf16 %v242_v3, %v236_v2  ;;  %v235_v6 = vld [vmem:[#allocation2 + $0x420] sm:$0xff]  ;;  %v241_v7 = vld [vmem:[#allocation2 + $0x450] sm:$0xff]  ;;  %v248_v8 = vld [vmem:[#allocation2 + $0x488] sm:$0xff] }
  0x5b   :  { %1797 = vmatprep.subr.bf16.mxu1 %v1796_v26  ;;  %v254_v9 = vld [vmem:[#allocation2 + $0x4b8] sm:$0xff]  ;;  %v247_v10 = vld [vmem:[#allocation2 + $0x480] sm:$0xff]  ;;  %v253_v11 = vld [vmem:[#allocation2 + $0x4b0] sm:$0xff]  ;;  %v1826_v12 = vpack.c.bf16 %v241_v7, %v235_v6 }
  0x5c   :  { %v260_v13 = vld [vmem:[#allocation2 + $0x4e8] sm:$0xff]  ;;  %v266_v14 = vld [vmem:[#allocation2 + $0x518] sm:$0xff]  ;;  %v107_v17 = vld [vmem:[#allocation2 + $0x20] sm:$0xff]  ;;  %v1828_v18 = vpack.c.bf16 %v254_v9, %v248_v8  ;;  %v1830_v29 = vpack.c.bf16 %v253_v11, %v247_v10 }
  0x5d   :  { %v108_v15 = vld [vmem:[#allocation2 + $0x28] sm:$0xff]  ;;  %v114_v16 = vld [vmem:[#allocation2 + $0x58] sm:$0xff]  ;;  %v113_v20 = vld [vmem:[#allocation2 + $0x50] sm:$0xff]  ;;  %v1832_v33 = vpack.c.bf16 %v266_v14, %v260_v13 }
  0x5e   :  { %1799 = vmatpush1.bf16.msra.mxu1 %v1798_v31  ;;  %v1908_v19 = vpack.c.bf16 %v114_v16, %v108_v15  ;;  %v120_v21 = vld [vmem:[#allocation2 + $0x88] sm:$0xff]  ;;  %v126_v22 = vld [vmem:[#allocation2 + $0xb8] sm:$0xff]  ;;  %v1910_v23 = vpack.c.bf16 %v113_v20, %v107_v17  ;;  %v119_v25 = vld [vmem:[#allocation2 + $0x80] sm:$0xff] }
  0x5f   :  { %1801 = vmatprep.subr.bf16.mxu1 %v1800_v32  ;;  %v1912_v24 = vpack.c.bf16 %v126_v22, %v120_v21  ;;  %v125_v26 = vld [vmem:[#allocation2 + $0xb0] sm:$0xff]  ;;  %v132_v27 = vld [vmem:[#allocation2 + $0xe8] sm:$0xff]  ;;  %v138_v28 = vld [vmem:[#allocation2 + $0x118] sm:$0xff] }
  0x60   :  { %1909 = vmatprep.subr.bf16.mxu0 %v1908_v19  ;;  %v259_v30 = vld [vmem:[#allocation2 + $0x4e0] sm:$0xff]  ;;  %v265_v31 = vld [vmem:[#allocation2 + $0x510] sm:$0xff]  ;;  %v1914_v32 = vpack.c.bf16 %v125_v26, %v119_v25  ;;  %v272_v34 = vld [vmem:[#allocation2 + $0x548] sm:$0xff]  ;;  %v1916_v35 = vpack.c.bf16 %v138_v28, %v132_v27 }
  0x61   :  { %1911 = vmatpush1.bf16.msra.mxu0 %v1910_v23  ;;  %v131_v36 = vld [vmem:[#allocation2 + $0xe0] sm:$0xff]  ;;  %v144_v39 = vld [vmem:[#allocation2 + $0x148] sm:$0xff]  ;;  %v150_v40 = vld [vmem:[#allocation2 + $0x178] sm:$0xff]  ;;  %v1834_v42 = vpack.c.bf16 %v265_v31, %v259_v30 }
  0x62   :  { %1803 = vmatpush1.bf16.msra.mxu1 %v1802_v37  ;;  %1913 = vmatprep.subr.bf16.mxu0 %v1912_v24  ;;  %v137_v37 = vld [vmem:[#allocation2 + $0x110] sm:$0xff]  ;;  %v271_v43 = vld [vmem:[#allocation2 + $0x540] sm:$0xff]  ;;  %v284_v47 = vld [vmem:[#allocation2 + $0x5a8] sm:$0xff]  ;;  %v1920_v48 = vpack.c.bf16 %v150_v40, %v144_v39 }
  0x63   :  { %1805 = vmatprep.subr.bf16.mxu1 %v1804_v38  ;;  %v278_v38 = vld [vmem:[#allocation2 + $0x578] sm:$0xff]  ;;  %v143_v49 = vld [vmem:[#allocation2 + $0x140] sm:$0xff]  ;;  %v156_v52 = vld [vmem:[#allocation2 + $0x1a8] sm:$0xff] }
  0x64   :  { %v1836_v46 = vpack.c.bf16 %v278_v38, %v272_v34  ;;  %v162_v53 = vld [vmem:[#allocation2 + $0x1d8] sm:$0xff]  ;;  %v283_v55 = vld [vmem:[#allocation2 + $0x5a0] sm:$0xff]  ;;  %v168_v0 = vld [vmem:[#allocation2 + $0x208] sm:$0xff] }
  0x65   :  { %1915 = vmatpush1.bf16.msra.mxu0 %v1914_v32  ;;  %v106_v59 = vld [vmem:[#allocation2 + $0x18] sm:$0xff]  ;;  %v1924_v60 = vpack.c.bf16 %v162_v53, %v156_v52  ;;  %v155_v61 = vld [vmem:[#allocation2 + $0x1a0] sm:$0xff]  ;;  %v124_v9 = vld [vmem:[#allocation2 + $0xa8] sm:$0xff] }
  0x66   :  { %1807 = vmatpush1.bf16.msra.mxu1 %v1806_v44  ;;  %v277_v44 = vld [vmem:[#allocation2 + $0x570] sm:$0xff]  ;;  %1917 = vmatprep.subr.bf16.mxu0 %v1916_v35  ;;  %v174_v1 = vld [vmem:[#allocation2 + $0x238] sm:$0xff]  ;;  %v111_v6 = vld [vmem:[#allocation2 + $0x40] sm:$0xff] }
  0x67   :  { %1809 = vmatprep.subr.bf16.mxu1 %v1808_v45  ;;  %v1918_v45 = vpack.c.bf16 %v137_v37, %v131_v36  ;;  %v1838_v54 = vpack.c.bf16 %v277_v44, %v271_v43  ;;  %v118_v7 = vld [vmem:[#allocation2 + $0x78] sm:$0xff]  ;;  %v1928_v8 = vpack.c.bf16 %v174_v1, %v168_v0  ;;  %v167_v10 = vld [vmem:[#allocation2 + $0x200] sm:$0xff]  ;;  %v173_v11 = vld [vmem:[#allocation2 + $0x230] sm:$0xff] }
  0x68   :  { %v186_v13 = vld [vmem:[#allocation2 + $0x298] sm:$0xff]  ;;  %v2567_v14 = vld [vmem:[%s2751_s0] sm:$0xff]  ;;  %v117_v16 = vld [vmem:[#allocation2 + $0x70] sm:$0xff]  ;;  %v1848_v17 = vpack.c.bf16 %v124_v9, %v118_v7  ;;  %v1930_v21 = vpack.c.bf16 %v173_v11, %v167_v10 }
  0x69   :  { %1919 = vmatpush1.bf16.msra.mxu0 %v1918_v45  ;;  %v130_v19 = vld [vmem:[#allocation2 + $0xd8] sm:$0xff]  ;;  %v136_v22 = vld [vmem:[#allocation2 + $0x108] sm:$0xff]  ;;  %v179_v24 = vld [vmem:[#allocation2 + $0x260] sm:$0xff] }
  0x6a   :  { %1811 = vmatpush1.bf16.msra.mxu1 %v1810_v50  ;;  %v149_v50 = vld [vmem:[#allocation2 + $0x170] sm:$0xff]  ;;  %1921 = vmatprep.subr.bf16.mxu0 %v1920_v48  ;;  %v2572_v20 = vld [vmem:[%s2751_s0 + $0x18] sm:$0xff]  ;;  %v192_v26 = vld [vmem:[#allocation2 + $0x2c8] sm:$0xff]  ;;  %v1852_v30 = vpack.c.bf16 %v136_v22, %v130_v19 }
  0x6b   :  { %1813 = vmatprep.subr.bf16.mxu1 %v1812_v51  ;;  %v290_v51 = vld [vmem:[#allocation2 + $0x5d8] sm:$0xff]  ;;  %v185_v25 = vld [vmem:[#allocation2 + $0x290] sm:$0xff]  ;;  %v135_v32 = vld [vmem:[#allocation2 + $0x100] sm:$0xff] }
  0x6c   :  { %v1840_v58 = vpack.c.bf16 %v290_v51, %v284_v47  ;;  %v198_v27 = vld [vmem:[#allocation2 + $0x2f8] sm:$0xff]  ;;  %v129_v31 = vld [vmem:[#allocation2 + $0xd0] sm:$0xff]  ;;  %v1934_v34 = vpack.c.bf16 %v185_v25, %v179_v24  ;;  %v148_v35 = vld [vmem:[#allocation2 + $0x168] sm:$0xff] }
  0x6d   :  { %v1936_v36 = vpack.c.bf16 %v198_v27, %v192_v26  ;;  %v191_v37 = vld [vmem:[#allocation2 + $0x2c0] sm:$0xff]  ;;  %v197_v38 = vld [vmem:[#allocation2 + $0x2f0] sm:$0xff]  ;;  %v204_v39 = vld [vmem:[#allocation2 + $0x328] sm:$0xff] }
  0x6e   :  { %1815 = vmatpush1.bf16.msra.mxu1 %v1814_v56  ;;  %v289_v56 = vld [vmem:[#allocation2 + $0x5d0] sm:$0xff]  ;;  %v210_v40 = vld [vmem:[#allocation2 + $0x358] sm:$0xff]  ;;  %v147_v45 = vld [vmem:[#allocation2 + $0x160] sm:$0xff]  ;;  %v1938_v47 = vpack.c.bf16 %v197_v38, %v191_v37 }
  0x6f   :  { %1817 = vmatprep.subr.bf16.mxu1 %v1816_v57  ;;  %v1922_v57 = vpack.c.bf16 %v149_v50, %v143_v49  ;;  %v1842_v2 = vpack.c.bf16 %v289_v56, %v283_v55  ;;  %v141_v44 = vld [vmem:[#allocation2 + $0x130] sm:$0xff]  ;;  %v160_v48 = vld [vmem:[#allocation2 + $0x1c8] sm:$0xff]  ;;  %v1940_v49 = vpack.c.bf16 %v210_v40, %v204_v39  ;;  %v203_v50 = vld [vmem:[#allocation2 + $0x320] sm:$0xff] }
  0x70   :  { %v209_v51 = vld [vmem:[#allocation2 + $0x350] sm:$0xff]  ;;  %v216_v52 = vld [vmem:[#allocation2 + $0x388] sm:$0xff]  ;;  %v222_v53 = vld [vmem:[#allocation2 + $0x3b8] sm:$0xff] }
  0x71   :  { %1923 = vmatpush1.bf16.msra.mxu0 %v1922_v57  ;;  %v153_v56 = vld [vmem:[#allocation2 + $0x190] sm:$0xff]  ;;  %v166_v57 = vld [vmem:[#allocation2 + $0x1f8] sm:$0xff]  ;;  %v184_v7 = vld [vmem:[#allocation2 + $0x288] sm:$0xff] }
  0x72   :  { %1819 = vmatpush1.bf16.msra.mxu1 %v1818_v62  ;;  %v161_v62 = vld [vmem:[#allocation2 + $0x1d0] sm:$0xff]  ;;  %1925 = vmatprep.subr.bf16.mxu0 %v1924_v60  ;;  %v1944_v60 = vpack.c.bf16 %v222_v53, %v216_v52  ;;  %v234_v0 = vld [vmem:[#allocation2 + $0x418] sm:$0xff]  ;;  %v227_v9 = vld [vmem:[#allocation2 + $0x3e0] sm:$0xff] }
  0x73   :  { %1821 = vmatprep.subr.bf16.mxu1 %v1820_v63  ;;  %v112_v63 = vld [vmem:[#allocation2 + $0x48] sm:$0xff]  ;;  %v1926_v3 = vpack.c.bf16 %v161_v62, %v155_v61  ;;  %v215_v61 = vld [vmem:[#allocation2 + $0x380] sm:$0xff]  ;;  %v221_v62 = vld [vmem:[#allocation2 + $0x3b0] sm:$0xff] }
  0x74   :  { %v233_v10 = vld [vmem:[#allocation2 + $0x410] sm:$0xff]  ;;  %v240_v11 = vld [vmem:[#allocation2 + $0x448] sm:$0xff]  ;;  %v258_v26 = vld [vmem:[#allocation2 + $0x4d8] sm:$0xff] }
  0x75   :  { %1927 = vmatpush1.bf16.msra.mxu0 %v1926_v3  ;;  %v165_v3 = vld [vmem:[#allocation2 + $0x1f0] sm:$0xff]  ;;  %v1950_v19 = vpack.c.bf16 %v233_v10, %v227_v9  ;;  %v252_v25 = vld [vmem:[#allocation2 + $0x4a8] sm:$0xff]  ;;  %v270_v39 = vld [vmem:[#allocation2 + $0x538] sm:$0xff] }
  0x76   :  { %1823 = vmatpush1.bf16.msra.mxu1 %v1822_v4  ;;  %v1844_v4 = vpack.c.bf16 %v112_v63, %v106_v59  ;;  %1929 = vmatprep.subr.bf16.mxu0 %v1928_v8  ;;  %v172_v59 = vld [vmem:[#allocation2 + $0x228] sm:$0xff]  ;;  %v245_v24 = vld [vmem:[#allocation2 + $0x470] sm:$0xff]  ;;  %v282_v52 = vld [vmem:[#allocation2 + $0x598] sm:$0xff] }
  0x77   :  { %1825 = vmatprep.subr.bf16.mxu1 %v1824_v5  ;;  %v105_v5 = vld [vmem:[#allocation2 + $0x10] sm:$0xff]  ;;  %v228_v63 = vld [vmem:[#allocation2 + $0x3e8] sm:$0xff] }
  0x78   :  { %v1846_v15 = vpack.c.bf16 %v111_v6, %v105_v5  ;;  %v178_v5 = vld [vmem:[#allocation2 + $0x258] sm:$0xff]  ;;  %v1946_v6 = vpack.c.bf16 %v221_v62, %v215_v61  ;;  %v1948_v8 = vpack.c.bf16 %v234_v0, %v228_v63  ;;  %v257_v37 = vld [vmem:[#allocation2 + $0x4d0] sm:$0xff]  ;;  %v264_v38 = vld [vmem:[#allocation2 + $0x508] sm:$0xff] }
  0x79   :  { %1931 = vmatpush1.bf16.msra.mxu0 %v1930_v21  ;;  %v196_v21 = vld [vmem:[#allocation2 + $0x2e8] sm:$0xff]  ;;  %v281_v61 = vld [vmem:[#allocation2 + $0x590] sm:$0xff]  ;;  %v294_v63 = vld [vmem:[#allocation2 + $0x5f8] sm:$0xff] }
  0x7a   :  { %1827 = vmatpush1.bf16.msra.mxu1 %v1826_v12  ;;  %v180_v12 = vld [vmem:[#allocation2 + $0x268] sm:$0xff]  ;;  %v293_v9 = vld [vmem:[#allocation2 + $0x5f0] sm:$0xff] }
  0x7b   :  { %1829 = vmatprep.subr.bf16.mxu1 %v1828_v18  ;;  %v123_v18 = vld [vmem:[#allocation2 + $0xa0] sm:$0xff]  ;;  %v1932_v23 = vpack.c.bf16 %v186_v13, %v180_v12  ;;  %v246_v12 = vld [vmem:[#allocation2 + $0x478] sm:$0xff]  ;;  %v288_v62 = vld [vmem:[#allocation2 + $0x5c8] sm:$0xff] }
  0x7c   :  { %v1850_v28 = vpack.c.bf16 %v123_v18, %v117_v16  ;;  %v177_v16 = vld [vmem:[#allocation2 + $0x250] sm:$0xff]  ;;  %v190_v18 = vld [vmem:[#allocation2 + $0x2b8] sm:$0xff]  ;;  %v1952_v22 = vpack.c.bf16 %v246_v12, %v240_v11 }
  0x7d   :  { %1933 = vmatprep.subr.bf16.mxu0 %v1932_v23  ;;  %v239_v23 = vld [vmem:[#allocation2 + $0x440] sm:$0xff]  ;;  %v237_v12 = vld [vmem:[#allocation2 + $0x430] sm:$0xff] }
  0x7e   :  { %1831 = vmatpush1.bf16.msra.mxu1 %v1830_v29  ;;  %v2579_v29 = vld [vmem:[%s2751_s0 + $0x10] sm:$0xff]  ;;  %1935 = vmatpush1.bf16.msra.mxu0 %v1934_v34  ;;  %v208_v34 = vld [vmem:[#allocation2 + $0x348] sm:$0xff] }
  0x7f   :  { %1833 = vmatprep.subr.bf16.mxu1 %v1832_v33  ;;  %v142_v33 = vld [vmem:[#allocation2 + $0x138] sm:$0xff]  ;;  %1937 = vmatprep.subr.bf16.mxu0 %v1936_v36  ;;  %v251_v36 = vld [vmem:[#allocation2 + $0x4a0] sm:$0xff] }
  0x80   :  { %v1856_v43 = vpack.c.bf16 %v148_v35, %v142_v33  ;;  %v1954_v33 = vpack.c.bf16 %v245_v24, %v239_v23  ;;  %v1956_v35 = vpack.c.bf16 %v258_v26, %v252_v25  ;;  %v262_v23 = vld [vmem:[#allocation2 + $0x4f8] sm:$0xff]  ;;  %v268_v24 = vld [vmem:[#allocation2 + $0x528] sm:$0xff] }
  0x81   :  { %v1896_v26 = vpack.c.bf16 %v268_v24, %v262_v23 }
  0x82   :  { %1835 = vmatpush1.bf16.msra.mxu1 %v1834_v42  ;;  %v1854_v42 = vpack.c.bf16 %v135_v32, %v129_v31  ;;  %1939 = vmatpush1.bf16.msra.mxu0 %v1938_v47  ;;  %v195_v31 = vld [vmem:[#allocation2 + $0x2e0] sm:$0xff]  ;;  %v202_v32 = vld [vmem:[#allocation2 + $0x318] sm:$0xff]  ;;  %v220_v47 = vld [vmem:[#allocation2 + $0x3a8] sm:$0xff] }
  0x83   :  { %1837 = vmatprep.subr.bf16.mxu1 %v1836_v46  ;;  %v154_v46 = vld [vmem:[#allocation2 + $0x198] sm:$0xff]  ;;  %1941 = vmatprep.subr.bf16.mxu0 %v1940_v49  ;;  %v263_v49 = vld [vmem:[#allocation2 + $0x500] sm:$0xff] }
  0x84   :  { %v1860_v55 = vpack.c.bf16 %v160_v48, %v154_v46  ;;  %v1958_v46 = vpack.c.bf16 %v257_v37, %v251_v36  ;;  %v1960_v48 = vpack.c.bf16 %v270_v39, %v264_v38  ;;  %v286_v36 = vld [vmem:[#allocation2 + $0x5b8] sm:$0xff]  ;;  %v292_v37 = vld [vmem:[#allocation2 + $0x5e8] sm:$0xff] }
  0x85   :  { %v1904_v39 = vpack.c.bf16 %v292_v37, %v286_v36 }
  0x86   :  { %1839 = vmatpush1.bf16.msra.mxu1 %v1838_v54  ;;  %v1858_v54 = vpack.c.bf16 %v147_v45, %v141_v44  ;;  %v207_v44 = vld [vmem:[#allocation2 + $0x340] sm:$0xff]  ;;  %v214_v45 = vld [vmem:[#allocation2 + $0x378] sm:$0xff] }
  0x87   :  { %1841 = vmatprep.subr.bf16.mxu1 %v1840_v58  ;;  %v1942_v58 = vpack.c.bf16 %v209_v51, %v203_v50  ;;  %v269_v50 = vld [vmem:[#allocation2 + $0x530] sm:$0xff]  ;;  %v276_v51 = vld [vmem:[#allocation2 + $0x568] sm:$0xff] }
  0x89   :  { %1943 = vmatpush1.bf16.msra.mxu0 %v1942_v58  ;;  %v232_v58 = vld [vmem:[#allocation2 + $0x408] sm:$0xff] }
  0x8a   :  { %1843 = vmatpush1.bf16.msra.mxu1 %v1842_v2  ;;  %v1864_v2 = vpack.c.bf16 %v172_v59, %v166_v57  ;;  %1945 = vmatprep.subr.bf16.mxu0 %v1944_v60  ;;  %v1962_v57 = vpack.c.bf16 %v269_v50, %v263_v49  ;;  %v1964_v59 = vpack.c.bf16 %v282_v52, %v276_v51  ;;  %v275_v60 = vld [vmem:[#allocation2 + $0x560] sm:$0xff] }
  0x8b   :  { %1845 = vmatprep.subr.bf16.mxu1 %v1844_v4  ;;  %v171_v4 = vld [vmem:[#allocation2 + $0x220] sm:$0xff] }
  0x8c   :  { %v1866_v13 = vpack.c.bf16 %v171_v4, %v165_v3  ;;  %v231_v3 = vld [vmem:[#allocation2 + $0x400] sm:$0xff]  ;;  %v238_v4 = vld [vmem:[#allocation2 + $0x438] sm:$0xff] }
  0x8d   :  { %392 = vmatmul.mubr.f32.vlgmr.msra.gmra.mrb[0].mxu1 %v2567_v14  ;;  %1947 = vmatpush1.bf16.msra.mxu0 %v1946_v6  ;;  %v244_v6 = vld [vmem:[#allocation2 + $0x468] sm:$0xff] }
  0x8e   :  { %1847 = vmatpush1.bf16.msra.mxu1 %v1846_v15  ;;  %397 = vmatprep.mubr.f32.mxu1 %v2572_v20  ;;  %v1868_v15 = vpack.c.bf16 %v184_v7, %v178_v5  ;;  %v1966_v5 = vpack.c.bf16 %v281_v61, %v275_v60  ;;  %v1968_v7 = vpack.c.bf16 %v294_v63, %v288_v62 }
  0x8f   :  { %1849 = vmatprep.subr.bf16.mxu1 %v1848_v17  ;;  %v183_v17 = vld [vmem:[#allocation2 + $0x280] sm:$0xff]  ;;  %1949 = vmatprep.subr.bf16.mxu0 %v1948_v8  ;;  %v1888_v11 = vpack.c.bf16 %v244_v6, %v238_v4 }
  0x90   :  { %v1870_v27 = vpack.c.bf16 %v183_v17, %v177_v16  ;;  %v287_v8 = vld [vmem:[#allocation2 + $0x5c0] sm:$0xff]  ;;  %v250_v16 = vld [vmem:[#allocation2 + $0x498] sm:$0xff]  ;;  %v256_v17 = vld [vmem:[#allocation2 + $0x4c8] sm:$0xff] }
  0x91   :  { %398 = vmatmul.mubr.f32.gmra.mrb[2].mxu1 %v2579_v29  ;;  %1951 = vmatpush1.bf16.msra.mxu0 %v1950_v19  ;;  %v1892_v19 = vpack.c.bf16 %v256_v17, %v250_v16 }
  0x92   :  { %1851 = vmatpush1.bf16.msra.mxu1 %v1850_v28  ;;  %468 = vmatprep.mubr.f32.mxu1 %v2560_v41  ;;  %v159_v41 = vld [vmem:[#allocation2 + $0x1c0] sm:$0xff]  ;;  %v1872_v28 = vpack.c.bf16 %v196_v21, %v190_v18  ;;  %v249_v21 = vld [vmem:[#allocation2 + $0x490] sm:$0xff] }
  0x93   :  { %1853 = vmatprep.subr.bf16.mxu1 %v1852_v30  ;;  %v1862_v1 = vpack.c.bf16 %v159_v41, %v153_v56  ;;  %v189_v30 = vld [vmem:[#allocation2 + $0x2b0] sm:$0xff]  ;;  %1953 = vmatprep.subr.bf16.mxu0 %v1952_v22  ;;  %v219_v56 = vld [vmem:[#allocation2 + $0x3a0] sm:$0xff]  ;;  %v226_v41 = vld [vmem:[#allocation2 + $0x3d8] sm:$0xff] }
  0x94   :  { %v1874_v40 = vpack.c.bf16 %v195_v31, %v189_v30  ;;  %v255_v22 = vld [vmem:[#allocation2 + $0x4c0] sm:$0xff]  ;;  %v274_v30 = vld [vmem:[#allocation2 + $0x558] sm:$0xff]  ;;  %v280_v31 = vld [vmem:[#allocation2 + $0x588] sm:$0xff] }
  0x95   :  { %1955 = vmatpush1.bf16.msra.mxu0 %v1954_v33  ;;  %v1894_v25 = vpack.c.bf16 %v255_v22, %v249_v21  ;;  %v1900_v33 = vpack.c.bf16 %v280_v31, %v274_v30 }
  0x96   :  { %1855 = vmatpush1.bf16.msra.mxu1 %v1854_v42  ;;  %v1876_v42 = vpack.c.bf16 %v208_v34, %v202_v32  ;;  %1957 = vmatprep.subr.bf16.mxu0 %v1956_v35  ;;  %v273_v34 = vld [vmem:[#allocation2 + $0x550] sm:$0xff]  ;;  %v279_v35 = vld [vmem:[#allocation2 + $0x580] sm:$0xff] }
  0x97   :  { %1857 = vmatprep.subr.bf16.mxu1 %v1856_v43  ;;  %v201_v43 = vld [vmem:[#allocation2 + $0x310] sm:$0xff]  ;;  %v1902_v38 = vpack.c.bf16 %v279_v35, %v273_v34 }
  0x98   :  { %v1878_v53 = vpack.c.bf16 %v207_v44, %v201_v43  ;;  %v297_v44 = vlaneseq }
  0x99   :  { %1959 = vmatpush1.bf16.msra.mxu0 %v1958_v46 }
  0x9a   :  { %1859 = vmatpush1.bf16.msra.mxu1 %v1858_v54  ;;  %v1880_v54 = vpack.c.bf16 %v220_v47, %v214_v45  ;;  %1961 = vmatprep.subr.bf16.mxu0 %v1960_v48  ;;  %v2589_v45 = vshrl.u32 %v297_v44, 7  ;;  %v295_v47 = vld [vmem:[%s2753_s2] sm:$0x3f]  ;;  %v874_v44 = vld [vmem:[#allocation4 + $0x18] sm:$0xff] }
  0x9b   :  { %1861 = vmatprep.subr.bf16.mxu1 %v1860_v55  ;;  %v213_v55 = vld [vmem:[#allocation2 + $0x370] sm:$0xff] }
  0x9c   :  { %v1882_v0 = vpack.c.bf16 %v219_v56, %v213_v55  ;;  %v2592_v46 = vsub.s32 1, %v2589_v45  ;;  %v315_v55 = vsub.s32 4, %v2589_v45  ;;  %v319_v56 = vsub.s32 5, %v2589_v45 }
  0x9d   :  { %1963 = vmatpush1.bf16.msra.mxu0 %v1962_v57  ;;  %v2605_v4 = vsub.s32 0, %v2589_v45 }
  0x9e   :  { %1863 = vmatpush1.bf16.msra.mxu1 %v1862_v1  ;;  %v1884_v1 = vpack.c.bf16 %v232_v58, %v226_v41  ;;  %1965 = vmatprep.subr.bf16.mxu0 %v1964_v59  ;;  %v304_v48 = vrot.slane %v295_v47, %v2592_v46  ;;  %v316_v41 = vrot.slane %v295_v47, %v315_v55 }
  0x9f   :  { %1865 = vmatprep.subr.bf16.mxu1 %v1864_v2  ;;  %v225_v2 = vld [vmem:[#allocation2 + $0x3d0] sm:$0xff]  ;;  %v320_v57 = vrot.slane %v295_v47, %v319_v56 }
  0xa0   :  { %v1886_v10 = vpack.c.bf16 %v231_v3, %v225_v2  ;;  %v311_v2 = vsub.s32 3, %v2589_v45  ;;  %v307_v3 = vsub.s32 2, %v2589_v45 }
  0xa1   :  { %1967 = vmatpush1.bf16.msra.mxu0 %v1966_v5 }
  0xa2   :  { %1867 = vmatpush1.bf16.msra.mxu1 %v1866_v13  ;;  %v243_v13 = vld [vmem:[#allocation2 + $0x460] sm:$0xff]  ;;  %1969 = vmatprep.subr.bf16.mxu0 %v1968_v7  ;;  %v312_v5 = vrot.slane %v295_v47, %v311_v2  ;;  %v308_v6 = vrot.slane %v295_v47, %v307_v3 }
  0xa3   :  { %1869 = vmatprep.subr.bf16.mxu1 %v1868_v15  ;;  %v1970_v15 = vpack.c.bf16 %v293_v9, %v287_v8  ;;  %v1890_v18 = vpack.c.bf16 %v243_v13, %v237_v12  ;;  %v300_v9 = vrot.slane %v295_v47, %v2605_v4 }
  0xa5   :  { %1971 = vmatpush1.bf16.msra.mxu0 %v1970_v15 }
  0xa6   :  { %1871 = vmatpush1.bf16.msra.mxu1 %v1870_v27  ;;  %v261_v27 = vld [vmem:[#allocation2 + $0x4f0] sm:$0xff] }
  0xa7   :  { %1873 = vmatprep.subr.bf16.mxu1 %v1872_v28  ;;  %v267_v28 = vld [vmem:[#allocation2 + $0x520] sm:$0xff] }
  0xa8   :  { %546 = vmatmul.mubr.f32.vlgmr.msra.gmra.mrb[0].mxu0 %v2567_v14  ;;  %v1898_v32 = vpack.c.bf16 %v267_v28, %v261_v27 }
  0xa9   :  { %551 = vmatprep.mubr.f32.mxu0 %v2572_v20 }
  0xaa   :  { %1875 = vmatpush1.bf16.msra.mxu1 %v1874_v40  ;;  %v285_v40 = vld [vmem:[#allocation2 + $0x5b0] sm:$0xff] }
  0xab   :  { %1877 = vmatprep.subr.bf16.mxu1 %v1876_v42  ;;  %v291_v42 = vld [vmem:[#allocation2 + $0x5e0] sm:$0xff] }
  0xac   :  { %552 = vmatmul.mubr.f32.gmra.mrb[2].mxu0 %v2579_v29  ;;  %v1906_v43 = vpack.c.bf16 %v291_v42, %v285_v40 }
  0xae   :  { %1879 = vmatpush1.bf16.msra.mxu1 %v1878_v53 }
  0xaf   :  { %1881 = vmatprep.subr.bf16.mxu1 %v1880_v54 }
  0xb2   :  { %1883 = vmatpush1.bf16.msra.mxu1 %v1882_v0 }
  0xb3   :  { %1885 = vmatprep.subr.bf16.mxu1 %v1884_v1 }
  0xb6   :  { %1887 = vmatpush1.bf16.msra.mxu1 %v1886_v10 }
  0xb7   :  { %1889 = vmatprep.subr.bf16.mxu1 %v1888_v11 }
  0xba   :  { %1891 = vmatpush1.bf16.msra.mxu1 %v1890_v18 }
  0xbb   :  { %1893 = vmatprep.subr.bf16.mxu1 %v1892_v19 }
  0xbe   :  { %1895 = vmatpush1.bf16.msra.mxu1 %v1894_v25 }
  0xbf   :  { %1897 = vmatprep.subr.bf16.mxu1 %v1896_v26 }
  0xc2   :  { %1899 = vmatpush1.bf16.msra.mxu1 %v1898_v32 }
  0xc3   :  { %1901 = vmatprep.subr.bf16.mxu1 %v1900_v33 }
  0xc6   :  { %1903 = vmatpush1.bf16.msra.mxu1 %v1902_v38 }
  0xc7   :  { %1905 = vmatprep.subr.bf16.mxu1 %v1904_v39  ;;  %v2432_v39 = vmov 0.0  }
  0xca   :  { %1907 = vmatpush1.bf16.msra.mxu1 %v1906_v43  ;;  %v872_v43 = vld [vmem:[#allocation4 + $0x8] sm:$0xff] }
  0xcd   :  { %469 = vmatmul.mubr.f32.vlgmr.msra.gmra.mrb[4].mxu1 %v2567_v14 }
  0xce   :  { %474 = vmatprep.mubr.f32.mxu1 %v2572_v20 }
  0xd1   :  { %475 = vmatmul.mubr.f32.gmra.mrb[6].mxu1 %v2579_v29 }
  0xd2   :  { %790 = vmatprep.mubr.f32.mxu1 %v2432_v39 }
 0x160   :  { %v393_v49 = vpop.f32.mrb[0].mxu1 }
 0x161   :  { %v395_v50 = vpop.f32.mrb[1].mxu1  ;;  %v394_v16 = vadd.f32 %v393_v49, %v300_v9  ;;  %v1972_v49 = vpack.c.bf16 %v874_v44, %v872_v43  ;;  %v905_v43 = vld [vmem:[#allocation4 + $0x110] sm:$0xff]  ;;  %v908_v44 = vld [vmem:[#allocation4 + $0x128] sm:$0xff] }
 0x162   :  { %v396_v51 = vadd.f32 %v395_v50, %v304_v48  ;;  %v871_v50 = vld [vmem:[#allocation4] sm:$0xff] }
 0x164   :  { %622 = vmatprep.mubr.f32.mxu0 %v396_v51  ;;  %v399_v52 = vpop.f32.mrb[2].mxu1  ;;  %v873_v51 = vld [vmem:[#allocation4 + $0x10] sm:$0xff] }
 0x165   :  { %v401_v53 = vpop.f32.mrb[3].mxu1  ;;  %v400_v18 = vadd.f32 %v399_v52, %v300_v9  ;;  %v876_v52 = vld [vmem:[#allocation4 + $0x28] sm:$0xff]  ;;  %v1974_v55 = vpack.c.bf16 %v873_v51, %v871_v50  ;;  %v885_v9 = vld [vmem:[#allocation4 + $0x70] sm:$0xff]  ;;  %v907_v50 = vld [vmem:[#allocation4 + $0x120] sm:$0xff] }
 0x166   :  { %v402_v54 = vadd.f32 %v401_v53, %v304_v48  ;;  %v878_v53 = vld [vmem:[#allocation4 + $0x38] sm:$0xff]  ;;  %v909_v51 = vld [vmem:[#allocation4 + $0x130] sm:$0xff] }
 0x17b   :  { %v547_v58 = vpop.f32.mrb[0].mxu0 }
 0x17c   :  { %v548_v59 = vadd.f32 %v547_v58, %v316_v41  ;;  %v549_v60 = vpop.f32.mrb[1].mxu0  ;;  %v877_v58 = vld [vmem:[#allocation4 + $0x30] sm:$0xff] }
 0x17d   :  { %v550_v61 = vadd.f32 %v549_v60, %v320_v57  ;;  %v882_v60 = vld [vmem:[#allocation4 + $0x58] sm:$0xff] }
 0x17f   :  { %v553_v62 = vpop.f32.mrb[2].mxu0  ;;  %726 = vmatprep.subr.mxu1 %v550_v61 }
 0x180   :  { %v2600_v63 = vadd.f32 %v553_v62, %v316_v41  ;;  %v555_v0 = vpop.f32.mrb[3].mxu0  ;;  %727 = vmatpush1.msra.mxu1 %v548_v59  ;;  %v1976_v41 = vpack.c.bf16 %v878_v53, %v876_v52  ;;  %v880_v59 = vld [vmem:[#allocation4 + $0x48] sm:$0xff]  ;;  %v914_v53 = vld [vmem:[#allocation4 + $0x158] sm:$0xff] }
 0x181   :  { %v556_v1 = vadd.f32 %v555_v0, %v320_v57  ;;  %v875_v57 = vld [vmem:[#allocation4 + $0x20] sm:$0xff]  ;;  %v1980_v62 = vpack.c.bf16 %v882_v60, %v880_v59  ;;  %v912_v52 = vld [vmem:[#allocation4 + $0x148] sm:$0xff] }
 0x182   :  { %v1978_v61 = vpack.c.bf16 %v877_v58, %v875_v57  ;;  %v879_v0 = vld [vmem:[#allocation4 + $0x40] sm:$0xff]  ;;  %v916_v57 = vld [vmem:[#allocation4 + $0x168] sm:$0xff]  ;;  %v918_v58 = vld [vmem:[#allocation4 + $0x178] sm:$0xff] }
 0x183   :  { %800 = vmatprep.subr.mxu1 %v556_v1  ;;  %v881_v1 = vld [vmem:[#allocation4 + $0x50] sm:$0xff]  ;;  %v2016_v60 = vpack.c.bf16 %v918_v58, %v916_v57  ;;  %v1100_v57 = vld [vmem:[#allocation6 + $0x38] sm:$0xff]  ;;  %v1093_v58 = vld [vmem:[#allocation6] sm:$0xff] }
 0x1a0   :  { %v470_v7 = vpop.f32.mrb[4].mxu1 }
 0x1a1   :  { %v472_v8 = vpop.f32.mrb[5].mxu1  ;;  %v471_v11 = vadd.f32 %v470_v7, %v308_v6 }
 0x1a2   :  { %v473_v10 = vadd.f32 %v472_v8, %v312_v5  ;;  %v883_v8 = vld [vmem:[#allocation4 + $0x60] sm:$0xff] }
 0x1a4   :  { %v476_v12 = vpop.f32.mrb[6].mxu1  ;;  %558 = vmatprep.subr.mxu0 %v473_v10  ;;  %v888_v10 = vld [vmem:[#allocation4 + $0x88] sm:$0xff] }
 0x1a5   :  { %v477_v13 = vadd.f32 %v476_v12, %v308_v6  ;;  %v478_v15 = vpop.f32.mrb[7].mxu1  ;;  %559 = vmatpush1.xpose.msra.mxu0 %v471_v11  ;;  %v886_v6 = vld [vmem:[#allocation4 + $0x78] sm:$0xff]  ;;  %v1986_v12 = vpack.c.bf16 %v885_v9, %v883_v8  ;;  %v924_v8 = vld [vmem:[#allocation4 + $0x1a8] sm:$0xff] }
 0x1a6   :  { %v479_v17 = vadd.f32 %v478_v15, %v312_v5  ;;  %v884_v5 = vld [vmem:[#allocation4 + $0x68] sm:$0xff]  ;;  %v890_v11 = vld [vmem:[#allocation4 + $0x98] sm:$0xff]  ;;  %v887_v15 = vld [vmem:[#allocation4 + $0x80] sm:$0xff] }
 0x1a7   :  { %v1984_v7 = vpack.c.bf16 %v886_v6, %v884_v5  ;;  %v926_v9 = vld [vmem:[#allocation4 + $0x1b8] sm:$0xff] }
 0x1a8   :  { %623 = vmatmul.mubr.f32.vlgmr.msra.gmra.mrb[4].mxu0 %v394_v16  ;;  %628 = vmatprep.subr.mxu0 %v479_v17  ;;  %v889_v16 = vld [vmem:[#allocation4 + $0x90] sm:$0xff]  ;;  %v892_v17 = vld [vmem:[#allocation4 + $0xa8] sm:$0xff] }
 0x1a9   :  { %629 = vmatpush1.xpose.msra.mxu0 %v477_v13  ;;  %692 = vmatprep.mubr.f32.mxu0 %v402_v54  ;;  %v1988_v13 = vpack.c.bf16 %v890_v11, %v888_v10  ;;  %v2024_v11 = vpack.c.bf16 %v926_v9, %v924_v8  ;;  %v1101_v8 = vld [vmem:[#allocation6 + $0x40] sm:$0xff] }
 0x1aa   :  { %v1105_v9 = vld [vmem:[#allocation6 + $0x60] sm:$0xff] }
 0x1ac   :  { %693 = vmatmul.mubr.f32.vlgmr.msra.gmra.mrb[6].mxu0 %v400_v18  ;;  %v894_v18 = vld [vmem:[#allocation4 + $0xb8] sm:$0xff] }
 0x27b   :  { %v624_v19 = vpop.f32.mrb[4].mxu0 }
 0x27c   :  { %v698_v21 = vmul.f32 0.0625, %v624_v19  ;;  %v626_v22 = vpop.f32.mrb[5].mxu0  ;;  %v1990_v19 = vpack.c.bf16 %v889_v16, %v887_v15  ;;  %v928_v15 = vld [vmem:[#allocation4 + $0x1c8] sm:$0xff]  ;;  %v930_v16 = vld [vmem:[#allocation4 + $0x1d8] sm:$0xff] }
 0x27d   :  { %v891_v22 = vld [vmem:[#allocation4 + $0xa0] sm:$0xff] }
 0x27e   :  { %v701_v23 = vsel %vm700_vm0, %v698_v21, -inf }
 0x27f   :  { %702 = vmax.xlane.f32.xlu0 %v701_v23  ;;  %v694_v24 = vpop.f32.mrb[6].mxu0  ;;  %v893_v23 = vld [vmem:[#allocation4 + $0xb0] sm:$0xff] }
 0x280   :  { %v699_v25 = vmul.f32 0.0625, %v694_v24  ;;  %v696_v26 = vpop.f32.mrb[7].mxu0  ;;  %v896_v24 = vld [vmem:[#allocation4 + $0xc8] sm:$0xff] }
 0x281   :  { %v1994_v26 = vpack.c.bf16 %v893_v23, %v891_v22  ;;  %v932_v22 = vld [vmem:[#allocation4 + $0x1e8] sm:$0xff]  ;;  %v934_v23 = vld [vmem:[#allocation4 + $0x1f8] sm:$0xff] }
 0x282   :  { %v704_v27 = vsel %vm700_vm0, %v699_v25, -inf }
 0x283   :  { %705 = vmax.xlane.f32.xlu0 %v704_v27 }
 0x30c   :  { %v703_v28 = vpop.xlane.xlu0 %702 }
 0x30d   :  { %v707_v30 = vsub.f32 %v698_v21, %v703_v28  ;;  %v1992_v21 = vpack.c.bf16 %v894_v18, %v892_v17  ;;  %v895_v28 = vld [vmem:[#allocation4 + $0xc0] sm:$0xff]  ;;  %v2028_v18 = vpack.c.bf16 %v930_v16, %v928_v15  ;;  %v1114_v15 = vld [vmem:[#allocation6 + $0xa8] sm:$0xff] }
 0x30f   :  { %v709_v31 = vmul.f32 1.442695, %v707_v30  ;;  %v897_v30 = vld [vmem:[#allocation4 + $0xd0] sm:$0xff] }
 0x310   :  { %v706_v32 = vpop.xlane.xlu0 %705 }
 0x311   :  { %2311 = vpow2.f32 %v709_v31  ;;  %v708_v33 = vsub.f32 %v699_v25, %v706_v32  ;;  %v898_v25 = vld [vmem:[#allocation4 + $0xd8] sm:$0xff]  ;;  %v900_v31 = vld [vmem:[#allocation4 + $0xe8] sm:$0xff] }
 0x312   :  { %v1996_v27 = vpack.c.bf16 %v898_v25, %v896_v24  ;;  %v902_v32 = vld [vmem:[#allocation4 + $0xf8] sm:$0xff]  ;;  %v2032_v25 = vpack.c.bf16 %v934_v23, %v932_v22  ;;  %v1113_v23 = vld [vmem:[#allocation6 + $0xa0] sm:$0xff] }
 0x313   :  { %v711_v34 = vmul.f32 1.442695, %v708_v33  ;;  %v1998_v33 = vpack.c.bf16 %v897_v30, %v895_v28 }
 0x315   :  { %2313 = vpow2.f32 %v711_v34  ;;  %v2000_v34 = vpack.c.bf16 %v902_v32, %v900_v31 }
 0x31b   :  { %v2312_v35 = vpop.eup %2311 }
 0x31c   :  { %v713_v36 = vsel %vm700_vm0, %v2312_v35, 0.0 }
 0x31d   :  { %714 = vadd.xlane.f32.xlu1 %v713_v36  ;;  %v901_v36 = vld [vmem:[#allocation4 + $0xf0] sm:$0xff] }
 0x31f   :  { %v2314_v37 = vpop.eup %2313 }
 0x320   :  { %v716_v38 = vsel %vm700_vm0, %v2314_v37, 0.0 }
 0x321   :  { %717 = vadd.xlane.f32.xlu1 %v716_v38  ;;  %v906_v38 = vld [vmem:[#allocation4 + $0x118] sm:$0xff] }
 0x3aa   :  { %v715_v40 = vpop.xlane.xlu1 %714 }
 0x3ab   :  { %2315 = vrcp.f32 %v715_v40 }
 0x3ae   :  { %v718_v42 = vpop.xlane.xlu1 %717 }
 0x3af   :  { %2317 = vrcp.f32 %v718_v42  ;;  %v903_v42 = vld [vmem:[#allocation4 + $0x100] sm:$0xff] }
 0x3b5   :  { %v2316_v47 = vpop.eup %2315 }
 0x3b6   :  { %v720_v48 = vmul.f32 %v2316_v47, %v2312_v35  ;;  %v899_v35 = vld [vmem:[#allocation4 + $0xe0] sm:$0xff]  ;;  %v910_v47 = vld [vmem:[#allocation4 + $0x138] sm:$0xff] }
 0x3b8   :  { %1778 = vmatmul.mubr.msk.f32.vlgmr.msra.gmra.mrb[8].mxu1 %vm700_vm0, %v720_v48  ;;  %v2006_v48 = vpack.c.bf16 %v905_v43, %v903_v42  ;;  %v2327_v43 = vld [vmem:[%s2751_s0 + $0x8] sm:$0xff] }
 0x3b9   :  { %v2318_v54 = vpop.eup %2317  ;;  %801 = vmatpush1.msra.mxu1 %v2600_v63  ;;  %864 = vmatprep.mubr.f32.mxu1 %v2432_v39  ;;  %v1982_v63 = vpack.c.bf16 %v881_v1, %v879_v0  ;;  %v2002_v39 = vpack.c.bf16 %v901_v36, %v899_v35  ;;  %v920_v0 = vld [vmem:[#allocation4 + $0x188] sm:$0xff]  ;;  %v922_v1 = vld [vmem:[#allocation4 + $0x198] sm:$0xff] }
 0x3ba   :  { %v722_v56 = vmul.f32 %v2318_v54, %v2314_v37  ;;  %1973 = vmatprep.subr.bf16.mxu1 %v1972_v49  ;;  %v904_v37 = vld [vmem:[#allocation4 + $0x108] sm:$0xff]  ;;  %v2008_v49 = vpack.c.bf16 %v910_v47, %v908_v44  ;;  %v2010_v54 = vpack.c.bf16 %v909_v51, %v907_v50  ;;  %v2020_v6 = vpack.c.bf16 %v922_v1, %v920_v0 }
 0x3bb   :  { %v2004_v40 = vpack.c.bf16 %v906_v38, %v904_v37  ;;  %v1102_v0 = vld [vmem:[#allocation6 + $0x48] sm:$0xff] }
 0x3bc   :  { %1779 = vmatmul.mubr.msk.f32.vlgmr.msra.gmra.mrb[10].mxu1 %vm700_vm0, %v722_v56  ;;  %v911_v56 = vld [vmem:[#allocation4 + $0x140] sm:$0xff]  ;;  %v1106_v1 = vld [vmem:[#allocation6 + $0x68] sm:$0xff] }
 0x3bd   :  { %1975 = vmatpush1.bf16.msra.mxu1 %v1974_v55  ;;  %v2012_v55 = vpack.c.bf16 %v914_v53, %v912_v52 }
 0x3be   :  { %1977 = vmatprep.subr.bf16.mxu1 %v1976_v41  ;;  %v913_v41 = vld [vmem:[#allocation4 + $0x150] sm:$0xff] }
 0x3bf   :  { %v2014_v59 = vpack.c.bf16 %v913_v41, %v911_v56  ;;  %v1096_v56 = vld [vmem:[#allocation6 + $0x18] sm:$0xff] }
 0x3c1   :  { %1979 = vmatpush1.bf16.msra.mxu1 %v1978_v61  ;;  %v915_v61 = vld [vmem:[#allocation4 + $0x160] sm:$0xff] }
 0x3c2   :  { %1981 = vmatprep.subr.bf16.mxu1 %v1980_v62  ;;  %v917_v62 = vld [vmem:[#allocation4 + $0x170] sm:$0xff] }
 0x3c3   :  { %v2018_v5 = vpack.c.bf16 %v917_v62, %v915_v61  ;;  %v1095_v62 = vld [vmem:[#allocation6 + $0x10] sm:$0xff] }
 0x3c5   :  { %1983 = vmatpush1.bf16.msra.mxu1 %v1982_v63  ;;  %v919_v63 = vld [vmem:[#allocation4 + $0x180] sm:$0xff] }
 0x3c6   :  { %1985 = vmatprep.subr.bf16.mxu1 %v1984_v7  ;;  %v921_v7 = vld [vmem:[#allocation4 + $0x190] sm:$0xff] }
 0x3c7   :  { %v2022_v10 = vpack.c.bf16 %v921_v7, %v919_v63  ;;  %v2040_v63 = vpack.c.bf16 %v1106_v1, %v1102_v0  ;;  %v1137_v0 = vld [vmem:[#allocation6 + $0x160] sm:$0xff] }
 0x3c9   :  { %1987 = vmatpush1.bf16.msra.mxu1 %v1986_v12  ;;  %v923_v12 = vld [vmem:[#allocation4 + $0x1a0] sm:$0xff] }
 0x3ca   :  { %1989 = vmatprep.subr.bf16.mxu1 %v1988_v13  ;;  %v925_v13 = vld [vmem:[#allocation4 + $0x1b0] sm:$0xff] }
 0x3cb   :  { %v2026_v17 = vpack.c.bf16 %v925_v13, %v923_v12  ;;  %v1107_v12 = vld [vmem:[#allocation6 + $0x70] sm:$0xff]  ;;  %v1110_v13 = vld [vmem:[#allocation6 + $0x88] sm:$0xff] }
 0x3cd   :  { %1991 = vmatpush1.bf16.msra.mxu1 %v1990_v19  ;;  %v927_v19 = vld [vmem:[#allocation4 + $0x1c0] sm:$0xff] }
 0x3ce   :  { %1993 = vmatprep.subr.bf16.mxu1 %v1992_v21  ;;  %v929_v21 = vld [vmem:[#allocation4 + $0x1d0] sm:$0xff] }
 0x3cf   :  { %v2030_v24 = vpack.c.bf16 %v929_v21, %v927_v19  ;;  %v1116_v19 = vld [vmem:[#allocation6 + $0xb8] sm:$0xff]  ;;  %v1109_v21 = vld [vmem:[#allocation6 + $0x80] sm:$0xff] }
 0x3d1   :  { %1995 = vmatpush1.bf16.msra.mxu1 %v1994_v26  ;;  %v931_v26 = vld [vmem:[#allocation4 + $0x1e0] sm:$0xff] }
 0x3d2   :  { %1997 = vmatprep.subr.bf16.mxu1 %v1996_v27  ;;  %v933_v27 = vld [vmem:[#allocation4 + $0x1f0] sm:$0xff] }
 0x3d3   :  { %v2034_v28 = vpack.c.bf16 %v933_v27, %v931_v26  ;;  %v2046_v26 = vpack.c.bf16 %v1113_v23, %v1109_v21  ;;  %v1118_v27 = vld [vmem:[#allocation6 + $0xc8] sm:$0xff]  ;;  %v1152_v21 = vld [vmem:[#allocation6 + $0x1d8] sm:$0xff] }
 0x3d5   :  { %1999 = vmatpush1.bf16.msra.mxu1 %v1998_v33 }
 0x3d6   :  { %2001 = vmatprep.subr.bf16.mxu1 %v2000_v34  ;;  %v935_v34 = vld [vmem:[%s2755_s4] sm:$0x3] }
 0x3d7   :  { %v940_v35 = vrot.slane %v935_v34, %v2605_v4  ;;  %v944_v36 = vrot.slane %v935_v34, %v2592_v46  ;;  %v1117_v34 = vld [vmem:[#allocation6 + $0xc0] sm:$0xff] }
 0x3d9   :  { %2003 = vmatpush1.bf16.msra.mxu1 %v2002_v39 }
 0x3da   :  { %2005 = vmatprep.subr.bf16.mxu1 %v2004_v40 }
 0x3dd   :  { %2007 = vmatpush1.bf16.msra.mxu1 %v2006_v48 }
 0x3de   :  { %2009 = vmatprep.subr.bf16.mxu1 %v2008_v49 }
 0x3e1   :  { %2011 = vmatpush1.bf16.msra.mxu1 %v2010_v54  ;;  %v1094_v54 = vld [vmem:[#allocation6 + $0x8] sm:$0xff] }
 0x3e2   :  { %2013 = vmatprep.subr.bf16.mxu1 %v2012_v55  ;;  %v1098_v55 = vld [vmem:[#allocation6 + $0x28] sm:$0xff] }
 0x3e3   :  { %v2036_v41 = vpack.c.bf16 %v1098_v55, %v1094_v54  ;;  %v1127_v54 = vld [vmem:[#allocation6 + $0x110] sm:$0xff] }
 0x3e5   :  { %2015 = vmatpush1.bf16.msra.mxu1 %v2014_v59  ;;  %v1097_v59 = vld [vmem:[#allocation6 + $0x20] sm:$0xff]  ;;  %2037 = vmatprep.subr.bf16.mxu0 %v2036_v41  ;;  %v1134_v41 = vld [vmem:[#allocation6 + $0x148] sm:$0xff] }
 0x3e6   :  { %2017 = vmatprep.subr.bf16.mxu1 %v2016_v60  ;;  %v2100_v60 = vpack.c.bf16 %v1100_v57, %v1096_v56  ;;  %v2038_v61 = vpack.c.bf16 %v1097_v59, %v1093_v58  ;;  %v1131_v56 = vld [vmem:[#allocation6 + $0x130] sm:$0xff]  ;;  %v1138_v57 = vld [vmem:[#allocation6 + $0x168] sm:$0xff]  ;;  %v1136_v58 = vld [vmem:[#allocation6 + $0x158] sm:$0xff] }
 0x3e7   :  { %v1140_v59 = vld [vmem:[#allocation6 + $0x178] sm:$0xff] }
 0x3e8   :  { %2039 = vmatpush1.bf16.msra.mxu0 %v2038_v61  ;;  %v2118_v61 = vpack.c.bf16 %v1131_v56, %v1127_v54  ;;  %v2120_v1 = vpack.c.bf16 %v1140_v59, %v1136_v58  ;;  %v1167_v58 = vld [vmem:[#allocation6 + $0x250] sm:$0xff] }
 0x3e9   :  { %2019 = vmatpush1.bf16.msra.mxu1 %v2018_v5  ;;  %v1104_v5 = vld [vmem:[#allocation6 + $0x58] sm:$0xff]  ;;  %2041 = vmatprep.subr.bf16.mxu0 %v2040_v63  ;;  %v1146_v63 = vld [vmem:[#allocation6 + $0x1a8] sm:$0xff] }
 0x3ea   :  { %2021 = vmatprep.subr.bf16.mxu1 %v2020_v6  ;;  %v1108_v6 = vld [vmem:[#allocation6 + $0x78] sm:$0xff] }
 0x3eb   :  { %v2104_v7 = vpack.c.bf16 %v1108_v6, %v1104_v5  ;;  %v1139_v5 = vld [vmem:[#allocation6 + $0x170] sm:$0xff]  ;;  %v1142_v6 = vld [vmem:[#allocation6 + $0x188] sm:$0xff] }
 0x3ed   :  { %2023 = vmatpush1.bf16.msra.mxu1 %v2022_v10  ;;  %v1103_v10 = vld [vmem:[#allocation6 + $0x50] sm:$0xff] }
 0x3ee   :  { %2025 = vmatprep.subr.bf16.mxu1 %v2024_v11  ;;  %v2042_v11 = vpack.c.bf16 %v1105_v9, %v1101_v8  ;;  %v2106_v16 = vpack.c.bf16 %v1107_v12, %v1103_v10  ;;  %v1148_v8 = vld [vmem:[#allocation6 + $0x1b8] sm:$0xff]  ;;  %v1141_v12 = vld [vmem:[#allocation6 + $0x180] sm:$0xff] }
 0x3f0   :  { %2043 = vmatpush1.bf16.msra.mxu0 %v2042_v11  ;;  %v2060_v11 = vpack.c.bf16 %v1146_v63, %v1142_v6  ;;  %v1173_v6 = vld [vmem:[#allocation6 + $0x280] sm:$0xff] }
 0x3f1   :  { %2027 = vmatpush1.bf16.msra.mxu1 %v2026_v17  ;;  %v2044_v17 = vpack.c.bf16 %v1114_v15, %v1110_v13  ;;  %v1145_v13 = vld [vmem:[#allocation6 + $0x1a0] sm:$0xff]  ;;  %v1143_v15 = vld [vmem:[#allocation6 + $0x190] sm:$0xff] }
 0x3f2   :  { %2029 = vmatprep.subr.bf16.mxu1 %v2028_v18  ;;  %v1112_v18 = vld [vmem:[#allocation6 + $0x98] sm:$0xff]  ;;  %v2062_v23 = vpack.c.bf16 %v1145_v13, %v1141_v12  ;;  %v1177_v63 = vld [vmem:[#allocation6 + $0x2a0] sm:$0xff] }
 0x3f3   :  { %v2108_v22 = vpack.c.bf16 %v1116_v19, %v1112_v18  ;;  %2045 = vmatprep.subr.bf16.mxu0 %v2044_v17  ;;  %v1147_v17 = vld [vmem:[#allocation6 + $0x1b0] sm:$0xff]  ;;  %v1150_v18 = vld [vmem:[#allocation6 + $0x1c8] sm:$0xff] }
 0x3f4   :  { %2047 = vmatpush1.bf16.msra.mxu0 %v2046_v26  ;;  %v1154_v19 = vld [vmem:[#allocation6 + $0x1e8] sm:$0xff]  ;;  %v1149_v26 = vld [vmem:[#allocation6 + $0x1c0] sm:$0xff] }
 0x3f5   :  { %2031 = vmatpush1.bf16.msra.mxu1 %v2030_v24  ;;  %v1111_v24 = vld [vmem:[#allocation6 + $0x90] sm:$0xff] }
 0x3f6   :  { %2033 = vmatprep.subr.bf16.mxu1 %v2032_v25  ;;  %v1115_v25 = vld [vmem:[#allocation6 + $0xb0] sm:$0xff] }
 0x3f9   :  { %2035 = vmatpush1.bf16.msra.mxu1 %v2034_v28  ;;  %v1122_v28 = vld [vmem:[#allocation6 + $0xe8] sm:$0xff] }
 0x3fa   :  { %2101 = vmatprep.subr.bf16.mxu1 %v2100_v60 }
 0x48b   :  { %v792_v30 = vpop.f32.mrb[8].mxu1 }
 0x48c   :  { %v794_v31 = vpop.f32.mrb[9].mxu1 }
 0x48d   :  { %1011 = vmatprep.mubr.f32.mxu1 %v794_v31  ;;  %v2110_v31 = vpack.c.bf16 %v1115_v25, %v1111_v24  ;;  %v2126_v24 = vpack.c.bf16 %v1147_v17, %v1143_v15  ;;  %v2064_v25 = vpack.c.bf16 %v1154_v19, %v1150_v18 }
 0x48e   :  { %1012 = vmatmul.mubr.f32.vlgmr.msra.gmra.mrb[12].mxu1 %v792_v30  ;;  %v1120_v30 = vld [vmem:[#allocation6 + $0xd8] sm:$0xff] }
 0x48f   :  { %v866_v32 = vpop.f32.mrb[10].mxu1 }
 0x490   :  { %v868_v33 = vpop.f32.mrb[11].mxu1 }
 0x491   :  { %1017 = vmatprep.mubr.f32.mxu1 %v868_v33  ;;  %v1124_v33 = vld [vmem:[#allocation6 + $0xf8] sm:$0xff] }
 0x492   :  { %1018 = vmatmul.mubr.f32.gmra.mrb[14].mxu1 %v866_v32  ;;  %v2048_v32 = vpack.c.bf16 %v1122_v28, %v1118_v27  ;;  %v1153_v27 = vld [vmem:[#allocation6 + $0x1e0] sm:$0xff]  ;;  %v1151_v28 = vld [vmem:[#allocation6 + $0x1d0] sm:$0xff] }
 0x494   :  { %2049 = vmatprep.subr.bf16.mxu0 %v2048_v32  ;;  %v1158_v32 = vld [vmem:[#allocation6 + $0x208] sm:$0xff] }
 0x561   :  { %v1013_v37 = vpop.f32.mrb[12].mxu1 }
 0x562   :  { %v1014_v38 = vadd.f32 %v1013_v37, %v940_v35  ;;  %v1015_v39 = vpop.f32.mrb[13].mxu1  ;;  %v1119_v37 = vld [vmem:[#allocation6 + $0xd0] sm:$0xff] }
 0x563   :  { %v1016_v40 = vadd.f32 %v1015_v39, %v944_v36  ;;  %v1126_v39 = vld [vmem:[#allocation6 + $0x108] sm:$0xff] }
 0x564   :  { %v2625_v42 = vadd.f32 %v1014_v38, %v2567_v14  ;;  %v1123_v38 = vld [vmem:[#allocation6 + $0xf0] sm:$0xff] }
 0x565   :  { %v2630_v44 = vadd.f32 %v2327_v43, %v1016_v40  ;;  %v1019_v47 = vpop.f32.mrb[14].mxu1  ;;  %v1130_v40 = vld [vmem:[#allocation6 + $0x128] sm:$0xff]  ;;  %v1128_v43 = vld [vmem:[#allocation6 + $0x118] sm:$0xff] }
 0x566   :  { %v1020_v48 = vadd.f32 %v1019_v47, %v940_v35  ;;  %v1021_v49 = vpop.f32.mrb[15].mxu1  ;;  %v1121_v35 = vld [vmem:[#allocation6 + $0xe0] sm:$0xff]  ;;  %v1132_v47 = vld [vmem:[#allocation6 + $0x138] sm:$0xff] }
 0x567   :  { %v1022_v50 = vadd.f32 %v1021_v49, %v944_v36  ;;  %v1030_v51 = vadd.f32 %v2630_v44, %v2625_v42  ;;  %v2112_v36 = vpack.c.bf16 %v1124_v33, %v1120_v30  ;;  %v2114_v49 = vpack.c.bf16 %v1123_v38, %v1119_v37  ;;  %v1162_v33 = vld [vmem:[#allocation6 + $0x228] sm:$0xff] }
 0x568   :  { %v2635_v52 = vadd.f32 %v1020_v48, %v2579_v29  ;;  %v1099_v29 = vld [vmem:[#allocation6 + $0x30] sm:$0xff]  ;;  %v2050_v48 = vpack.c.bf16 %v1121_v35, %v1117_v34  ;;  %v2116_v55 = vpack.c.bf16 %v1132_v47, %v1128_v43  ;;  %v1160_v34 = vld [vmem:[#allocation6 + $0x218] sm:$0xff]  ;;  %v2068_v38 = vpack.c.bf16 %v1162_v33, %v1158_v32  ;;  %v1185_v32 = vld [vmem:[#allocation6 + $0x2e0] sm:$0xff] }
 0x569   :  { %v2638_v53 = vadd.f32 %v1022_v50, %v2572_v20  ;;  %1031 = vadd.xlane.f32.xlu0 %v1030_v51  ;;  %v2102_v20 = vpack.c.bf16 %v1099_v29, %v1095_v62  ;;  %v2052_v50 = vpack.c.bf16 %v1130_v40, %v1126_v39  ;;  %v1125_v51 = vld [vmem:[#allocation6 + $0x100] sm:$0xff]  ;;  %v2056_v62 = vpack.c.bf16 %v1138_v57, %v1134_v41  ;;  %v1164_v35 = vld [vmem:[#allocation6 + $0x238] sm:$0xff]  ;;  %v1159_v43 = vld [vmem:[#allocation6 + $0x210] sm:$0xff] }
 0x56a   :  { %2051 = vmatpush1.bf16.msra.mxu0 %v2050_v48  ;;  %v1133_v29 = vld [vmem:[#allocation6 + $0x140] sm:$0xff]  ;;  %v2132_v47 = vpack.c.bf16 %v1164_v35, %v1160_v34  ;;  %v1163_v48 = vld [vmem:[#allocation6 + $0x230] sm:$0xff] }
 0x56b   :  { %v1033_v14 = vadd.f32 %v2638_v53, %v2635_v52  ;;  %2103 = vmatpush1.bf16.msra.mxu1 %v2102_v20  ;;  %2053 = vmatprep.subr.bf16.mxu0 %v2052_v50  ;;  %v1135_v20 = vld [vmem:[#allocation6 + $0x150] sm:$0xff]  ;;  %v2058_v9 = vpack.c.bf16 %v1137_v0, %v1133_v29  ;;  %v1157_v39 = vld [vmem:[#allocation6 + $0x200] sm:$0xff]  ;;  %v1170_v50 = vld [vmem:[#allocation6 + $0x268] sm:$0xff] }
 0x56c   :  { %2105 = vmatprep.subr.bf16.mxu1 %v2104_v7  ;;  %v1144_v7 = vld [vmem:[#allocation6 + $0x198] sm:$0xff]  ;;  %v2122_v10 = vpack.c.bf16 %v1139_v5, %v1135_v20  ;;  %v1161_v40 = vld [vmem:[#allocation6 + $0x220] sm:$0xff]  ;;  %v1183_v34 = vld [vmem:[#allocation6 + $0x2d0] sm:$0xff] }
 0x56d   :  { %1034 = vadd.xlane.f32.xlu1 %v1033_v14  ;;  %v1129_v14 = vld [vmem:[#allocation6 + $0x120] sm:$0xff]  ;;  %v2070_v54 = vpack.c.bf16 %v1161_v40, %v1157_v39  ;;  %v1176_v29 = vld [vmem:[#allocation6 + $0x298] sm:$0xff]  ;;  %v1187_v35 = vld [vmem:[#allocation6 + $0x2f0] sm:$0xff] }
 0x56e   :  { %v2054_v60 = vpack.c.bf16 %v1129_v14, %v1125_v51  ;;  %v1168_v51 = vld [vmem:[#allocation6 + $0x258] sm:$0xff]  ;;  %v1165_v41 = vld [vmem:[#allocation6 + $0x240] sm:$0xff] }
 0x56f   :  { %2107 = vmatpush1.bf16.msra.mxu1 %v2106_v16  ;;  %v2124_v16 = vpack.c.bf16 %v1148_v8, %v1144_v7  ;;  %v1172_v14 = vld [vmem:[#allocation6 + $0x278] sm:$0xff]  ;;  %v1169_v57 = vld [vmem:[#allocation6 + $0x260] sm:$0xff]  ;;  %v1175_v8 = vld [vmem:[#allocation6 + $0x290] sm:$0xff] }
 0x570   :  { %2109 = vmatprep.subr.bf16.mxu1 %v2108_v22  ;;  %2055 = vmatpush1.bf16.msra.mxu0 %v2054_v60  ;;  %v1156_v22 = vld [vmem:[#allocation6 + $0x1f8] sm:$0xff]  ;;  %v2136_v59 = vpack.c.bf16 %v1172_v14, %v1168_v51  ;;  %v1171_v60 = vld [vmem:[#allocation6 + $0x270] sm:$0xff]  ;;  %v2074_v20 = vpack.c.bf16 %v1169_v57, %v1165_v41 }
 0x571   :  { %2057 = vmatprep.subr.bf16.mxu0 %v2056_v62  ;;  %v2128_v30 = vpack.c.bf16 %v1156_v22, %v1152_v21  ;;  %v1178_v62 = vld [vmem:[#allocation6 + $0x2a8] sm:$0xff]  ;;  %v1180_v0 = vld [vmem:[#allocation6 + $0x2b8] sm:$0xff]  ;;  %v1191_v51 = vld [vmem:[#allocation6 + $0x310] sm:$0xff] }
 0x572   :  { %v2140_v7 = vpack.c.bf16 %v1180_v0, %v1176_v29  ;;  %v1192_v39 = vld [vmem:[#allocation6 + $0x318] sm:$0xff]  ;;  %v1195_v14 = vld [vmem:[#allocation6 + $0x330] sm:$0xff] }
 0x573   :  { %2111 = vmatpush1.bf16.msra.mxu1 %v2110_v31  ;;  %v1155_v31 = vld [vmem:[#allocation6 + $0x1f0] sm:$0xff]  ;;  %v1200_v41 = vld [vmem:[#allocation6 + $0x358] sm:$0xff] }
 0x574   :  { %2113 = vmatprep.subr.bf16.mxu1 %v2112_v36  ;;  %2059 = vmatpush1.bf16.msra.mxu0 %v2058_v9  ;;  %v2066_v36 = vpack.c.bf16 %v1153_v27, %v1149_v26  ;;  %v2130_v37 = vpack.c.bf16 %v1155_v31, %v1151_v28  ;;  %v1179_v9 = vld [vmem:[#allocation6 + $0x2b0] sm:$0xff]  ;;  %v1182_v26 = vld [vmem:[#allocation6 + $0x2c8] sm:$0xff]  ;;  %v1184_v28 = vld [vmem:[#allocation6 + $0x2d8] sm:$0xff] }
 0x575   :  { %2061 = vmatprep.subr.bf16.mxu0 %v2060_v11  ;;  %v2142_v11 = vpack.c.bf16 %v1179_v9, %v1175_v8  ;;  %v1186_v27 = vld [vmem:[#allocation6 + $0x2e8] sm:$0xff]  ;;  %v1188_v31 = vld [vmem:[#allocation6 + $0x2f8] sm:$0xff]  ;;  %v1199_v29 = vld [vmem:[#allocation6 + $0x350] sm:$0xff] }
 0x576   :  { %v2144_v33 = vpack.c.bf16 %v1188_v31, %v1184_v28  ;;  %v1203_v0 = vld [vmem:[#allocation6 + $0x370] sm:$0xff]  ;;  %v1205_v9 = vld [vmem:[#allocation6 + $0x380] sm:$0xff] }
 0x577   :  { %2115 = vmatpush1.bf16.msra.mxu1 %v2114_v49  ;;  %v1166_v49 = vld [vmem:[#allocation6 + $0x248] sm:$0xff]  ;;  %v1219_v28 = vld [vmem:[#allocation6 + $0x3f0] sm:$0xff] }
 0x578   :  { %2117 = vmatprep.subr.bf16.mxu1 %v2116_v55  ;;  %2063 = vmatpush1.bf16.msra.mxu0 %v2062_v23  ;;  %v2134_v55 = vpack.c.bf16 %v1163_v48, %v1159_v43  ;;  %v2072_v56 = vpack.c.bf16 %v1170_v50, %v1166_v49  ;;  %v1196_v43 = vld [vmem:[#allocation6 + $0x338] sm:$0xff]  ;;  %v1193_v48 = vld [vmem:[#allocation6 + $0x320] sm:$0xff] }
 0x579   :  { %2065 = vmatprep.subr.bf16.mxu0 %v2064_v25  ;;  %v2148_v49 = vpack.c.bf16 %v1196_v43, %v1192_v39  ;;  %v1028_v39 = vld [vmem:[%s2756_s5] sm:$0x3] }
 0x57a   :  { %v1067_v43 = vrot.slane %v1028_v39, %v2605_v4 }
 0x57b   :  { %2119 = vmatpush1.bf16.msra.mxu1 %v2118_v61  ;;  %v1174_v61 = vld [vmem:[#allocation6 + $0x288] sm:$0xff] }
 0x57c   :  { %2121 = vmatprep.subr.bf16.mxu1 %v2120_v1  ;;  %2067 = vmatpush1.bf16.msra.mxu0 %v2066_v36  ;;  %v2138_v1 = vpack.c.bf16 %v1171_v60, %v1167_v58  ;;  %v2076_v5 = vpack.c.bf16 %v1178_v62, %v1174_v61  ;;  %v2146_v36 = vpack.c.bf16 %v1187_v35, %v1183_v34  ;;  %v1204_v58 = vld [vmem:[#allocation6 + $0x378] sm:$0xff]  ;;  %v1201_v60 = vld [vmem:[#allocation6 + $0x360] sm:$0xff] }
 0x57d   :  { %2069 = vmatprep.subr.bf16.mxu0 %v2068_v38  ;;  %v1194_v38 = vld [vmem:[#allocation6 + $0x328] sm:$0xff]  ;;  %v2152_v61 = vpack.c.bf16 %v1204_v58, %v1200_v41  ;;  %v1412_v58 = vld [vmem:[#allocation7 + $0x38] sm:$0xff] }
 0x57f   :  { %2123 = vmatpush1.bf16.msra.mxu1 %v2122_v10  ;;  %v2078_v10 = vpack.c.bf16 %v1177_v63, %v1173_v6  ;;  %v1208_v6 = vld [vmem:[#allocation6 + $0x398] sm:$0xff] }
 0x580   :  { %2125 = vmatprep.subr.bf16.mxu1 %v2124_v16  ;;  %2071 = vmatpush1.bf16.msra.mxu0 %v2070_v54  ;;  %v2150_v54 = vpack.c.bf16 %v1195_v14, %v1191_v51  ;;  %v1212_v63 = vld [vmem:[#allocation6 + $0x3b8] sm:$0xff] }
 0x581   :  { %2073 = vmatprep.subr.bf16.mxu0 %v2072_v56  ;;  %v1202_v56 = vld [vmem:[#allocation6 + $0x368] sm:$0xff]  ;;  %v2156_v8 = vpack.c.bf16 %v1212_v63, %v1208_v6  ;;  %v1416_v63 = vld [vmem:[#allocation7 + $0x58] sm:$0xff] }
 0x582   :  { %v1414_v6 = vld [vmem:[#allocation7 + $0x48] sm:$0xff] }
 0x583   :  { %2127 = vmatpush1.bf16.msra.mxu1 %v2126_v24 }
 0x584   :  { %2129 = vmatprep.subr.bf16.mxu1 %v2128_v30  ;;  %2075 = vmatpush1.bf16.msra.mxu0 %v2074_v20  ;;  %v2080_v30 = vpack.c.bf16 %v1186_v27, %v1182_v26  ;;  %v1206_v20 = vld [vmem:[#allocation6 + $0x388] sm:$0xff]  ;;  %v1217_v26 = vld [vmem:[#allocation6 + $0x3e0] sm:$0xff]  ;;  %v1215_v27 = vld [vmem:[#allocation6 + $0x3d0] sm:$0xff] }
 0x585   :  { %2077 = vmatprep.subr.bf16.mxu0 %v2076_v5  ;;  %v1210_v5 = vld [vmem:[#allocation6 + $0x3a8] sm:$0xff]  ;;  %v2162_v31 = vpack.c.bf16 %v1219_v28, %v1215_v27  ;;  %v1428_v28 = vld [vmem:[#allocation7 + $0xb8] sm:$0xff] }
 0x586   :  { %v1426_v27 = vld [vmem:[#allocation7 + $0xa8] sm:$0xff] }
 0x587   :  { %2131 = vmatpush1.bf16.msra.mxu1 %v2130_v37  ;;  %v1190_v37 = vld [vmem:[#allocation6 + $0x308] sm:$0xff] }
 0x588   :  { %2133 = vmatprep.subr.bf16.mxu1 %v2132_v47  ;;  %2079 = vmatpush1.bf16.msra.mxu0 %v2078_v10  ;;  %v2084_v40 = vpack.c.bf16 %v1194_v38, %v1190_v37  ;;  %v1189_v47 = vld [vmem:[#allocation6 + $0x300] sm:$0xff] }
 0x589   :  { %2081 = vmatprep.subr.bf16.mxu0 %v2080_v30  ;;  %v2086_v50 = vpack.c.bf16 %v1193_v48, %v1189_v47  ;;  %v1209_v10 = vld [vmem:[#allocation6 + $0x3a0] sm:$0xff]  ;;  %v1071_v47 = vrot.slane %v1028_v39, %v2592_v46  ;;  %v1436_v39 = vld [vmem:[#allocation7 + $0xf8] sm:$0xff] }
 0x58b   :  { %2135 = vmatpush1.bf16.msra.mxu1 %v2134_v55  ;;  %v1198_v55 = vld [vmem:[#allocation6 + $0x348] sm:$0xff] }
 0x58c   :  { %2137 = vmatprep.subr.bf16.mxu1 %v2136_v59  ;;  %v2088_v57 = vpack.c.bf16 %v1202_v56, %v1198_v55  ;;  %v1197_v59 = vld [vmem:[#allocation6 + $0x340] sm:$0xff]  ;;  %v1407_v55 = vld [vmem:[#allocation7 + $0x10] sm:$0xff] }
 0x58d   :  { %v2090_v62 = vpack.c.bf16 %v1201_v60, %v1197_v59 }
 0x58f   :  { %2139 = vmatpush1.bf16.msra.mxu1 %v2138_v1  ;;  %v2154_v1 = vpack.c.bf16 %v1203_v0, %v1199_v29 }
 0x590   :  { %2141 = vmatprep.subr.bf16.mxu1 %v2140_v7  ;;  %v2092_v7 = vpack.c.bf16 %v1210_v5, %v1206_v20  ;;  %v1409_v20 = vld [vmem:[#allocation7 + $0x20] sm:$0xff] }
 0x593   :  { %2143 = vmatpush1.bf16.msra.mxu1 %v2142_v11  ;;  %v1207_v11 = vld [vmem:[#allocation6 + $0x390] sm:$0xff] }
 0x594   :  { %2145 = vmatprep.subr.bf16.mxu1 %v2144_v33 }
 0x597   :  { %2147 = vmatpush1.bf16.msra.mxu1 %v2146_v36 }
 0x598   :  { %2149 = vmatprep.subr.bf16.mxu1 %v2148_v49 }
 0x59b   :  { %2151 = vmatpush1.bf16.msra.mxu1 %v2150_v54  ;;  %v1405_v54 = vld [vmem:[#allocation7] sm:$0xff] }
 0x59c   :  { %2153 = vmatprep.subr.bf16.mxu1 %v2152_v61  ;;  %v2166_v60 = vpack.c.bf16 %v1407_v55, %v1405_v54  ;;  %v1437_v54 = vld [vmem:[#allocation7 + $0x100] sm:$0xff]  ;;  %v1439_v55 = vld [vmem:[#allocation7 + $0x110] sm:$0xff] }
 0x59f   :  { %2155 = vmatpush1.bf16.msra.mxu1 %v2154_v1  ;;  %v1411_v1 = vld [vmem:[#allocation7 + $0x30] sm:$0xff] }
 0x5a0   :  { %2157 = vmatprep.subr.bf16.mxu1 %v2156_v8  ;;  %v2172_v8 = vpack.c.bf16 %v1416_v63, %v1414_v6  ;;  %v1452_v6 = vld [vmem:[#allocation7 + $0x178] sm:$0xff] }
 0x5f6   :  { %v1032_v12 = vpop.xlane.xlu0 %1031 }
 0x5f7   :  { %v1037_v13 = vmul.f32 0.00390625, %v1032_v12  ;;  %v2094_v12 = vpack.c.bf16 %v1209_v10, %v1205_v9  ;;  %v1413_v9 = vld [vmem:[#allocation7 + $0x40] sm:$0xff]  ;;  %v1415_v10 = vld [vmem:[#allocation7 + $0x50] sm:$0xff] }
 0x5f9   :  { %v2643_v15 = vsub.f32 %v2625_v42, %v1037_v13  ;;  %v2646_v16 = vsub.f32 %v2630_v44, %v1037_v13  ;;  %v1211_v13 = vld [vmem:[#allocation6 + $0x3b0] sm:$0xff] }
 0x5fa   :  { %v1035_v17 = vpop.xlane.xlu1 %1034 }
 0x5fb   :  { %v1038_v18 = vmul.f32 0.00390625, %v1035_v17  ;;  %v1043_v19 = vmul.f32 %v2643_v15, %v2643_v15  ;;  %v1044_v21 = vmul.f32 %v2646_v16, %v2646_v16  ;;  %v1214_v17 = vld [vmem:[#allocation6 + $0x3c8] sm:$0xff] }
 0x5fd   :  { %v2653_v22 = vsub.f32 %v2635_v52, %v1038_v18  ;;  %v2656_v23 = vsub.f32 %v2638_v53, %v1038_v18  ;;  %v1047_v24 = vadd.f32 %v1044_v21, %v1043_v19  ;;  %v1181_v52 = vld [vmem:[#allocation6 + $0x2c0] sm:$0xff]  ;;  %v1218_v18 = vld [vmem:[#allocation6 + $0x3e8] sm:$0xff]  ;;  %v2158_v19 = vpack.c.bf16 %v1211_v13, %v1207_v11 }
 0x5fe   :  { %v2082_v53 = vpack.c.bf16 %v1185_v32, %v1181_v52  ;;  %v2096_v21 = vpack.c.bf16 %v1218_v18, %v1214_v17  ;;  %v1406_v52 = vld [vmem:[#allocation7 + $0x8] sm:$0xff]  ;;  %v1408_v32 = vld [vmem:[#allocation7 + $0x18] sm:$0xff]  ;;  %v2174_v13 = vpack.c.bf16 %v1415_v10, %v1413_v9  ;;  %v1417_v18 = vld [vmem:[#allocation7 + $0x60] sm:$0xff] }
 0x5ff   :  { %1048 = vadd.xlane.f32.xlu0 %v1047_v24  ;;  %v1045_v42 = vmul.f32 %v2653_v22, %v2653_v22  ;;  %v1046_v44 = vmul.f32 %v2656_v23, %v2656_v23  ;;  %v1216_v24 = vld [vmem:[#allocation6 + $0x3d8] sm:$0xff]  ;;  %2159 = vmatpush1.bf16.msra.mxu1 %v2158_v19  ;;  %v2164_v33 = vpack.c.bf16 %v1408_v32, %v1406_v52  ;;  %v1418_v11 = vld [vmem:[#allocation7 + $0x68] sm:$0xff]  ;;  %v1419_v19 = vld [vmem:[#allocation7 + $0x70] sm:$0xff] }
 0x600   :  { %2083 = vmatpush1.bf16.msra.mxu0 %v2082_v53  ;;  %v1425_v52 = vld [vmem:[#allocation7 + $0xa0] sm:$0xff]  ;;  %v1427_v32 = vld [vmem:[#allocation7 + $0xb0] sm:$0xff]  ;;  %v1454_v10 = vld [vmem:[#allocation7 + $0x188] sm:$0xff] }
 0x601   :  { %v1050_v25 = vadd.f32 %v1046_v44, %v1045_v42  ;;  %2085 = vmatprep.subr.bf16.mxu0 %v2084_v40  ;;  %v1220_v42 = vld [vmem:[#allocation6 + $0x3f8] sm:$0xff]  ;;  %v1213_v44 = vld [vmem:[#allocation6 + $0x3c0] sm:$0xff]  ;;  %v1451_v9 = vld [vmem:[#allocation7 + $0x170] sm:$0xff] }
 0x602   :  { %v2098_v30 = vpack.c.bf16 %v1217_v26, %v1213_v44  ;;  %v1029_v40 = vld [vmem:[%s2757_s6] sm:$0x3]  ;;  %v1423_v26 = vld [vmem:[#allocation7 + $0x90] sm:$0xff] }
 0x603   :  { %1051 = vadd.xlane.f32.xlu1 %v1050_v25  ;;  %v2160_v25 = vpack.c.bf16 %v1220_v42, %v1216_v24  ;;  %v1086_v51 = vrot.slane %v1029_v40, %v2592_v46  ;;  %v1424_v24 = vld [vmem:[#allocation7 + $0x98] sm:$0xff]  ;;  %v2178_v42 = vpack.c.bf16 %v1419_v19, %v1417_v18  ;;  %v1455_v18 = vld [vmem:[#allocation7 + $0x190] sm:$0xff]  ;;  %v1458_v19 = vld [vmem:[#allocation7 + $0x1a8] sm:$0xff] }
 0x604   :  { %2087 = vmatpush1.bf16.msra.mxu0 %v2086_v50  ;;  %v1082_v50 = vrot.slane %v1029_v40, %v2605_v4 }
 0x605   :  { %2089 = vmatprep.subr.bf16.mxu0 %v2088_v57  ;;  %2161 = vmatprep.subr.bf16.mxu1 %v2160_v25  ;;  %v1410_v57 = vld [vmem:[#allocation7 + $0x28] sm:$0xff]  ;;  %v1421_v25 = vld [vmem:[#allocation7 + $0x80] sm:$0xff] }
 0x606   :  { %2163 = vmatpush1.bf16.msra.mxu1 %v2162_v31  ;;  %v2168_v0 = vpack.c.bf16 %v1412_v58, %v1410_v57  ;;  %v2184_v31 = vpack.c.bf16 %v1428_v28, %v1426_v27  ;;  %v2198_v57 = vpack.c.bf16 %v1439_v55, %v1437_v54  ;;  %v1464_v27 = vld [vmem:[#allocation7 + $0x1d8] sm:$0xff]  ;;  %v1469_v55 = vld [vmem:[#allocation7 + $0x200] sm:$0xff] }
 0x608   :  { %2091 = vmatpush1.bf16.msra.mxu0 %v2090_v62 }
 0x609   :  { %2093 = vmatprep.subr.bf16.mxu0 %v2092_v7 }
 0x60c   :  { %2095 = vmatpush1.bf16.msra.mxu0 %v2094_v12  ;;  %v1420_v12 = vld [vmem:[#allocation7 + $0x78] sm:$0xff] }
 0x60d   :  { %2097 = vmatprep.subr.bf16.mxu0 %v2096_v21  ;;  %v2176_v17 = vpack.c.bf16 %v1420_v12, %v1418_v11  ;;  %v1422_v21 = vld [vmem:[#allocation7 + $0x88] sm:$0xff]  ;;  %v1456_v11 = vld [vmem:[#allocation7 + $0x198] sm:$0xff] }
 0x60e   :  { %v2180_v44 = vpack.c.bf16 %v1424_v24, %v1422_v21  ;;  %v1460_v21 = vld [vmem:[#allocation7 + $0x1b8] sm:$0xff] }
 0x610   :  { %2099 = vmatpush1.bf16.msra.mxu0 %v2098_v30  ;;  %v2182_v30 = vpack.c.bf16 %v1423_v26, %v1421_v25  ;;  %v1459_v25 = vld [vmem:[#allocation7 + $0x1b0] sm:$0xff]  ;;  %v1462_v26 = vld [vmem:[#allocation7 + $0x1c8] sm:$0xff] }
 0x611   :  { %2165 = vmatprep.subr.bf16.mxu0 %v2164_v33  ;;  %v1430_v33 = vld [vmem:[#allocation7 + $0xc8] sm:$0xff] }
 0x68c   :  { %v1049_v53 = vpop.xlane.xlu0 %1048 }
 0x68d   :  { %v1053_v34 = vmul.f32 0.00390625, %v1049_v53  ;;  %v1432_v53 = vld [vmem:[#allocation7 + $0xd8] sm:$0xff] }
 0x68f   :  { %v1055_v35 = vadd.f32 1e-05, %v1053_v34  ;;  %v2186_v34 = vpack.c.bf16 %v1427_v32, %v1425_v52  ;;  %v1463_v52 = vld [vmem:[#allocation7 + $0x1d0] sm:$0xff] }
 0x690   :  { %v1052_v36 = vpop.xlane.xlu1 %1051 }
 0x691   :  { %2319 = vrsqrt.f32 %v1055_v35  ;;  %v1054_v37 = vmul.f32 0.00390625, %v1052_v36  ;;  %v2188_v35 = vpack.c.bf16 %v1432_v53, %v1430_v33  ;;  %v1429_v36 = vld [vmem:[#allocation7 + $0xc0] sm:$0xff]  ;;  %v1466_v33 = vld [vmem:[#allocation7 + $0x1e8] sm:$0xff]  ;;  %v1468_v53 = vld [vmem:[#allocation7 + $0x1f8] sm:$0xff] }
 0x693   :  { %v1056_v38 = vadd.f32 1e-05, %v1054_v37  ;;  %v1431_v37 = vld [vmem:[#allocation7 + $0xd0] sm:$0xff] }
 0x694   :  { %v2190_v40 = vpack.c.bf16 %v1431_v37, %v1429_v36  ;;  %v1467_v36 = vld [vmem:[#allocation7 + $0x1f0] sm:$0xff] }
 0x695   :  { %2321 = vrsqrt.f32 %v1056_v38  ;;  %v1434_v38 = vld [vmem:[#allocation7 + $0xe8] sm:$0xff] }
 0x69b   :  { %v2320_v48 = vpop.eup %2319 }
 0x69c   :  { %v1060_v49 = vmul.f32 %v2320_v48, %v2646_v16  ;;  %v1059_v14 = vmul.f32 %v2320_v48, %v2643_v15  ;;  %v1435_v48 = vld [vmem:[#allocation7 + $0xf0] sm:$0xff] }
 0x69e   :  { %v1075_v56 = vmul.f32 %v1071_v47, %v1060_v49  ;;  %v1074_v41 = vmul.f32 %v1067_v43, %v1059_v14  ;;  %v1438_v49 = vld [vmem:[#allocation7 + $0x108] sm:$0xff] }
 0x69f   :  { %v2322_v59 = vpop.eup %2321 }
 0x6a0   :  { %v2674_v61 = vadd.f32 %v1086_v51, %v1075_v56  ;;  %v2676_v62 = vadd.f32 %v1082_v50, %v1074_v41  ;;  %v1062_v16 = vmul.f32 %v2322_v59, %v2656_v23  ;;  %v1061_v29 = vmul.f32 %v2322_v59, %v2653_v22  ;;  %v1442_v56 = vld [vmem:[#allocation7 + $0x128] sm:$0xff]  ;;  %v1444_v41 = vld [vmem:[#allocation7 + $0x138] sm:$0xff]  ;;  %v1441_v59 = vld [vmem:[#allocation7 + $0x120] sm:$0xff] }
 0x6a1   :  { %v2170_v22 = vpack.c.bf16 %v1411_v1, %v1409_v20  ;;  %v2200_v58 = vpack.c.bf16 %v1444_v41, %v1442_v56  ;;  %v1445_v1 = vld [vmem:[#allocation7 + $0x140] sm:$0xff]  ;;  %v1471_v56 = vld [vmem:[#allocation7 + $0x210] sm:$0xff] }
 0x6a2   :  { %1307 = vmatprep.mubr.f32.mxu0 %v2674_v61  ;;  %1384 = vmatprep.mubr.f32.mxu1 %v2674_v61  ;;  %v1077_v15 = vmul.f32 %v1071_v47, %v1062_v16  ;;  %v1076_v5 = vmul.f32 %v1067_v43, %v1061_v29  ;;  %v2192_v43 = vpack.c.bf16 %v1436_v39, %v1434_v38  ;;  %v1433_v47 = vld [vmem:[#allocation7 + $0xe0] sm:$0xff]  ;;  %v1446_v16 = vld [vmem:[#allocation7 + $0x148] sm:$0xff]  ;;  %v1448_v29 = vld [vmem:[#allocation7 + $0x158] sm:$0xff] }
 0x6a3   :  { %1308 = vmatmul.mubr.f32.vlgmr.msra.gmra.mrb[8].mxu0 %v2676_v62  ;;  %1385 = vmatmul.mubr.f32.vlgmr.msra.gmra.mrb[16].mxu1 %v2676_v62  ;;  %v2204_v20 = vpack.c.bf16 %v1448_v29, %v1446_v16  ;;  %v1470_v38 = vld [vmem:[#allocation7 + $0x208] sm:$0xff]  ;;  %v1472_v39 = vld [vmem:[#allocation7 + $0x218] sm:$0xff] }
 0x6a4   :  { %v2684_v7 = vadd.f32 %v1086_v51, %v1077_v15  ;;  %v2686_v23 = vadd.f32 %v1082_v50, %v1076_v5  ;;  %2167 = vmatpush1.bf16.msra.mxu0 %v2166_v60  ;;  %v1440_v50 = vld [vmem:[#allocation7 + $0x118] sm:$0xff]  ;;  %v2194_v51 = vpack.c.bf16 %v1435_v48, %v1433_v47  ;;  %v1443_v60 = vld [vmem:[#allocation7 + $0x130] sm:$0xff]  ;;  %v1450_v5 = vld [vmem:[#allocation7 + $0x168] sm:$0xff] }
 0x6a5   :  { %2169 = vmatprep.subr.bf16.mxu0 %v2168_v0  ;;  %v2196_v14 = vpack.c.bf16 %v1440_v50, %v1438_v49  ;;  %v2202_v0 = vpack.c.bf16 %v1443_v60, %v1441_v59  ;;  %v1447_v15 = vld [vmem:[#allocation7 + $0x150] sm:$0xff]  ;;  %v1476_v59 = vld [vmem:[#allocation7 + $0x238] sm:$0xff] }
 0x6a6   :  { %1313 = vmatprep.mubr.f32.mxu0 %v2684_v7  ;;  %1390 = vmatprep.mubr.f32.mxu1 %v2684_v7  ;;  %v2206_v63 = vpack.c.bf16 %v1447_v15, %v1445_v1 }
 0x6a7   :  { %1314 = vmatmul.mubr.f32.gmra.mrb[10].mxu0 %v2686_v23  ;;  %1391 = vmatmul.mubr.f32.gmra.mrb[18].mxu1 %v2686_v23 }
 0x6a8   :  { %2171 = vmatpush1.bf16.msra.mxu0 %v2170_v22  ;;  %v2208_v22 = vpack.c.bf16 %v1452_v6, %v1450_v5 }
 0x6a9   :  { %2173 = vmatprep.subr.bf16.mxu0 %v2172_v8  ;;  %v1449_v8 = vld [vmem:[#allocation7 + $0x160] sm:$0xff] }
 0x6aa   :  { %v2210_v12 = vpack.c.bf16 %v1451_v9, %v1449_v8 }
 0x6ac   :  { %2175 = vmatpush1.bf16.msra.mxu0 %v2174_v13  ;;  %v2212_v13 = vpack.c.bf16 %v1456_v11, %v1454_v10  ;;  %v1480_v10 = vld [vmem:[#allocation7 + $0x258] sm:$0xff] }
 0x6ad   :  { %2177 = vmatprep.subr.bf16.mxu0 %v2176_v17  ;;  %v1453_v17 = vld [vmem:[#allocation7 + $0x180] sm:$0xff] }
 0x6ae   :  { %v2214_v24 = vpack.c.bf16 %v1455_v18, %v1453_v17  ;;  %v1477_v18 = vld [vmem:[#allocation7 + $0x240] sm:$0xff] }
 0x6b0   :  { %2179 = vmatpush1.bf16.msra.mxu0 %v2178_v42  ;;  %v2216_v42 = vpack.c.bf16 %v1460_v21, %v1458_v19  ;;  %v1479_v19 = vld [vmem:[#allocation7 + $0x250] sm:$0xff] }
 0x6b1   :  { %2181 = vmatprep.subr.bf16.mxu0 %v2180_v44  ;;  %v1457_v44 = vld [vmem:[#allocation7 + $0x1a0] sm:$0xff] }
 0x6b2   :  { %v2218_v28 = vpack.c.bf16 %v1459_v25, %v1457_v44  ;;  %v2238_v44 = vpack.c.bf16 %v1479_v19, %v1477_v18  ;;  %v1514_v18 = vld [vmem:[#allocation7 + $0x368] sm:$0xff]  ;;  %v1516_v19 = vld [vmem:[#allocation7 + $0x378] sm:$0xff] }
 0x6b4   :  { %2183 = vmatpush1.bf16.msra.mxu0 %v2182_v30  ;;  %v2220_v30 = vpack.c.bf16 %v1464_v27, %v1462_v26  ;;  %v1481_v26 = vld [vmem:[#allocation7 + $0x260] sm:$0xff]  ;;  %v1483_v27 = vld [vmem:[#allocation7 + $0x270] sm:$0xff] }
 0x6b5   :  { %2185 = vmatprep.subr.bf16.mxu0 %v2184_v31  ;;  %v1461_v31 = vld [vmem:[#allocation7 + $0x1c0] sm:$0xff] }
 0x6b6   :  { %v2222_v32 = vpack.c.bf16 %v1463_v52, %v1461_v31  ;;  %v2242_v31 = vpack.c.bf16 %v1483_v27, %v1481_v26  ;;  %v1520_v26 = vld [vmem:[#allocation7 + $0x398] sm:$0xff] }
 0x6b8   :  { %2187 = vmatpush1.bf16.msra.mxu0 %v2186_v34  ;;  %v2224_v34 = vpack.c.bf16 %v1468_v53, %v1466_v33  ;;  %v1487_v33 = vld [vmem:[#allocation7 + $0x290] sm:$0xff]  ;;  %v1490_v53 = vld [vmem:[#allocation7 + $0x2a8] sm:$0xff] }
 0x6b9   :  { %2189 = vmatprep.subr.bf16.mxu0 %v2188_v35  ;;  %v1465_v35 = vld [vmem:[#allocation7 + $0x1e0] sm:$0xff] }
 0x6ba   :  { %v2226_v37 = vpack.c.bf16 %v1467_v36, %v1465_v35 }
 0x6bc   :  { %2191 = vmatpush1.bf16.msra.mxu0 %v2190_v40  ;;  %v2228_v40 = vpack.c.bf16 %v1472_v39, %v1470_v38  ;;  %v1491_v38 = vld [vmem:[#allocation7 + $0x2b0] sm:$0xff]  ;;  %v1494_v39 = vld [vmem:[#allocation7 + $0x2c8] sm:$0xff] }
 0x6bd   :  { %2193 = vmatprep.subr.bf16.mxu0 %v2192_v43  ;;  %v2695_v43 = vld [vmem:[%s2759_s8] sm:$0xf] }
 0x6be   :  { %v1226_v47 = vrot.slane %v2695_v43, %v2605_v4  ;;  %v1230_v48 = vrot.slane %v2695_v43, %v2592_v46 }
 0x6c0   :  { %2195 = vmatpush1.bf16.msra.mxu0 %v2194_v51 }
 0x6c1   :  { %2197 = vmatprep.subr.bf16.mxu0 %v2196_v14 }
 0x6c4   :  { %2199 = vmatpush1.bf16.msra.mxu0 %v2198_v57  ;;  %v2706_v57 = vrot.slane %v2695_v43, %v311_v2  ;;  %v1478_v2 = vld [vmem:[#allocation7 + $0x248] sm:$0xff] }
 0x6c5   :  { %2201 = vmatprep.subr.bf16.mxu0 %v2200_v58  ;;  %v1474_v58 = vld [vmem:[#allocation7 + $0x228] sm:$0xff]  ;;  %v2236_v17 = vpack.c.bf16 %v1480_v10, %v1478_v2  ;;  %v1512_v10 = vld [vmem:[#allocation7 + $0x358] sm:$0xff] }
 0x6c6   :  { %v2232_v6 = vpack.c.bf16 %v1476_v59, %v1474_v58  ;;  %v1499_v58 = vld [vmem:[#allocation7 + $0x2f0] sm:$0xff]  ;;  %v1502_v59 = vld [vmem:[#allocation7 + $0x308] sm:$0xff] }
 0x6c7   :  { %v1510_v2 = vld [vmem:[#allocation7 + $0x348] sm:$0xff] }
 0x6c8   :  { %2203 = vmatpush1.bf16.msra.mxu0 %v2202_v0  ;;  %v2230_v0 = vpack.c.bf16 %v1471_v56, %v1469_v55 }
 0x6c9   :  { %2205 = vmatprep.subr.bf16.mxu0 %v2204_v20 }
 0x6cc   :  { %2207 = vmatpush1.bf16.msra.mxu0 %v2206_v63  ;;  %v1473_v63 = vld [vmem:[#allocation7 + $0x220] sm:$0xff] }
 0x6cd   :  { %2209 = vmatprep.subr.bf16.mxu0 %v2208_v22  ;;  %v1475_v22 = vld [vmem:[#allocation7 + $0x230] sm:$0xff] }
 0x6d0   :  { %2211 = vmatpush1.bf16.msra.mxu0 %v2210_v12  ;;  %v2234_v12 = vpack.c.bf16 %v1475_v22, %v1473_v63 }
 0x6d1   :  { %2213 = vmatprep.subr.bf16.mxu0 %v2212_v13 }
 0x6d4   :  { %2215 = vmatpush1.bf16.msra.mxu0 %v2214_v24  ;;  %v1482_v24 = vld [vmem:[#allocation7 + $0x268] sm:$0xff] }
 0x6d5   :  { %2217 = vmatprep.subr.bf16.mxu0 %v2216_v42  ;;  %v1484_v42 = vld [vmem:[#allocation7 + $0x278] sm:$0xff] }
 0x6d6   :  { %v2240_v25 = vpack.c.bf16 %v1484_v42, %v1482_v24  ;;  %v2272_v24 = vpack.c.bf16 %v1516_v19, %v1514_v18  ;;  %v1513_v42 = vld [vmem:[#allocation7 + $0x360] sm:$0xff] }
 0x6d8   :  { %2219 = vmatpush1.bf16.msra.mxu0 %v2218_v28  ;;  %v1486_v28 = vld [vmem:[#allocation7 + $0x288] sm:$0xff] }
 0x6d9   :  { %2221 = vmatprep.subr.bf16.mxu0 %v2220_v30  ;;  %v1488_v30 = vld [vmem:[#allocation7 + $0x298] sm:$0xff] }
 0x6da   :  { %v2244_v52 = vpack.c.bf16 %v1488_v30, %v1486_v28  ;;  %v1517_v30 = vld [vmem:[#allocation7 + $0x380] sm:$0xff] }
 0x6dc   :  { %2223 = vmatpush1.bf16.msra.mxu0 %v2222_v32  ;;  %v1485_v32 = vld [vmem:[#allocation7 + $0x280] sm:$0xff] }
 0x6dd   :  { %2225 = vmatprep.subr.bf16.mxu0 %v2224_v34  ;;  %v1492_v34 = vld [vmem:[#allocation7 + $0x2b8] sm:$0xff]  ;;  %v2246_v35 = vpack.c.bf16 %v1487_v33, %v1485_v32 }
 0x6de   :  { %v2248_v36 = vpack.c.bf16 %v1492_v34, %v1490_v53  ;;  %v1524_v32 = vld [vmem:[#allocation7 + $0x3b8] sm:$0xff]  ;;  %v1521_v34 = vld [vmem:[#allocation7 + $0x3a0] sm:$0xff] }
 0x6e0   :  { %2227 = vmatpush1.bf16.msra.mxu0 %v2226_v37  ;;  %v1489_v37 = vld [vmem:[#allocation7 + $0x2a0] sm:$0xff] }
 0x6e1   :  { %2229 = vmatprep.subr.bf16.mxu0 %v2228_v40  ;;  %v1496_v40 = vld [vmem:[#allocation7 + $0x2d8] sm:$0xff] }
 0x776   :  { %v1309_v49 = vpop.f32.mrb[8].mxu0  ;;  %v2701_v50 = vpop.f32.mrb[16].mxu1 }
 0x777   :  { %v1310_v51 = vadd.f32 %v1309_v49, %v1226_v47  ;;  %v1311_v14 = vpop.f32.mrb[9].mxu0  ;;  %v1388_v54 = vpop.f32.mrb[17].mxu1  ;;  %v1493_v49 = vld [vmem:[#allocation7 + $0x2c0] sm:$0xff] }
 0x778   :  { %v1312_v41 = vadd.f32 %v1311_v14, %v1230_v48  ;;  %v1389_v8 = vadd.f32 %v1388_v54, %v2706_v57  ;;  %v1498_v14 = vld [vmem:[#allocation7 + $0x2e8] sm:$0xff]  ;;  %v1500_v54 = vld [vmem:[#allocation7 + $0x2f8] sm:$0xff] }
 0x779   :  { %v1397_v20 = vmax.f32 %v1310_v51, 0.0  ;;  %v1495_v51 = vld [vmem:[#allocation7 + $0x2d0] sm:$0xff]  ;;  %v2256_v56 = vpack.c.bf16 %v1500_v54, %v1498_v14  ;;  %v1234_v14 = vrot.slane %v2695_v43, %v307_v3  ;;  %v1533_v3 = vld [vmem:[%s2761_s10] sm:$0x3] }
 0x77a   :  { %v1398_v60 = vmax.f32 %v1312_v41, 0.0  ;;  %v1315_v16 = vpop.f32.mrb[10].mxu0  ;;  %v2708_v29 = vpop.f32.mrb[18].mxu1  ;;  %v1400_v21 = vmax.f32 %v1389_v8, 0.0  ;;  %v2254_v55 = vpack.c.bf16 %v1495_v51, %v1493_v49  ;;  %v1497_v41 = vld [vmem:[#allocation7 + $0x2e0] sm:$0xff]  ;;  %v1532_v49 = vld [vmem:[#allocation7 + $0x3f8] sm:$0xff]  ;;  %v1538_v43 = vrot.slane %v1533_v3, %v2605_v4 }
 0x77b   :  { %v1316_v1 = vadd.f32 %v1315_v16, %v1226_v47  ;;  %v1317_v15 = vpop.f32.mrb[11].mxu0  ;;  %v2710_v5 = vpop.f32.mrb[19].mxu1  ;;  %v2250_v47 = vpack.c.bf16 %v1491_v38, %v1489_v37  ;;  %v2258_v16 = vpack.c.bf16 %v1499_v58, %v1497_v41  ;;  %v1505_v8 = vld [vmem:[#allocation7 + $0x320] sm:$0xff]  ;;  %v1528_v37 = vld [vmem:[#allocation7 + $0x3d8] sm:$0xff]  ;;  %v1387_v58 = vadd.f32 %v2701_v50, %v1234_v14 }
 0x77c   :  { %v1318_v9 = vadd.f32 %v1317_v15, %v1230_v48  ;;  %1609 = vmatprep.mubr.f32.mxu0 %v1398_v60  ;;  %v2252_v48 = vpack.c.bf16 %v1496_v40, %v1494_v39  ;;  %v1504_v60 = vld [vmem:[#allocation7 + $0x318] sm:$0xff]  ;;  %v1506_v15 = vld [vmem:[#allocation7 + $0x328] sm:$0xff]  ;;  %v1525_v40 = vld [vmem:[#allocation7 + $0x3c0] sm:$0xff]  ;;  %v1542_v50 = vrot.slane %v1533_v3, %v2592_v46 }
 0x77d   :  { %1610 = vmatmul.mubr.f32.vlgmr.msra.gmra.mrb[12].mxu0 %v1397_v20  ;;  %v1401_v13 = vmax.f32 %v1316_v1, 0.0  ;;  %v1501_v20 = vld [vmem:[#allocation7 + $0x300] sm:$0xff]  ;;  %v1503_v1 = vld [vmem:[#allocation7 + $0x310] sm:$0xff] }
 0x77e   :  { %v1402_v11 = vmax.f32 %v1318_v9, 0.0  ;;  %2231 = vmatpush1.bf16.msra.mxu0 %v2230_v0  ;;  %v2260_v0 = vpack.c.bf16 %v1504_v60, %v1502_v59  ;;  %v2262_v63 = vpack.c.bf16 %v1503_v1, %v1501_v20  ;;  %v1507_v9 = vld [vmem:[#allocation7 + $0x330] sm:$0xff]  ;;  %v1395_v59 = vadd.f32 %v2710_v5, %v2706_v57 }
 0x77f   :  { %2233 = vmatprep.subr.bf16.mxu0 %v2232_v6  ;;  %v1508_v6 = vld [vmem:[#allocation7 + $0x338] sm:$0xff]  ;;  %v1399_v60 = vmax.f32 %v1387_v58, 0.0 }
 0x780   :  { %1615 = vmatprep.mubr.f32.mxu0 %v1402_v11  ;;  %v2264_v22 = vpack.c.bf16 %v1508_v6, %v1506_v15  ;;  %v2266_v11 = vpack.c.bf16 %v1507_v9, %v1505_v8 }
 0x781   :  { %1616 = vmatmul.mubr.f32.gmra.mrb[14].mxu0 %v1401_v13  ;;  %v1509_v13 = vld [vmem:[#allocation7 + $0x340] sm:$0xff] }
 0x782   :  { %2235 = vmatpush1.bf16.msra.mxu0 %v2234_v12  ;;  %1686 = vmatprep.mubr.f32.mxu0 %v1400_v21  ;;  %v2268_v12 = vpack.c.bf16 %v1512_v10, %v1510_v2 }
 0x783   :  { %2237 = vmatprep.subr.bf16.mxu0 %v2236_v17  ;;  %v1511_v17 = vld [vmem:[#allocation7 + $0x350] sm:$0xff] }
 0x784   :  { %v2270_v21 = vpack.c.bf16 %v1511_v17, %v1509_v13 }
 0x786   :  { %2239 = vmatpush1.bf16.msra.mxu0 %v2238_v44  ;;  %v1515_v44 = vld [vmem:[#allocation7 + $0x370] sm:$0xff] }
 0x787   :  { %2241 = vmatprep.subr.bf16.mxu0 %v2240_v25  ;;  %v1518_v25 = vld [vmem:[#allocation7 + $0x388] sm:$0xff]  ;;  %v2274_v27 = vpack.c.bf16 %v1515_v44, %v1513_v42 }
 0x788   :  { %v2276_v28 = vpack.c.bf16 %v1520_v26, %v1518_v25 }
 0x78a   :  { %2243 = vmatpush1.bf16.msra.mxu0 %v2242_v31  ;;  %v1519_v31 = vld [vmem:[#allocation7 + $0x390] sm:$0xff] }
 0x78b   :  { %2245 = vmatprep.subr.bf16.mxu0 %v2244_v52  ;;  %v1522_v52 = vld [vmem:[#allocation7 + $0x3a8] sm:$0xff]  ;;  %v2278_v33 = vpack.c.bf16 %v1519_v31, %v1517_v30 }
 0x78c   :  { %v2280_v53 = vpack.c.bf16 %v1524_v32, %v1522_v52  ;;  %v1703_v32 = vld [vmem:[%s2762_s11] sm:$0x3] }
 0x78e   :  { %2247 = vmatpush1.bf16.msra.mxu0 %v2246_v35  ;;  %v1523_v35 = vld [vmem:[#allocation7 + $0x3b0] sm:$0xff] }
 0x78f   :  { %2249 = vmatprep.subr.bf16.mxu0 %v2248_v36  ;;  %v1526_v36 = vld [vmem:[#allocation7 + $0x3c8] sm:$0xff]  ;;  %v2282_v38 = vpack.c.bf16 %v1523_v35, %v1521_v34  ;;  %v1745_v34 = vrot.slane %v1703_v32, %v2592_v46 }
 0x790   :  { %v2284_v39 = vpack.c.bf16 %v1528_v37, %v1526_v36 }
 0x792   :  { %2251 = vmatpush1.bf16.msra.mxu0 %v2250_v47  ;;  %v1527_v47 = vld [vmem:[#allocation7 + $0x3d0] sm:$0xff] }
 0x793   :  { %2253 = vmatprep.subr.bf16.mxu0 %v2252_v48  ;;  %v1530_v48 = vld [vmem:[#allocation7 + $0x3e8] sm:$0xff]  ;;  %v2286_v51 = vpack.c.bf16 %v1527_v47, %v1525_v40 }
 0x794   :  { %v2288_v54 = vpack.c.bf16 %v1532_v49, %v1530_v48 }
 0x796   :  { %2255 = vmatpush1.bf16.msra.mxu0 %v2254_v55  ;;  %v1529_v55 = vld [vmem:[#allocation7 + $0x3e0] sm:$0xff] }
 0x797   :  { %2257 = vmatprep.subr.bf16.mxu0 %v2256_v56  ;;  %v1531_v56 = vld [vmem:[#allocation7 + $0x3f0] sm:$0xff] }
 0x798   :  { %v2290_v41 = vpack.c.bf16 %v1531_v56, %v1529_v55 }
 0x79a   :  { %2259 = vmatpush1.bf16.msra.mxu0 %v2258_v16  ;;  %v1393_v16 = vadd.f32 %v2708_v29, %v1234_v14 }
 0x79b   :  { %2261 = vmatprep.subr.bf16.mxu0 %v2260_v0  ;;  %v1404_v0 = vmax.f32 %v1395_v59, 0.0 }
 0x79c   :  { %v1403_v45 = vmax.f32 %v1393_v16, 0.0 }
 0x79e   :  { %2263 = vmatpush1.bf16.msra.mxu0 %v2262_v63 }
 0x79f   :  { %2265 = vmatprep.subr.bf16.mxu0 %v2264_v22 }
 0x7a2   :  { %2267 = vmatpush1.bf16.msra.mxu0 %v2266_v11 }
 0x7a3   :  { %2269 = vmatprep.subr.bf16.mxu0 %v2268_v12 }
 0x7a6   :  { %2271 = vmatpush1.bf16.msra.mxu0 %v2270_v21 }
 0x7a7   :  { %2273 = vmatprep.subr.bf16.mxu0 %v2272_v24 }
 0x7aa   :  { %2275 = vmatpush1.bf16.msra.mxu0 %v2274_v27 }
 0x7ab   :  { %2277 = vmatprep.subr.bf16.mxu0 %v2276_v28 }
 0x7ae   :  { %2279 = vmatpush1.bf16.msra.mxu0 %v2278_v33  ;;  %v1704_v33 = vld [vmem:[%s2763_s12] sm:$0x3] }
 0x7af   :  { %2281 = vmatprep.subr.bf16.mxu0 %v2280_v53  ;;  %v1741_v53 = vrot.slane %v1703_v32, %v2605_v4  ;;  %v1756_v36 = vrot.slane %v1704_v33, %v2605_v4  ;;  %v1760_v37 = vrot.slane %v1704_v33, %v2592_v46 }
 0x7b2   :  { %2283 = vmatpush1.bf16.msra.mxu0 %v2282_v38 }
 0x7b3   :  { %2285 = vmatprep.subr.bf16.mxu0 %v2284_v39 }
 0x7b6   :  { %2287 = vmatpush1.bf16.msra.mxu0 %v2286_v51 }
 0x7b7   :  { %2289 = vmatprep.subr.bf16.mxu0 %v2288_v54 }
 0x7ba   :  { %2291 = vmatpush1.bf16.msra.mxu0 %v2290_v41 }
 0x7bd   :  { %1687 = vmatmul.mubr.f32.vlgmr.msra.gmra.mrb[12].mxu0 %v1399_v60 }
 0x7be   :  { %1692 = vmatprep.mubr.f32.mxu0 %v1404_v0 }
 0x7c1   :  { %1693 = vmatmul.mubr.f32.gmra.mrb[14].mxu0 %v1403_v45 }
 0x890   :  { %v1688_v20 = vpop.f32.mrb[12].mxu0 }
 0x891   :  { %v2292_v1 = vadd.f32 %v1688_v20, %v1538_v43  ;;  %v1690_v57 = vpop.f32.mrb[13].mxu0 }
 0x892   :  { %v2293_v5 = vadd.f32 %v1690_v57, %v1542_v50 }
 0x893   :  { %v1699_v15 = vadd.f32 %v2292_v1, %v2676_v62 }
 0x894   :  { %v1700_v29 = vadd.f32 %v2293_v5, %v2674_v61  ;;  %v1694_v6 = vpop.f32.mrb[14].mxu0 }
 0x895   :  { %v2294_v63 = vadd.f32 %v1694_v6, %v1538_v43  ;;  %v1696_v22 = vpop.f32.mrb[15].mxu0 }
 0x896   :  { %v2295_v8 = vadd.f32 %v1696_v22, %v1542_v50  ;;  %v1705_v9 = vadd.f32 %v1700_v29, %v1699_v15 }
 0x897   :  { %v1701_v2 = vadd.f32 %v2294_v63, %v2686_v23 }
 0x898   :  { %v1702_v10 = vadd.f32 %v2295_v8, %v2684_v7  ;;  %1706 = vadd.xlane.f32.xlu0 %v1705_v9 }
 0x89a   :  { %v1708_v11 = vadd.f32 %v1702_v10, %v1701_v2 }
 0x89c   :  { %1709 = vadd.xlane.f32.xlu1 %v1708_v11 }
 0x925   :  { %v1707_v12 = vpop.xlane.xlu0 %1706 }
 0x926   :  { %v1711_v13 = vmul.f32 0.00390625, %v1707_v12 }
 0x928   :  { %v1713_v17 = vsub.f32 %v1699_v15, %v1711_v13  ;;  %v1714_v18 = vsub.f32 %v1700_v29, %v1711_v13 }
 0x929   :  { %v1710_v19 = vpop.xlane.xlu1 %1709 }
 0x92a   :  { %v1712_v62 = vmul.f32 0.00390625, %v1710_v19  ;;  %v1717_v21 = vmul.f32 %v1713_v17, %v1713_v17  ;;  %v1718_v61 = vmul.f32 %v1714_v18, %v1714_v18 }
 0x92c   :  { %v1715_v24 = vsub.f32 %v1701_v2, %v1712_v62  ;;  %v1716_v42 = vsub.f32 %v1702_v10, %v1712_v62  ;;  %v1721_v44 = vadd.f32 %v1718_v61, %v1717_v21 }
 0x92e   :  { %1722 = vadd.xlane.f32.xlu0 %v1721_v44  ;;  %v1719_v25 = vmul.f32 %v1715_v24, %v1715_v24  ;;  %v1720_v26 = vmul.f32 %v1716_v42, %v1716_v42 }
 0x930   :  { %v1724_v23 = vadd.f32 %v1720_v26, %v1719_v25 }
 0x932   :  { %1725 = vadd.xlane.f32.xlu1 %v1724_v23 }
 0x9bb   :  { %v1723_v7 = vpop.xlane.xlu0 %1722 }
 0x9bc   :  { %v1727_v27 = vmul.f32 0.00390625, %v1723_v7 }
 0x9be   :  { %v1729_v28 = vadd.f32 1e-05, %v1727_v27 }
 0x9bf   :  { %v1726_v30 = vpop.xlane.xlu1 %1725 }
 0x9c0   :  { %2323 = vrsqrt.f32 %v1729_v28  ;;  %v1728_v31 = vmul.f32 0.00390625, %v1726_v30 }
 0x9c2   :  { %v1730_v52 = vadd.f32 1e-05, %v1728_v31 }
 0x9c4   :  { %2325 = vrsqrt.f32 %v1730_v52 }
 0x9ca   :  { %v2324_v35 = vpop.eup %2323 }
 0x9cb   :  { %v1733_v38 = vmul.f32 %v2324_v35, %v1713_v17  ;;  %v1734_v39 = vmul.f32 %v2324_v35, %v1714_v18 }
 0x9cd   :  { %v1748_v40 = vmul.f32 %v1741_v53, %v1733_v38  ;;  %v1749_v47 = vmul.f32 %v1745_v34, %v1734_v39 }
 0x9ce   :  { %v2326_v48 = vpop.eup %2325 }
 0x9cf   :  { %v1763_v49 = vadd.f32 %v1756_v36, %v1748_v40  ;;  %v1764_v51 = vadd.f32 %v1760_v37, %v1749_v47  ;;  %v1735_v14 = vmul.f32 %v2326_v48, %v1715_v24  ;;  %v1736_v54 = vmul.f32 %v2326_v48, %v1716_v42 }
 0x9d1   :  { %1767 = vst [vmem:[%s2764_s13] sm:$0xff] %v1763_v49  ;;  %1768 = vst [vmem:[%s2764_s13 + $0x8] sm:$0xff] %v1764_v51  ;;  %v1750_v4 = vmul.f32 %v1741_v53, %v1735_v14  ;;  %v1751_v55 = vmul.f32 %v1745_v34, %v1736_v54 }
 0x9d3   :  { %v1765_v46 = vadd.f32 %v1756_v36, %v1750_v4  ;;  %v1766_v56 = vadd.f32 %v1760_v37, %v1751_v55 }
 0x9d5   :  { %1769 = vst [vmem:[%s2764_s13 + $0x10] sm:$0xff] %v1765_v46  ;;  %1770 = vst [vmem:[%s2764_s13 + $0x18] sm:$0xff] %v1766_v56 }
 0x9d6   :  { %1775 = vsyncpa [#allocation3], 1 }
 0x9d7   :  { %1776 = vsyncpa [#allocation5], 1 }
 0x9d8   :  { %1777 = vsyncpa [#allocation8], 1 }

// kernel: vae_forward.5
= control target key start
LH: loop header
LB: loop body
LE: loop exit
PB: predicated region body
PF: predicated region fallthrough
CT: control target
= control target key end

     0   :  { %vm645_vm0 = vcmask 64512   ;;  %s4061_s1 = inlined_call_operand.vmem [shape: f32[256,768], index: 1, kind: input, shape index: {}]   ;;  %s4062_s0 = inlined_call_operand.vmem [shape: f32[16,256], index: 0, kind: input, shape index: {}]   ;;  %s4063_s2 = inlined_call_operand.vmem [shape: f32[1,768], index: 2, kind: input, shape index: {}]   ;;  %s4064_s3 = inlined_call_operand.vmem [shape: f32[256,256], index: 3, kind: input, shape index: {}]   ;;  %s4065_s4 = inlined_call_operand.vmem [shape: f32[1,256], index: 4, kind: input, shape index: {}]   ;;  %s4066_s7 = inlined_call_operand.vmem [shape: f32[256,512], index: 7, kind: input, shape index: {}]   ;;  %s4067_s9 = inlined_call_operand.vmem [shape: f32[512,256], index: 9, kind: input, shape index: {}]   ;;  %s4068_s5 = inlined_call_operand.vmem [shape: f32[1,256], index: 5, kind: input, shape index: {}]   ;;  %s4069_s6 = inlined_call_operand.vmem [shape: f32[1,256], index: 6, kind: input, shape index: {}]   ;;  %s4070_s8 = inlined_call_operand.vmem [shape: f32[1,512], index: 8, kind: input, shape index: {}]   ;;  %s4071_s10 = inlined_call_operand.vmem [shape: f32[1,256], index: 10, kind: input, shape index: {}]   ;;  %s4072_s11 = inlined_call_operand.vmem [shape: f32[1,256], index: 11, kind: input, shape index: {}]   ;;  %s4073_s12 = inlined_call_operand.vmem [shape: f32[1,256], index: 12, kind: input, shape index: {}]   ;;  %s4074_s13 = inlined_call_operand.vmem [shape: f32[16,256], index: 13, kind: output, shape index: {}]  }
   0x1   :  { %v49_v0 = vld [vmem:[%s4061_s1 + $0x8] sm:$0xff]  ;;  %v55_v1 = vld [vmem:[%s4061_s1 + $0x38] sm:$0xff]  ;;  %v48_v2 = vld [vmem:[%s4061_s1] sm:$0xff] }
   0x2   :  { %v1722_v3 = vpack.c.bf16 %v55_v1, %v49_v0  ;;  %v54_v4 = vld [vmem:[%s4061_s1 + $0x30] sm:$0xff]  ;;  %v61_v5 = vld [vmem:[%s4061_s1 + $0x68] sm:$0xff]  ;;  %v67_v6 = vld [vmem:[%s4061_s1 + $0x98] sm:$0xff] }
   0x3   :  { %v1724_v7 = vpack.c.bf16 %v54_v4, %v48_v2  ;;  %v1726_v8 = vpack.c.bf16 %v67_v6, %v61_v5  ;;  %v60_v9 = vld [vmem:[%s4061_s1 + $0x60] sm:$0xff]  ;;  %v66_v10 = vld [vmem:[%s4061_s1 + $0x90] sm:$0xff]  ;;  %v73_v11 = vld [vmem:[%s4061_s1 + $0xc8] sm:$0xff] }
   0x4   :  { %1723 = vmatprep.subr.bf16.mxu1 %v1722_v3  ;;  %v79_v12 = vld [vmem:[%s4061_s1 + $0xf8] sm:$0xff]  ;;  %v1728_v13 = vpack.c.bf16 %v66_v10, %v60_v9  ;;  %v72_v15 = vld [vmem:[%s4061_s1 + $0xc0] sm:$0xff]  ;;  %v78_v16 = vld [vmem:[%s4061_s1 + $0xf0] sm:$0xff] }
   0x5   :  { %1725 = vmatpush1.bf16.msra.mxu1 %v1724_v7  ;;  %v1730_v14 = vpack.c.bf16 %v79_v12, %v73_v11  ;;  %v85_v17 = vld [vmem:[%s4061_s1 + $0x128] sm:$0xff]  ;;  %v91_v18 = vld [vmem:[%s4061_s1 + $0x158] sm:$0xff]  ;;  %v1732_v19 = vpack.c.bf16 %v78_v16, %v72_v15  ;;  %v84_v21 = vld [vmem:[%s4061_s1 + $0x120] sm:$0xff] }
   0x6   :  { %1727 = vmatprep.subr.bf16.mxu1 %v1726_v8  ;;  %v1734_v20 = vpack.c.bf16 %v91_v18, %v85_v17  ;;  %v90_v22 = vld [vmem:[%s4061_s1 + $0x150] sm:$0xff]  ;;  %v97_v23 = vld [vmem:[%s4061_s1 + $0x188] sm:$0xff]  ;;  %v103_v24 = vld [vmem:[%s4061_s1 + $0x1b8] sm:$0xff] }
   0x7   :  { %v1736_v25 = vpack.c.bf16 %v90_v22, %v84_v21  ;;  %v1738_v26 = vpack.c.bf16 %v103_v24, %v97_v23  ;;  %v96_v27 = vld [vmem:[%s4061_s1 + $0x180] sm:$0xff]  ;;  %v102_v28 = vld [vmem:[%s4061_s1 + $0x1b0] sm:$0xff]  ;;  %v109_v29 = vld [vmem:[%s4061_s1 + $0x1e8] sm:$0xff] }
   0x8   :  { %v115_v30 = vld [vmem:[%s4061_s1 + $0x218] sm:$0xff]  ;;  %v1740_v31 = vpack.c.bf16 %v102_v28, %v96_v27  ;;  %v108_v33 = vld [vmem:[%s4061_s1 + $0x1e0] sm:$0xff]  ;;  %v114_v34 = vld [vmem:[%s4061_s1 + $0x210] sm:$0xff] }
   0x9   :  { %1729 = vmatpush1.bf16.msra.mxu1 %v1728_v13  ;;  %v1742_v32 = vpack.c.bf16 %v115_v30, %v109_v29  ;;  %v121_v35 = vld [vmem:[%s4061_s1 + $0x248] sm:$0xff]  ;;  %v127_v36 = vld [vmem:[%s4061_s1 + $0x278] sm:$0xff]  ;;  %v1744_v37 = vpack.c.bf16 %v114_v34, %v108_v33  ;;  %v120_v39 = vld [vmem:[%s4061_s1 + $0x240] sm:$0xff] }
   0xa   :  { %1731 = vmatprep.subr.bf16.mxu1 %v1730_v14  ;;  %v1746_v38 = vpack.c.bf16 %v127_v36, %v121_v35  ;;  %v126_v40 = vld [vmem:[%s4061_s1 + $0x270] sm:$0xff]  ;;  %v2418_v41 = vld [vmem:[%s4062_s0 + $0x8] sm:$0xff]  ;;  %v139_v43 = vld [vmem:[%s4061_s1 + $0x2d8] sm:$0xff] }
   0xb   :  { %v133_v42 = vld [vmem:[%s4061_s1 + $0x2a8] sm:$0xff]  ;;  %336 = vmatprep.mubr.f32.mxu1 %v2418_v41  ;;  %490 = vmatprep.mubr.f32.mxu0 %v2418_v41  ;;  %v1748_v44 = vpack.c.bf16 %v126_v40, %v120_v39  ;;  %v132_v46 = vld [vmem:[%s4061_s1 + $0x2a0] sm:$0xff]  ;;  %v138_v47 = vld [vmem:[%s4061_s1 + $0x2d0] sm:$0xff] }
   0xc   :  { %v1750_v45 = vpack.c.bf16 %v139_v43, %v133_v42  ;;  %v145_v48 = vld [vmem:[%s4061_s1 + $0x308] sm:$0xff]  ;;  %v151_v49 = vld [vmem:[%s4061_s1 + $0x338] sm:$0xff]  ;;  %v1752_v50 = vpack.c.bf16 %v138_v47, %v132_v46  ;;  %v144_v52 = vld [vmem:[%s4061_s1 + $0x300] sm:$0xff] }
   0xd   :  { %1733 = vmatpush1.bf16.msra.mxu1 %v1732_v19  ;;  %v1754_v51 = vpack.c.bf16 %v151_v49, %v145_v48  ;;  %v150_v53 = vld [vmem:[%s4061_s1 + $0x330] sm:$0xff]  ;;  %v157_v54 = vld [vmem:[%s4061_s1 + $0x368] sm:$0xff]  ;;  %v163_v55 = vld [vmem:[%s4061_s1 + $0x398] sm:$0xff] }
   0xe   :  { %1735 = vmatprep.subr.bf16.mxu1 %v1734_v20  ;;  %v1756_v56 = vpack.c.bf16 %v150_v53, %v144_v52  ;;  %v1758_v57 = vpack.c.bf16 %v163_v55, %v157_v54  ;;  %v156_v58 = vld [vmem:[%s4061_s1 + $0x360] sm:$0xff]  ;;  %v162_v59 = vld [vmem:[%s4061_s1 + $0x390] sm:$0xff]  ;;  %v169_v60 = vld [vmem:[%s4061_s1 + $0x3c8] sm:$0xff] }
   0xf   :  { %v175_v61 = vld [vmem:[%s4061_s1 + $0x3f8] sm:$0xff]  ;;  %v1760_v62 = vpack.c.bf16 %v162_v59, %v156_v58  ;;  %v168_v0 = vld [vmem:[%s4061_s1 + $0x3c0] sm:$0xff]  ;;  %v174_v1 = vld [vmem:[%s4061_s1 + $0x3f0] sm:$0xff] }
  0x10   :  { %v1762_v63 = vpack.c.bf16 %v175_v61, %v169_v60  ;;  %v181_v2 = vld [vmem:[%s4061_s1 + $0x428] sm:$0xff]  ;;  %v187_v3 = vld [vmem:[%s4061_s1 + $0x458] sm:$0xff]  ;;  %v1764_v4 = vpack.c.bf16 %v174_v1, %v168_v0  ;;  %v180_v6 = vld [vmem:[%s4061_s1 + $0x420] sm:$0xff] }
  0x11   :  { %1737 = vmatpush1.bf16.msra.mxu1 %v1736_v25  ;;  %v1766_v5 = vpack.c.bf16 %v187_v3, %v181_v2  ;;  %v186_v7 = vld [vmem:[%s4061_s1 + $0x450] sm:$0xff]  ;;  %v193_v8 = vld [vmem:[%s4061_s1 + $0x488] sm:$0xff]  ;;  %v199_v9 = vld [vmem:[%s4061_s1 + $0x4b8] sm:$0xff] }
  0x12   :  { %1739 = vmatprep.subr.bf16.mxu1 %v1738_v26  ;;  %v192_v10 = vld [vmem:[%s4061_s1 + $0x480] sm:$0xff]  ;;  %v198_v11 = vld [vmem:[%s4061_s1 + $0x4b0] sm:$0xff]  ;;  %v1768_v12 = vpack.c.bf16 %v186_v7, %v180_v6  ;;  %v205_v13 = vld [vmem:[%s4061_s1 + $0x4e8] sm:$0xff]  ;;  %v1770_v18 = vpack.c.bf16 %v199_v9, %v193_v8 }
  0x13   :  { %v211_v14 = vld [vmem:[%s4061_s1 + $0x518] sm:$0xff]  ;;  %v53_v15 = vld [vmem:[%s4061_s1 + $0x28] sm:$0xff]  ;;  %v52_v17 = vld [vmem:[%s4061_s1 + $0x20] sm:$0xff]  ;;  %v1772_v29 = vpack.c.bf16 %v198_v11, %v192_v10 }
  0x14   :  { %v59_v16 = vld [vmem:[%s4061_s1 + $0x58] sm:$0xff]  ;;  %v58_v20 = vld [vmem:[%s4061_s1 + $0x50] sm:$0xff]  ;;  %v65_v21 = vld [vmem:[%s4061_s1 + $0x88] sm:$0xff]  ;;  %v1774_v33 = vpack.c.bf16 %v211_v14, %v205_v13 }
  0x15   :  { %1741 = vmatpush1.bf16.msra.mxu1 %v1740_v31  ;;  %v1850_v19 = vpack.c.bf16 %v59_v16, %v53_v15  ;;  %v71_v22 = vld [vmem:[%s4061_s1 + $0xb8] sm:$0xff]  ;;  %v1852_v23 = vpack.c.bf16 %v58_v20, %v52_v17  ;;  %v64_v25 = vld [vmem:[%s4061_s1 + $0x80] sm:$0xff]  ;;  %v70_v26 = vld [vmem:[%s4061_s1 + $0xb0] sm:$0xff] }
  0x16   :  { %1743 = vmatprep.subr.bf16.mxu1 %v1742_v32  ;;  %v1854_v24 = vpack.c.bf16 %v71_v22, %v65_v21  ;;  %v77_v27 = vld [vmem:[%s4061_s1 + $0xe8] sm:$0xff]  ;;  %v83_v28 = vld [vmem:[%s4061_s1 + $0x118] sm:$0xff]  ;;  %v204_v30 = vld [vmem:[%s4061_s1 + $0x4e0] sm:$0xff]  ;;  %v1856_v32 = vpack.c.bf16 %v70_v26, %v64_v25 }
  0x17   :  { %1851 = vmatprep.subr.bf16.mxu0 %v1850_v19  ;;  %v210_v31 = vld [vmem:[%s4061_s1 + $0x510] sm:$0xff]  ;;  %v217_v34 = vld [vmem:[%s4061_s1 + $0x548] sm:$0xff]  ;;  %v1858_v35 = vpack.c.bf16 %v83_v28, %v77_v27  ;;  %v76_v36 = vld [vmem:[%s4061_s1 + $0xe0] sm:$0xff] }
  0x18   :  { %1853 = vmatpush1.bf16.msra.mxu0 %v1852_v23  ;;  %v89_v39 = vld [vmem:[%s4061_s1 + $0x148] sm:$0xff]  ;;  %v95_v40 = vld [vmem:[%s4061_s1 + $0x178] sm:$0xff]  ;;  %v1776_v42 = vpack.c.bf16 %v210_v31, %v204_v30  ;;  %v216_v43 = vld [vmem:[%s4061_s1 + $0x540] sm:$0xff] }
  0x19   :  { %1745 = vmatpush1.bf16.msra.mxu1 %v1744_v37  ;;  %1855 = vmatprep.subr.bf16.mxu0 %v1854_v24  ;;  %v82_v37 = vld [vmem:[%s4061_s1 + $0x110] sm:$0xff]  ;;  %v229_v47 = vld [vmem:[%s4061_s1 + $0x5a8] sm:$0xff]  ;;  %v1862_v48 = vpack.c.bf16 %v95_v40, %v89_v39  ;;  %v88_v49 = vld [vmem:[%s4061_s1 + $0x140] sm:$0xff] }
  0x1a   :  { %1747 = vmatprep.subr.bf16.mxu1 %v1746_v38  ;;  %v223_v38 = vld [vmem:[%s4061_s1 + $0x578] sm:$0xff]  ;;  %v101_v52 = vld [vmem:[%s4061_s1 + $0x1a8] sm:$0xff]  ;;  %v228_v55 = vld [vmem:[%s4061_s1 + $0x5a0] sm:$0xff] }
  0x1b   :  { %v1778_v46 = vpack.c.bf16 %v223_v38, %v217_v34  ;;  %v107_v53 = vld [vmem:[%s4061_s1 + $0x1d8] sm:$0xff]  ;;  %v100_v61 = vld [vmem:[%s4061_s1 + $0x1a0] sm:$0xff]  ;;  %v113_v0 = vld [vmem:[%s4061_s1 + $0x208] sm:$0xff] }
  0x1c   :  { %1857 = vmatpush1.bf16.msra.mxu0 %v1856_v32  ;;  %v51_v59 = vld [vmem:[%s4061_s1 + $0x18] sm:$0xff]  ;;  %v1866_v60 = vpack.c.bf16 %v107_v53, %v101_v52  ;;  %v56_v6 = vld [vmem:[%s4061_s1 + $0x40] sm:$0xff]  ;;  %v69_v9 = vld [vmem:[%s4061_s1 + $0xa8] sm:$0xff] }
  0x1d   :  { %1749 = vmatpush1.bf16.msra.mxu1 %v1748_v44  ;;  %v222_v44 = vld [vmem:[%s4061_s1 + $0x570] sm:$0xff]  ;;  %1859 = vmatprep.subr.bf16.mxu0 %v1858_v35  ;;  %v119_v1 = vld [vmem:[%s4061_s1 + $0x238] sm:$0xff]  ;;  %v112_v10 = vld [vmem:[%s4061_s1 + $0x200] sm:$0xff] }
  0x1e   :  { %1751 = vmatprep.subr.bf16.mxu1 %v1750_v45  ;;  %v1860_v45 = vpack.c.bf16 %v82_v37, %v76_v36  ;;  %v1780_v54 = vpack.c.bf16 %v222_v44, %v216_v43  ;;  %v63_v7 = vld [vmem:[%s4061_s1 + $0x78] sm:$0xff]  ;;  %v1870_v8 = vpack.c.bf16 %v119_v1, %v113_v0  ;;  %v118_v11 = vld [vmem:[%s4061_s1 + $0x230] sm:$0xff]  ;;  %v2629_v14 = vld [vmem:[%s4062_s0] sm:$0xff] }
  0x1f   :  { %v131_v13 = vld [vmem:[%s4061_s1 + $0x298] sm:$0xff]  ;;  %v62_v16 = vld [vmem:[%s4061_s1 + $0x70] sm:$0xff]  ;;  %v1790_v17 = vpack.c.bf16 %v69_v9, %v63_v7  ;;  %v1872_v21 = vpack.c.bf16 %v118_v11, %v112_v10  ;;  %v81_v22 = vld [vmem:[%s4061_s1 + $0x108] sm:$0xff] }
  0x20   :  { %1861 = vmatpush1.bf16.msra.mxu0 %v1860_v45  ;;  %v75_v19 = vld [vmem:[%s4061_s1 + $0xd8] sm:$0xff]  ;;  %v124_v24 = vld [vmem:[%s4061_s1 + $0x260] sm:$0xff]  ;;  %v130_v25 = vld [vmem:[%s4061_s1 + $0x290] sm:$0xff] }
  0x21   :  { %1753 = vmatpush1.bf16.msra.mxu1 %v1752_v50  ;;  %v94_v50 = vld [vmem:[%s4061_s1 + $0x170] sm:$0xff]  ;;  %1863 = vmatprep.subr.bf16.mxu0 %v1862_v48  ;;  %v2643_v20 = vld [vmem:[%s4062_s0 + $0x18] sm:$0xff]  ;;  %v137_v26 = vld [vmem:[%s4061_s1 + $0x2c8] sm:$0xff]  ;;  %v1794_v30 = vpack.c.bf16 %v81_v22, %v75_v19  ;;  %v1876_v34 = vpack.c.bf16 %v130_v25, %v124_v24 }
  0x22   :  { %1755 = vmatprep.subr.bf16.mxu1 %v1754_v51  ;;  %v235_v51 = vld [vmem:[%s4061_s1 + $0x5d8] sm:$0xff]  ;;  %v74_v31 = vld [vmem:[%s4061_s1 + $0xd0] sm:$0xff]  ;;  %v80_v32 = vld [vmem:[%s4061_s1 + $0x100] sm:$0xff] }
  0x23   :  { %v1782_v58 = vpack.c.bf16 %v235_v51, %v229_v47  ;;  %v143_v27 = vld [vmem:[%s4061_s1 + $0x2f8] sm:$0xff]  ;;  %v93_v35 = vld [vmem:[%s4061_s1 + $0x168] sm:$0xff]  ;;  %v136_v37 = vld [vmem:[%s4061_s1 + $0x2c0] sm:$0xff] }
  0x24   :  { %v1878_v36 = vpack.c.bf16 %v143_v27, %v137_v26  ;;  %v142_v38 = vld [vmem:[%s4061_s1 + $0x2f0] sm:$0xff]  ;;  %v149_v39 = vld [vmem:[%s4061_s1 + $0x328] sm:$0xff]  ;;  %v155_v40 = vld [vmem:[%s4061_s1 + $0x358] sm:$0xff] }
  0x25   :  { %1757 = vmatpush1.bf16.msra.mxu1 %v1756_v56  ;;  %v234_v56 = vld [vmem:[%s4061_s1 + $0x5d0] sm:$0xff]  ;;  %v92_v45 = vld [vmem:[%s4061_s1 + $0x160] sm:$0xff]  ;;  %v1880_v47 = vpack.c.bf16 %v142_v38, %v136_v37  ;;  %v1882_v48 = vpack.c.bf16 %v155_v40, %v149_v39  ;;  %v161_v51 = vld [vmem:[%s4061_s1 + $0x388] sm:$0xff] }
  0x26   :  { %1759 = vmatprep.subr.bf16.mxu1 %v1758_v57  ;;  %v1864_v57 = vpack.c.bf16 %v94_v50, %v88_v49  ;;  %v1784_v2 = vpack.c.bf16 %v234_v56, %v228_v55  ;;  %v86_v44 = vld [vmem:[%s4061_s1 + $0x130] sm:$0xff]  ;;  %v148_v49 = vld [vmem:[%s4061_s1 + $0x320] sm:$0xff]  ;;  %v167_v52 = vld [vmem:[%s4061_s1 + $0x3b8] sm:$0xff] }
  0x27   :  { %v154_v50 = vld [vmem:[%s4061_s1 + $0x350] sm:$0xff]  ;;  %v1800_v53 = vpack.c.bf16 %v92_v45, %v86_v44  ;;  %v104_v56 = vld [vmem:[%s4061_s1 + $0x1c0] sm:$0xff]  ;;  %v179_v0 = vld [vmem:[%s4061_s1 + $0x418] sm:$0xff] }
  0x28   :  { %1865 = vmatpush1.bf16.msra.mxu0 %v1864_v57  ;;  %v98_v55 = vld [vmem:[%s4061_s1 + $0x190] sm:$0xff]  ;;  %v111_v57 = vld [vmem:[%s4061_s1 + $0x1f8] sm:$0xff]  ;;  %v129_v7 = vld [vmem:[%s4061_s1 + $0x288] sm:$0xff] }
  0x29   :  { %1761 = vmatpush1.bf16.msra.mxu1 %v1760_v62  ;;  %v106_v62 = vld [vmem:[%s4061_s1 + $0x1d0] sm:$0xff]  ;;  %1867 = vmatprep.subr.bf16.mxu0 %v1866_v60  ;;  %v1886_v60 = vpack.c.bf16 %v167_v52, %v161_v51  ;;  %v1804_v1 = vpack.c.bf16 %v104_v56, %v98_v55  ;;  %v172_v9 = vld [vmem:[%s4061_s1 + $0x3e0] sm:$0xff]  ;;  %v185_v11 = vld [vmem:[%s4061_s1 + $0x448] sm:$0xff] }
  0x2a   :  { %1763 = vmatprep.subr.bf16.mxu1 %v1762_v63  ;;  %v57_v63 = vld [vmem:[%s4061_s1 + $0x48] sm:$0xff]  ;;  %v1868_v3 = vpack.c.bf16 %v106_v62, %v100_v61  ;;  %v160_v61 = vld [vmem:[%s4061_s1 + $0x380] sm:$0xff]  ;;  %v166_v62 = vld [vmem:[%s4061_s1 + $0x3b0] sm:$0xff] }
  0x2b   :  { %v178_v10 = vld [vmem:[%s4061_s1 + $0x410] sm:$0xff]  ;;  %v197_v25 = vld [vmem:[%s4061_s1 + $0x4a8] sm:$0xff]  ;;  %v203_v26 = vld [vmem:[%s4061_s1 + $0x4d8] sm:$0xff] }
  0x2c   :  { %1869 = vmatpush1.bf16.msra.mxu0 %v1868_v3  ;;  %v110_v3 = vld [vmem:[%s4061_s1 + $0x1f0] sm:$0xff]  ;;  %v1892_v19 = vpack.c.bf16 %v178_v10, %v172_v9  ;;  %v209_v38 = vld [vmem:[%s4061_s1 + $0x508] sm:$0xff]  ;;  %v215_v39 = vld [vmem:[%s4061_s1 + $0x538] sm:$0xff] }
  0x2d   :  { %1765 = vmatpush1.bf16.msra.mxu1 %v1764_v4  ;;  %v1786_v4 = vpack.c.bf16 %v57_v63, %v51_v59  ;;  %1871 = vmatprep.subr.bf16.mxu0 %v1870_v8  ;;  %v117_v59 = vld [vmem:[%s4061_s1 + $0x228] sm:$0xff]  ;;  %v190_v24 = vld [vmem:[%s4061_s1 + $0x470] sm:$0xff]  ;;  %v152_v44 = vld [vmem:[%s4061_s1 + $0x340] sm:$0xff] }
  0x2e   :  { %1767 = vmatprep.subr.bf16.mxu1 %v1766_v5  ;;  %v50_v5 = vld [vmem:[%s4061_s1 + $0x10] sm:$0xff]  ;;  %v173_v63 = vld [vmem:[%s4061_s1 + $0x3e8] sm:$0xff]  ;;  %v159_v45 = vld [vmem:[%s4061_s1 + $0x378] sm:$0xff] }
  0x2f   :  { %v1788_v15 = vpack.c.bf16 %v56_v6, %v50_v5  ;;  %v123_v5 = vld [vmem:[%s4061_s1 + $0x258] sm:$0xff]  ;;  %v1888_v6 = vpack.c.bf16 %v166_v62, %v160_v61  ;;  %v1890_v8 = vpack.c.bf16 %v179_v0, %v173_v63  ;;  %v202_v37 = vld [vmem:[%s4061_s1 + $0x4d0] sm:$0xff]  ;;  %v164_v55 = vld [vmem:[%s4061_s1 + $0x3a0] sm:$0xff] }
  0x30   :  { %1873 = vmatpush1.bf16.msra.mxu0 %v1872_v21  ;;  %v141_v21 = vld [vmem:[%s4061_s1 + $0x2e8] sm:$0xff]  ;;  %v227_v51 = vld [vmem:[%s4061_s1 + $0x598] sm:$0xff]  ;;  %v226_v61 = vld [vmem:[%s4061_s1 + $0x590] sm:$0xff] }
  0x31   :  { %1769 = vmatpush1.bf16.msra.mxu1 %v1768_v12  ;;  %v125_v12 = vld [vmem:[%s4061_s1 + $0x268] sm:$0xff]  ;;  %v171_v56 = vld [vmem:[%s4061_s1 + $0x3d8] sm:$0xff]  ;;  %v238_v9 = vld [vmem:[%s4061_s1 + $0x5f0] sm:$0xff] }
  0x32   :  { %1771 = vmatprep.subr.bf16.mxu1 %v1770_v18  ;;  %v68_v18 = vld [vmem:[%s4061_s1 + $0xa0] sm:$0xff]  ;;  %v1874_v23 = vpack.c.bf16 %v131_v13, %v125_v12  ;;  %v191_v12 = vld [vmem:[%s4061_s1 + $0x478] sm:$0xff]  ;;  %v233_v62 = vld [vmem:[%s4061_s1 + $0x5c8] sm:$0xff] }
  0x33   :  { %v1792_v28 = vpack.c.bf16 %v68_v18, %v62_v16  ;;  %v122_v16 = vld [vmem:[%s4061_s1 + $0x250] sm:$0xff]  ;;  %v135_v18 = vld [vmem:[%s4061_s1 + $0x2b8] sm:$0xff]  ;;  %v1894_v22 = vpack.c.bf16 %v191_v12, %v185_v11 }
  0x34   :  { %1875 = vmatprep.subr.bf16.mxu0 %v1874_v23  ;;  %v184_v23 = vld [vmem:[%s4061_s1 + $0x440] sm:$0xff]  ;;  %v239_v63 = vld [vmem:[%s4061_s1 + $0x5f8] sm:$0xff]  ;;  %v182_v12 = vld [vmem:[%s4061_s1 + $0x430] sm:$0xff] }
  0x35   :  { %1773 = vmatpush1.bf16.msra.mxu1 %v1772_v29  ;;  %v2665_v29 = vld [vmem:[%s4062_s0 + $0x10] sm:$0xff]  ;;  %1877 = vmatpush1.bf16.msra.mxu0 %v1876_v34  ;;  %v153_v34 = vld [vmem:[%s4061_s1 + $0x348] sm:$0xff] }
  0x36   :  { %1775 = vmatprep.subr.bf16.mxu1 %v1774_v33  ;;  %v87_v33 = vld [vmem:[%s4061_s1 + $0x138] sm:$0xff]  ;;  %1879 = vmatprep.subr.bf16.mxu0 %v1878_v36  ;;  %v196_v36 = vld [vmem:[%s4061_s1 + $0x4a0] sm:$0xff] }
  0x37   :  { %v1798_v43 = vpack.c.bf16 %v93_v35, %v87_v33  ;;  %v1896_v33 = vpack.c.bf16 %v190_v24, %v184_v23  ;;  %v1898_v35 = vpack.c.bf16 %v203_v26, %v197_v25  ;;  %v207_v23 = vld [vmem:[%s4061_s1 + $0x4f8] sm:$0xff]  ;;  %v213_v24 = vld [vmem:[%s4061_s1 + $0x528] sm:$0xff] }
  0x38   :  { %v1838_v26 = vpack.c.bf16 %v213_v24, %v207_v23 }
  0x39   :  { %1777 = vmatpush1.bf16.msra.mxu1 %v1776_v42  ;;  %v1796_v42 = vpack.c.bf16 %v80_v32, %v74_v31  ;;  %1881 = vmatpush1.bf16.msra.mxu0 %v1880_v47  ;;  %v140_v31 = vld [vmem:[%s4061_s1 + $0x2e0] sm:$0xff]  ;;  %v147_v32 = vld [vmem:[%s4061_s1 + $0x318] sm:$0xff]  ;;  %v165_v47 = vld [vmem:[%s4061_s1 + $0x3a8] sm:$0xff] }
  0x3a   :  { %1779 = vmatprep.subr.bf16.mxu1 %v1778_v46  ;;  %v99_v46 = vld [vmem:[%s4061_s1 + $0x198] sm:$0xff]  ;;  %1883 = vmatprep.subr.bf16.mxu0 %v1882_v48  ;;  %v208_v48 = vld [vmem:[%s4061_s1 + $0x500] sm:$0xff] }
  0x3d   :  { %1781 = vmatpush1.bf16.msra.mxu1 %v1780_v54 }
  0x3e   :  { %1783 = vmatprep.subr.bf16.mxu1 %v1782_v58  ;;  %v1884_v58 = vpack.c.bf16 %v154_v50, %v148_v49  ;;  %v214_v49 = vld [vmem:[%s4061_s1 + $0x530] sm:$0xff]  ;;  %v221_v50 = vld [vmem:[%s4061_s1 + $0x568] sm:$0xff] }
  0x40   :  { %1885 = vmatpush1.bf16.msra.mxu0 %v1884_v58  ;;  %v177_v58 = vld [vmem:[%s4061_s1 + $0x408] sm:$0xff] }
  0x41   :  { %1785 = vmatpush1.bf16.msra.mxu1 %v1784_v2  ;;  %v1806_v2 = vpack.c.bf16 %v117_v59, %v111_v57  ;;  %1887 = vmatprep.subr.bf16.mxu0 %v1886_v60  ;;  %v1904_v57 = vpack.c.bf16 %v214_v49, %v208_v48  ;;  %v1906_v59 = vpack.c.bf16 %v227_v51, %v221_v50  ;;  %v220_v60 = vld [vmem:[%s4061_s1 + $0x560] sm:$0xff] }
  0x42   :  { %1787 = vmatprep.subr.bf16.mxu1 %v1786_v4  ;;  %v116_v4 = vld [vmem:[%s4061_s1 + $0x220] sm:$0xff] }
  0x43   :  { %v1808_v13 = vpack.c.bf16 %v116_v4, %v110_v3  ;;  %v176_v3 = vld [vmem:[%s4061_s1 + $0x400] sm:$0xff]  ;;  %v183_v4 = vld [vmem:[%s4061_s1 + $0x438] sm:$0xff] }
  0x44   :  { %337 = vmatmul.mubr.f32.vlgmr.msra.gmra.mrb[0].mxu1 %v2629_v14  ;;  %1889 = vmatpush1.bf16.msra.mxu0 %v1888_v6  ;;  %v189_v6 = vld [vmem:[%s4061_s1 + $0x468] sm:$0xff] }
  0x45   :  { %1789 = vmatpush1.bf16.msra.mxu1 %v1788_v15  ;;  %342 = vmatprep.mubr.f32.mxu1 %v2643_v20  ;;  %v1810_v15 = vpack.c.bf16 %v129_v7, %v123_v5  ;;  %v1908_v5 = vpack.c.bf16 %v226_v61, %v220_v60  ;;  %v1910_v7 = vpack.c.bf16 %v239_v63, %v233_v62 }
  0x46   :  { %1791 = vmatprep.subr.bf16.mxu1 %v1790_v17  ;;  %v128_v17 = vld [vmem:[%s4061_s1 + $0x280] sm:$0xff]  ;;  %1891 = vmatprep.subr.bf16.mxu0 %v1890_v8  ;;  %v1830_v11 = vpack.c.bf16 %v189_v6, %v183_v4 }
  0x47   :  { %v1812_v27 = vpack.c.bf16 %v128_v17, %v122_v16  ;;  %v232_v8 = vld [vmem:[%s4061_s1 + $0x5c0] sm:$0xff]  ;;  %v195_v16 = vld [vmem:[%s4061_s1 + $0x498] sm:$0xff]  ;;  %v201_v17 = vld [vmem:[%s4061_s1 + $0x4c8] sm:$0xff] }
  0x48   :  { %343 = vmatmul.mubr.f32.gmra.mrb[2].mxu1 %v2665_v29  ;;  %1893 = vmatpush1.bf16.msra.mxu0 %v1892_v19  ;;  %v1834_v19 = vpack.c.bf16 %v201_v17, %v195_v16 }
  0x49   :  { %1793 = vmatpush1.bf16.msra.mxu1 %v1792_v28  ;;  %413 = vmatprep.mubr.f32.mxu1 %v2418_v41  ;;  %v105_v41 = vld [vmem:[%s4061_s1 + $0x1c8] sm:$0xff]  ;;  %v1814_v28 = vpack.c.bf16 %v141_v21, %v135_v18  ;;  %v194_v21 = vld [vmem:[%s4061_s1 + $0x490] sm:$0xff] }
  0x4a   :  { %1795 = vmatprep.subr.bf16.mxu1 %v1794_v30  ;;  %v1802_v54 = vpack.c.bf16 %v105_v41, %v99_v46  ;;  %v134_v30 = vld [vmem:[%s4061_s1 + $0x2b0] sm:$0xff]  ;;  %1895 = vmatprep.subr.bf16.mxu0 %v1894_v22  ;;  %v1900_v46 = vpack.c.bf16 %v202_v37, %v196_v36  ;;  %v1902_v41 = vpack.c.bf16 %v215_v39, %v209_v38  ;;  %v200_v22 = vld [vmem:[%s4061_s1 + $0x4c0] sm:$0xff]  ;;  %v231_v36 = vld [vmem:[%s4061_s1 + $0x5b8] sm:$0xff] }
  0x4b   :  { %v1816_v40 = vpack.c.bf16 %v140_v31, %v134_v30  ;;  %v1836_v25 = vpack.c.bf16 %v200_v22, %v194_v21  ;;  %v219_v30 = vld [vmem:[%s4061_s1 + $0x558] sm:$0xff]  ;;  %v225_v31 = vld [vmem:[%s4061_s1 + $0x588] sm:$0xff] }
  0x4c   :  { %1897 = vmatpush1.bf16.msra.mxu0 %v1896_v33  ;;  %v1842_v33 = vpack.c.bf16 %v225_v31, %v219_v30  ;;  %v237_v37 = vld [vmem:[%s4061_s1 + $0x5e8] sm:$0xff] }
  0x4d   :  { %1797 = vmatpush1.bf16.msra.mxu1 %v1796_v42  ;;  %v1818_v42 = vpack.c.bf16 %v153_v34, %v147_v32  ;;  %1899 = vmatprep.subr.bf16.mxu0 %v1898_v35  ;;  %v218_v34 = vld [vmem:[%s4061_s1 + $0x550] sm:$0xff]  ;;  %v224_v35 = vld [vmem:[%s4061_s1 + $0x580] sm:$0xff]  ;;  %v1846_v39 = vpack.c.bf16 %v237_v37, %v231_v36 }
  0x4e   :  { %1799 = vmatprep.subr.bf16.mxu1 %v1798_v43  ;;  %v146_v43 = vld [vmem:[%s4061_s1 + $0x310] sm:$0xff]  ;;  %v1844_v38 = vpack.c.bf16 %v224_v35, %v218_v34 }
  0x4f   :  { %v1820_v52 = vpack.c.bf16 %v152_v44, %v146_v43  ;;  %v242_v44 = vlaneseq }
  0x50   :  { %1901 = vmatpush1.bf16.msra.mxu0 %v1900_v46 }
  0x51   :  { %1801 = vmatpush1.bf16.msra.mxu1 %v1800_v53  ;;  %v1822_v53 = vpack.c.bf16 %v165_v47, %v159_v45  ;;  %1903 = vmatprep.subr.bf16.mxu0 %v1902_v41  ;;  %v2939_v45 = vshrl.u32 %v242_v44, 7  ;;  %v240_v47 = vld [vmem:[%s4063_s2] sm:$0x3f]  ;;  %v819_v44 = vld [vmem:[%s4064_s3 + $0x18] sm:$0xff] }
  0x52   :  { %1803 = vmatprep.subr.bf16.mxu1 %v1802_v54  ;;  %v158_v54 = vld [vmem:[%s4061_s1 + $0x370] sm:$0xff] }
  0x53   :  { %v1824_v0 = vpack.c.bf16 %v164_v55, %v158_v54  ;;  %v2942_v46 = vsub.s32 1, %v2939_v45  ;;  %v260_v54 = vsub.s32 4, %v2939_v45  ;;  %v264_v55 = vsub.s32 5, %v2939_v45 }
  0x54   :  { %1905 = vmatpush1.bf16.msra.mxu0 %v1904_v57  ;;  %v2955_v4 = vsub.s32 0, %v2939_v45 }
  0x55   :  { %1805 = vmatpush1.bf16.msra.mxu1 %v1804_v1  ;;  %v1826_v1 = vpack.c.bf16 %v177_v58, %v171_v56  ;;  %1907 = vmatprep.subr.bf16.mxu0 %v1906_v59  ;;  %v249_v41 = vrot.slane %v240_v47, %v2942_v46  ;;  %v261_v56 = vrot.slane %v240_v47, %v260_v54 }
  0x56   :  { %1807 = vmatprep.subr.bf16.mxu1 %v1806_v2  ;;  %v170_v2 = vld [vmem:[%s4061_s1 + $0x3d0] sm:$0xff]  ;;  %v265_v57 = vrot.slane %v240_v47, %v264_v55 }
  0x57   :  { %v1828_v10 = vpack.c.bf16 %v176_v3, %v170_v2  ;;  %v256_v2 = vsub.s32 3, %v2939_v45  ;;  %v252_v3 = vsub.s32 2, %v2939_v45 }
  0x58   :  { %1909 = vmatpush1.bf16.msra.mxu0 %v1908_v5 }
  0x59   :  { %1809 = vmatpush1.bf16.msra.mxu1 %v1808_v13  ;;  %v188_v13 = vld [vmem:[%s4061_s1 + $0x460] sm:$0xff]  ;;  %1911 = vmatprep.subr.bf16.mxu0 %v1910_v7  ;;  %v257_v5 = vrot.slane %v240_v47, %v256_v2  ;;  %v253_v6 = vrot.slane %v240_v47, %v252_v3 }
  0x5a   :  { %1811 = vmatprep.subr.bf16.mxu1 %v1810_v15  ;;  %v1912_v15 = vpack.c.bf16 %v238_v9, %v232_v8  ;;  %v1832_v18 = vpack.c.bf16 %v188_v13, %v182_v12  ;;  %v245_v9 = vrot.slane %v240_v47, %v2955_v4 }
  0x5c   :  { %1913 = vmatpush1.bf16.msra.mxu0 %v1912_v15 }
  0x5d   :  { %1813 = vmatpush1.bf16.msra.mxu1 %v1812_v27  ;;  %v206_v27 = vld [vmem:[%s4061_s1 + $0x4f0] sm:$0xff] }
  0x5e   :  { %1815 = vmatprep.subr.bf16.mxu1 %v1814_v28  ;;  %v212_v28 = vld [vmem:[%s4061_s1 + $0x520] sm:$0xff] }
  0x5f   :  { %491 = vmatmul.mubr.f32.vlgmr.msra.gmra.mrb[0].mxu0 %v2629_v14  ;;  %v1840_v32 = vpack.c.bf16 %v212_v28, %v206_v27 }
  0x60   :  { %496 = vmatprep.mubr.f32.mxu0 %v2643_v20 }
  0x61   :  { %1817 = vmatpush1.bf16.msra.mxu1 %v1816_v40  ;;  %v230_v40 = vld [vmem:[%s4061_s1 + $0x5b0] sm:$0xff] }
  0x62   :  { %1819 = vmatprep.subr.bf16.mxu1 %v1818_v42  ;;  %v236_v42 = vld [vmem:[%s4061_s1 + $0x5e0] sm:$0xff] }
  0x63   :  { %497 = vmatmul.mubr.f32.gmra.mrb[2].mxu0 %v2665_v29  ;;  %v1848_v43 = vpack.c.bf16 %v236_v42, %v230_v40 }
  0x65   :  { %1821 = vmatpush1.bf16.msra.mxu1 %v1820_v52 }
  0x66   :  { %1823 = vmatprep.subr.bf16.mxu1 %v1822_v53 }
  0x69   :  { %1825 = vmatpush1.bf16.msra.mxu1 %v1824_v0 }
  0x6a   :  { %1827 = vmatprep.subr.bf16.mxu1 %v1826_v1 }
  0x6d   :  { %1829 = vmatpush1.bf16.msra.mxu1 %v1828_v10 }
  0x6e   :  { %1831 = vmatprep.subr.bf16.mxu1 %v1830_v11 }
  0x71   :  { %1833 = vmatpush1.bf16.msra.mxu1 %v1832_v18 }
  0x72   :  { %1835 = vmatprep.subr.bf16.mxu1 %v1834_v19 }
  0x75   :  { %1837 = vmatpush1.bf16.msra.mxu1 %v1836_v25 }
  0x76   :  { %1839 = vmatprep.subr.bf16.mxu1 %v1838_v26 }
  0x79   :  { %1841 = vmatpush1.bf16.msra.mxu1 %v1840_v32 }
  0x7a   :  { %1843 = vmatprep.subr.bf16.mxu1 %v1842_v33 }
  0x7d   :  { %1845 = vmatpush1.bf16.msra.mxu1 %v1844_v38 }
  0x7e   :  { %1847 = vmatprep.subr.bf16.mxu1 %v1846_v39  ;;  %v2260_v39 = vmov 0.0  }
  0x81   :  { %1849 = vmatpush1.bf16.msra.mxu1 %v1848_v43  ;;  %v817_v43 = vld [vmem:[%s4064_s3 + $0x8] sm:$0xff] }
  0x84   :  { %414 = vmatmul.mubr.f32.vlgmr.msra.gmra.mrb[4].mxu1 %v2629_v14 }
  0x85   :  { %419 = vmatprep.mubr.f32.mxu1 %v2643_v20 }
  0x88   :  { %420 = vmatmul.mubr.f32.gmra.mrb[6].mxu1 %v2665_v29 }
  0x89   :  { %735 = vmatprep.mubr.f32.mxu1 %v2260_v39 }
 0x117   :  { %v338_v48 = vpop.f32.mrb[0].mxu1 }
 0x118   :  { %v340_v49 = vpop.f32.mrb[1].mxu1  ;;  %v339_v16 = vadd.f32 %v338_v48, %v245_v9  ;;  %v1914_v48 = vpack.c.bf16 %v819_v44, %v817_v43  ;;  %v850_v43 = vld [vmem:[%s4064_s3 + $0x110] sm:$0xff]  ;;  %v853_v44 = vld [vmem:[%s4064_s3 + $0x128] sm:$0xff] }
 0x119   :  { %v341_v50 = vadd.f32 %v340_v49, %v249_v41  ;;  %v816_v49 = vld [vmem:[%s4064_s3] sm:$0xff] }
 0x11b   :  { %567 = vmatprep.mubr.f32.mxu0 %v341_v50  ;;  %v344_v51 = vpop.f32.mrb[2].mxu1  ;;  %v818_v50 = vld [vmem:[%s4064_s3 + $0x10] sm:$0xff] }
 0x11c   :  { %v346_v52 = vpop.f32.mrb[3].mxu1  ;;  %v345_v18 = vadd.f32 %v344_v51, %v245_v9  ;;  %v821_v51 = vld [vmem:[%s4064_s3 + $0x28] sm:$0xff]  ;;  %v1916_v54 = vpack.c.bf16 %v818_v50, %v816_v49  ;;  %v830_v9 = vld [vmem:[%s4064_s3 + $0x70] sm:$0xff]  ;;  %v852_v49 = vld [vmem:[%s4064_s3 + $0x120] sm:$0xff] }
 0x11d   :  { %v347_v53 = vadd.f32 %v346_v52, %v249_v41  ;;  %v823_v52 = vld [vmem:[%s4064_s3 + $0x38] sm:$0xff]  ;;  %v854_v50 = vld [vmem:[%s4064_s3 + $0x130] sm:$0xff] }
 0x132   :  { %v492_v58 = vpop.f32.mrb[0].mxu0 }
 0x133   :  { %v493_v59 = vadd.f32 %v492_v58, %v261_v56  ;;  %v494_v60 = vpop.f32.mrb[1].mxu0  ;;  %v822_v58 = vld [vmem:[%s4064_s3 + $0x30] sm:$0xff] }
 0x134   :  { %v495_v61 = vadd.f32 %v494_v60, %v265_v57  ;;  %v827_v60 = vld [vmem:[%s4064_s3 + $0x58] sm:$0xff] }
 0x136   :  { %v498_v62 = vpop.f32.mrb[2].mxu0  ;;  %671 = vmatprep.subr.mxu1 %v495_v61 }
 0x137   :  { %v2950_v63 = vadd.f32 %v498_v62, %v261_v56  ;;  %v500_v0 = vpop.f32.mrb[3].mxu0  ;;  %672 = vmatpush1.msra.mxu1 %v493_v59  ;;  %v1918_v56 = vpack.c.bf16 %v823_v52, %v821_v51  ;;  %v825_v59 = vld [vmem:[%s4064_s3 + $0x48] sm:$0xff]  ;;  %v859_v52 = vld [vmem:[%s4064_s3 + $0x158] sm:$0xff] }
 0x138   :  { %v501_v1 = vadd.f32 %v500_v0, %v265_v57  ;;  %v820_v57 = vld [vmem:[%s4064_s3 + $0x20] sm:$0xff]  ;;  %v1922_v62 = vpack.c.bf16 %v827_v60, %v825_v59  ;;  %v826_v0 = vld [vmem:[%s4064_s3 + $0x50] sm:$0xff]  ;;  %v857_v51 = vld [vmem:[%s4064_s3 + $0x148] sm:$0xff] }
 0x139   :  { %v1920_v61 = vpack.c.bf16 %v822_v58, %v820_v57  ;;  %v861_v57 = vld [vmem:[%s4064_s3 + $0x168] sm:$0xff]  ;;  %v863_v58 = vld [vmem:[%s4064_s3 + $0x178] sm:$0xff] }
 0x13a   :  { %745 = vmatprep.subr.mxu1 %v501_v1  ;;  %v829_v1 = vld [vmem:[%s4064_s3 + $0x68] sm:$0xff]  ;;  %v1958_v60 = vpack.c.bf16 %v863_v58, %v861_v57  ;;  %v1042_v57 = vld [vmem:[%s4066_s7 + $0x20] sm:$0xff] }
 0x157   :  { %v415_v7 = vpop.f32.mrb[4].mxu1 }
 0x158   :  { %v417_v8 = vpop.f32.mrb[5].mxu1  ;;  %v416_v11 = vadd.f32 %v415_v7, %v253_v6 }
 0x159   :  { %v418_v10 = vadd.f32 %v417_v8, %v257_v5  ;;  %v828_v8 = vld [vmem:[%s4064_s3 + $0x60] sm:$0xff] }
 0x15b   :  { %v421_v12 = vpop.f32.mrb[6].mxu1  ;;  %503 = vmatprep.subr.mxu0 %v418_v10  ;;  %v833_v10 = vld [vmem:[%s4064_s3 + $0x88] sm:$0xff] }
 0x15c   :  { %v422_v13 = vadd.f32 %v421_v12, %v253_v6  ;;  %v423_v15 = vpop.f32.mrb[7].mxu1  ;;  %504 = vmatpush1.xpose.msra.mxu0 %v416_v11  ;;  %v835_v11 = vld [vmem:[%s4064_s3 + $0x98] sm:$0xff]  ;;  %v1928_v12 = vpack.c.bf16 %v830_v9, %v828_v8  ;;  %v869_v8 = vld [vmem:[%s4064_s3 + $0x1a8] sm:$0xff] }
 0x15d   :  { %v424_v17 = vadd.f32 %v423_v15, %v257_v5  ;;  %v831_v5 = vld [vmem:[%s4064_s3 + $0x78] sm:$0xff]  ;;  %v832_v15 = vld [vmem:[%s4064_s3 + $0x80] sm:$0xff] }
 0x15e   :  { %v1926_v7 = vpack.c.bf16 %v831_v5, %v829_v1  ;;  %v871_v9 = vld [vmem:[%s4064_s3 + $0x1b8] sm:$0xff] }
 0x15f   :  { %568 = vmatmul.mubr.f32.vlgmr.msra.gmra.mrb[4].mxu0 %v339_v16  ;;  %573 = vmatprep.subr.mxu0 %v424_v17  ;;  %v834_v16 = vld [vmem:[%s4064_s3 + $0x90] sm:$0xff]  ;;  %v837_v17 = vld [vmem:[%s4064_s3 + $0xa8] sm:$0xff] }
 0x160   :  { %574 = vmatpush1.xpose.msra.mxu0 %v422_v13  ;;  %637 = vmatprep.mubr.f32.mxu0 %v347_v53  ;;  %v1930_v13 = vpack.c.bf16 %v835_v11, %v833_v10  ;;  %v1966_v11 = vpack.c.bf16 %v871_v9, %v869_v8  ;;  %v1046_v8 = vld [vmem:[%s4066_s7 + $0x40] sm:$0xff] }
 0x161   :  { %v1050_v9 = vld [vmem:[%s4066_s7 + $0x60] sm:$0xff] }
 0x163   :  { %638 = vmatmul.mubr.f32.vlgmr.msra.gmra.mrb[6].mxu0 %v345_v18  ;;  %v839_v18 = vld [vmem:[%s4064_s3 + $0xb8] sm:$0xff] }
 0x232   :  { %v569_v19 = vpop.f32.mrb[4].mxu0 }
 0x233   :  { %v643_v21 = vmul.f32 0.0625, %v569_v19  ;;  %v571_v22 = vpop.f32.mrb[5].mxu0  ;;  %v1932_v19 = vpack.c.bf16 %v834_v16, %v832_v15  ;;  %v873_v15 = vld [vmem:[%s4064_s3 + $0x1c8] sm:$0xff]  ;;  %v875_v16 = vld [vmem:[%s4064_s3 + $0x1d8] sm:$0xff] }
 0x234   :  { %v836_v22 = vld [vmem:[%s4064_s3 + $0xa0] sm:$0xff] }
 0x235   :  { %v646_v23 = vsel %vm645_vm0, %v643_v21, -inf }
 0x236   :  { %647 = vmax.xlane.f32.xlu0 %v646_v23  ;;  %v639_v24 = vpop.f32.mrb[6].mxu0  ;;  %v838_v23 = vld [vmem:[%s4064_s3 + $0xb0] sm:$0xff] }
 0x237   :  { %v644_v25 = vmul.f32 0.0625, %v639_v24  ;;  %v641_v26 = vpop.f32.mrb[7].mxu0  ;;  %v841_v24 = vld [vmem:[%s4064_s3 + $0xc8] sm:$0xff] }
 0x238   :  { %v1936_v26 = vpack.c.bf16 %v838_v23, %v836_v22  ;;  %v877_v22 = vld [vmem:[%s4064_s3 + $0x1e8] sm:$0xff]  ;;  %v879_v23 = vld [vmem:[%s4064_s3 + $0x1f8] sm:$0xff] }
 0x239   :  { %v649_v27 = vsel %vm645_vm0, %v644_v25, -inf }
 0x23a   :  { %650 = vmax.xlane.f32.xlu0 %v649_v27 }
 0x2c3   :  { %v648_v28 = vpop.xlane.xlu0 %647 }
 0x2c4   :  { %v652_v30 = vsub.f32 %v643_v21, %v648_v28  ;;  %v1934_v21 = vpack.c.bf16 %v839_v18, %v837_v17  ;;  %v840_v28 = vld [vmem:[%s4064_s3 + $0xc0] sm:$0xff]  ;;  %v1970_v18 = vpack.c.bf16 %v875_v16, %v873_v15  ;;  %v1059_v15 = vld [vmem:[%s4066_s7 + $0xa8] sm:$0xff] }
 0x2c6   :  { %v654_v31 = vmul.f32 1.442695, %v652_v30  ;;  %v842_v30 = vld [vmem:[%s4064_s3 + $0xd0] sm:$0xff] }
 0x2c7   :  { %v651_v32 = vpop.xlane.xlu0 %650 }
 0x2c8   :  { %2243 = vpow2.f32 %v654_v31  ;;  %v653_v33 = vsub.f32 %v644_v25, %v651_v32  ;;  %v843_v25 = vld [vmem:[%s4064_s3 + $0xd8] sm:$0xff]  ;;  %v845_v31 = vld [vmem:[%s4064_s3 + $0xe8] sm:$0xff] }
 0x2c9   :  { %v1938_v27 = vpack.c.bf16 %v843_v25, %v841_v24  ;;  %v847_v32 = vld [vmem:[%s4064_s3 + $0xf8] sm:$0xff]  ;;  %v1974_v25 = vpack.c.bf16 %v879_v23, %v877_v22  ;;  %v1058_v23 = vld [vmem:[%s4066_s7 + $0xa0] sm:$0xff] }
 0x2ca   :  { %v656_v34 = vmul.f32 1.442695, %v653_v33  ;;  %v1940_v33 = vpack.c.bf16 %v842_v30, %v840_v28 }
 0x2cc   :  { %2245 = vpow2.f32 %v656_v34  ;;  %v1942_v34 = vpack.c.bf16 %v847_v32, %v845_v31 }
 0x2d2   :  { %v2244_v35 = vpop.eup %2243 }
 0x2d3   :  { %v658_v36 = vsel %vm645_vm0, %v2244_v35, 0.0 }
 0x2d4   :  { %659 = vadd.xlane.f32.xlu1 %v658_v36  ;;  %v846_v36 = vld [vmem:[%s4064_s3 + $0xf0] sm:$0xff] }
 0x2d6   :  { %v2246_v37 = vpop.eup %2245 }
 0x2d7   :  { %v661_v38 = vsel %vm645_vm0, %v2246_v37, 0.0 }
 0x2d8   :  { %662 = vadd.xlane.f32.xlu1 %v661_v38  ;;  %v851_v38 = vld [vmem:[%s4064_s3 + $0x118] sm:$0xff] }
 0x361   :  { %v660_v40 = vpop.xlane.xlu1 %659 }
 0x362   :  { %2247 = vrcp.f32 %v660_v40 }
 0x365   :  { %v663_v42 = vpop.xlane.xlu1 %662 }
 0x366   :  { %2249 = vrcp.f32 %v663_v42  ;;  %v848_v42 = vld [vmem:[%s4064_s3 + $0x100] sm:$0xff] }
 0x36c   :  { %v2248_v47 = vpop.eup %2247 }
 0x36d   :  { %v665_v41 = vmul.f32 %v2248_v47, %v2244_v35  ;;  %v844_v35 = vld [vmem:[%s4064_s3 + $0xe0] sm:$0xff]  ;;  %v855_v47 = vld [vmem:[%s4064_s3 + $0x138] sm:$0xff] }
 0x36f   :  { %1720 = vmatmul.mubr.msk.f32.vlgmr.msra.gmra.mrb[8].mxu1 %vm645_vm0, %v665_v41  ;;  %v1948_v41 = vpack.c.bf16 %v850_v43, %v848_v42  ;;  %v2259_v43 = vld [vmem:[%s4062_s0 + $0x8] sm:$0xff] }
 0x370   :  { %v2250_v53 = vpop.eup %2249  ;;  %746 = vmatpush1.msra.mxu1 %v2950_v63  ;;  %809 = vmatprep.mubr.f32.mxu1 %v2260_v39  ;;  %v824_v63 = vld [vmem:[%s4064_s3 + $0x40] sm:$0xff]  ;;  %v1944_v39 = vpack.c.bf16 %v846_v36, %v844_v35 }
 0x371   :  { %v667_v55 = vmul.f32 %v2250_v53, %v2246_v37  ;;  %1915 = vmatprep.subr.bf16.mxu1 %v1914_v48  ;;  %v1924_v6 = vpack.c.bf16 %v826_v0, %v824_v63  ;;  %v849_v37 = vld [vmem:[%s4064_s3 + $0x108] sm:$0xff]  ;;  %v1950_v48 = vpack.c.bf16 %v855_v47, %v853_v44  ;;  %v1952_v53 = vpack.c.bf16 %v854_v50, %v852_v49  ;;  %v867_v0 = vld [vmem:[%s4064_s3 + $0x198] sm:$0xff] }
 0x372   :  { %v1946_v40 = vpack.c.bf16 %v851_v38, %v849_v37  ;;  %v865_v63 = vld [vmem:[%s4064_s3 + $0x188] sm:$0xff] }
 0x373   :  { %1721 = vmatmul.mubr.msk.f32.vlgmr.msra.gmra.mrb[10].mxu1 %vm645_vm0, %v667_v55  ;;  %v856_v55 = vld [vmem:[%s4064_s3 + $0x140] sm:$0xff]  ;;  %v1962_v5 = vpack.c.bf16 %v867_v0, %v865_v63  ;;  %v1051_v0 = vld [vmem:[%s4066_s7 + $0x68] sm:$0xff] }
 0x374   :  { %1917 = vmatpush1.bf16.msra.mxu1 %v1916_v54  ;;  %v1954_v54 = vpack.c.bf16 %v859_v52, %v857_v51 }
 0x375   :  { %1919 = vmatprep.subr.bf16.mxu1 %v1918_v56  ;;  %v858_v56 = vld [vmem:[%s4064_s3 + $0x150] sm:$0xff] }
 0x376   :  { %v1956_v59 = vpack.c.bf16 %v858_v56, %v856_v55  ;;  %v1038_v56 = vld [vmem:[%s4066_s7] sm:$0xff] }
 0x378   :  { %1921 = vmatpush1.bf16.msra.mxu1 %v1920_v61  ;;  %v860_v61 = vld [vmem:[%s4064_s3 + $0x160] sm:$0xff] }
 0x379   :  { %1923 = vmatprep.subr.bf16.mxu1 %v1922_v62  ;;  %v862_v62 = vld [vmem:[%s4064_s3 + $0x170] sm:$0xff] }
 0x37a   :  { %v1960_v1 = vpack.c.bf16 %v862_v62, %v860_v61  ;;  %v1044_v61 = vld [vmem:[%s4066_s7 + $0x30] sm:$0xff]  ;;  %v1047_v62 = vld [vmem:[%s4066_s7 + $0x48] sm:$0xff] }
 0x37c   :  { %1925 = vmatpush1.bf16.msra.mxu1 %v1924_v6  ;;  %v864_v6 = vld [vmem:[%s4064_s3 + $0x180] sm:$0xff] }
 0x37d   :  { %1927 = vmatprep.subr.bf16.mxu1 %v1926_v7  ;;  %v866_v7 = vld [vmem:[%s4064_s3 + $0x190] sm:$0xff] }
 0x37e   :  { %v1964_v10 = vpack.c.bf16 %v866_v7, %v864_v6  ;;  %v1982_v6 = vpack.c.bf16 %v1051_v0, %v1047_v62  ;;  %v1082_v62 = vld [vmem:[%s4066_s7 + $0x160] sm:$0xff] }
 0x380   :  { %1929 = vmatpush1.bf16.msra.mxu1 %v1928_v12  ;;  %v868_v12 = vld [vmem:[%s4064_s3 + $0x1a0] sm:$0xff] }
 0x381   :  { %1931 = vmatprep.subr.bf16.mxu1 %v1930_v13  ;;  %v870_v13 = vld [vmem:[%s4064_s3 + $0x1b0] sm:$0xff] }
 0x382   :  { %v1968_v17 = vpack.c.bf16 %v870_v13, %v868_v12  ;;  %v1052_v12 = vld [vmem:[%s4066_s7 + $0x70] sm:$0xff]  ;;  %v1055_v13 = vld [vmem:[%s4066_s7 + $0x88] sm:$0xff] }
 0x384   :  { %1933 = vmatpush1.bf16.msra.mxu1 %v1932_v19  ;;  %v872_v19 = vld [vmem:[%s4064_s3 + $0x1c0] sm:$0xff] }
 0x385   :  { %1935 = vmatprep.subr.bf16.mxu1 %v1934_v21  ;;  %v874_v21 = vld [vmem:[%s4064_s3 + $0x1d0] sm:$0xff] }
 0x386   :  { %v1972_v24 = vpack.c.bf16 %v874_v21, %v872_v19  ;;  %v1061_v19 = vld [vmem:[%s4066_s7 + $0xb8] sm:$0xff]  ;;  %v1054_v21 = vld [vmem:[%s4066_s7 + $0x80] sm:$0xff] }
 0x388   :  { %1937 = vmatpush1.bf16.msra.mxu1 %v1936_v26  ;;  %v876_v26 = vld [vmem:[%s4064_s3 + $0x1e0] sm:$0xff] }
 0x389   :  { %1939 = vmatprep.subr.bf16.mxu1 %v1938_v27  ;;  %v878_v27 = vld [vmem:[%s4064_s3 + $0x1f0] sm:$0xff] }
 0x38a   :  { %v1976_v28 = vpack.c.bf16 %v878_v27, %v876_v26  ;;  %v1988_v26 = vpack.c.bf16 %v1058_v23, %v1054_v21  ;;  %v1063_v27 = vld [vmem:[%s4066_s7 + $0xc8] sm:$0xff]  ;;  %v1097_v21 = vld [vmem:[%s4066_s7 + $0x1d8] sm:$0xff] }
 0x38c   :  { %1941 = vmatpush1.bf16.msra.mxu1 %v1940_v33 }
 0x38d   :  { %1943 = vmatprep.subr.bf16.mxu1 %v1942_v34  ;;  %v880_v34 = vld [vmem:[%s4065_s4] sm:$0x3] }
 0x38e   :  { %v885_v35 = vrot.slane %v880_v34, %v2955_v4  ;;  %v889_v36 = vrot.slane %v880_v34, %v2942_v46  ;;  %v1062_v34 = vld [vmem:[%s4066_s7 + $0xc0] sm:$0xff] }
 0x390   :  { %1945 = vmatpush1.bf16.msra.mxu1 %v1944_v39 }
 0x391   :  { %1947 = vmatprep.subr.bf16.mxu1 %v1946_v40 }
 0x394   :  { %1949 = vmatpush1.bf16.msra.mxu1 %v1948_v41 }
 0x395   :  { %1951 = vmatprep.subr.bf16.mxu1 %v1950_v48 }
 0x398   :  { %1953 = vmatpush1.bf16.msra.mxu1 %v1952_v53  ;;  %v1039_v53 = vld [vmem:[%s4066_s7 + $0x8] sm:$0xff] }
 0x399   :  { %1955 = vmatprep.subr.bf16.mxu1 %v1954_v54  ;;  %v1043_v54 = vld [vmem:[%s4066_s7 + $0x28] sm:$0xff] }
 0x39a   :  { %v1978_v55 = vpack.c.bf16 %v1043_v54, %v1039_v53  ;;  %v1072_v53 = vld [vmem:[%s4066_s7 + $0x110] sm:$0xff] }
 0x39c   :  { %1957 = vmatpush1.bf16.msra.mxu1 %v1956_v59  ;;  %v1980_v59 = vpack.c.bf16 %v1042_v57, %v1038_v56  ;;  %1979 = vmatprep.subr.bf16.mxu0 %v1978_v55  ;;  %v1079_v55 = vld [vmem:[%s4066_s7 + $0x148] sm:$0xff]  ;;  %v1081_v56 = vld [vmem:[%s4066_s7 + $0x158] sm:$0xff] }
 0x39d   :  { %1959 = vmatprep.subr.bf16.mxu1 %v1958_v60  ;;  %v1040_v60 = vld [vmem:[%s4066_s7 + $0x10] sm:$0xff]  ;;  %v1085_v57 = vld [vmem:[%s4066_s7 + $0x178] sm:$0xff] }
 0x39e   :  { %v2044_v63 = vpack.c.bf16 %v1044_v61, %v1040_v60  ;;  %1981 = vmatpush1.bf16.msra.mxu0 %v1980_v59  ;;  %v1078_v61 = vld [vmem:[%s4066_s7 + $0x140] sm:$0xff]  ;;  %v2062_v0 = vpack.c.bf16 %v1085_v57, %v1081_v56  ;;  %v1112_v56 = vld [vmem:[%s4066_s7 + $0x250] sm:$0xff] }
 0x39f   :  { %1983 = vmatprep.subr.bf16.mxu0 %v1982_v6  ;;  %v1091_v6 = vld [vmem:[%s4066_s7 + $0x1a8] sm:$0xff] }
 0x3a0   :  { %1961 = vmatpush1.bf16.msra.mxu1 %v1960_v1  ;;  %v1049_v1 = vld [vmem:[%s4066_s7 + $0x58] sm:$0xff] }
 0x3a1   :  { %1963 = vmatprep.subr.bf16.mxu1 %v1962_v5  ;;  %v1053_v5 = vld [vmem:[%s4066_s7 + $0x78] sm:$0xff] }
 0x3a2   :  { %v2046_v7 = vpack.c.bf16 %v1053_v5, %v1049_v1  ;;  %v1084_v1 = vld [vmem:[%s4066_s7 + $0x170] sm:$0xff]  ;;  %v1087_v5 = vld [vmem:[%s4066_s7 + $0x188] sm:$0xff] }
 0x3a4   :  { %1965 = vmatpush1.bf16.msra.mxu1 %v1964_v10  ;;  %v1048_v10 = vld [vmem:[%s4066_s7 + $0x50] sm:$0xff] }
 0x3a5   :  { %1967 = vmatprep.subr.bf16.mxu1 %v1966_v11  ;;  %v1984_v11 = vpack.c.bf16 %v1050_v9, %v1046_v8  ;;  %v2048_v16 = vpack.c.bf16 %v1052_v12, %v1048_v10  ;;  %v1093_v8 = vld [vmem:[%s4066_s7 + $0x1b8] sm:$0xff]  ;;  %v2000_v9 = vpack.c.bf16 %v1082_v62, %v1078_v61  ;;  %v1086_v12 = vld [vmem:[%s4066_s7 + $0x180] sm:$0xff] }
 0x3a6   :  { %v1121_v61 = vld [vmem:[%s4066_s7 + $0x298] sm:$0xff] }
 0x3a7   :  { %1985 = vmatpush1.bf16.msra.mxu0 %v1984_v11  ;;  %v2002_v11 = vpack.c.bf16 %v1091_v6, %v1087_v5  ;;  %v1125_v62 = vld [vmem:[%s4066_s7 + $0x2b8] sm:$0xff]  ;;  %v1118_v5 = vld [vmem:[%s4066_s7 + $0x280] sm:$0xff] }
 0x3a8   :  { %1969 = vmatpush1.bf16.msra.mxu1 %v1968_v17  ;;  %v1986_v17 = vpack.c.bf16 %v1059_v15, %v1055_v13  ;;  %v1090_v13 = vld [vmem:[%s4066_s7 + $0x1a0] sm:$0xff]  ;;  %v1088_v15 = vld [vmem:[%s4066_s7 + $0x190] sm:$0xff] }
 0x3a9   :  { %1971 = vmatprep.subr.bf16.mxu1 %v1970_v18  ;;  %v1057_v18 = vld [vmem:[%s4066_s7 + $0x98] sm:$0xff]  ;;  %v2004_v23 = vpack.c.bf16 %v1090_v13, %v1086_v12  ;;  %v1122_v6 = vld [vmem:[%s4066_s7 + $0x2a0] sm:$0xff] }
 0x3aa   :  { %v2050_v22 = vpack.c.bf16 %v1061_v19, %v1057_v18  ;;  %1987 = vmatprep.subr.bf16.mxu0 %v1986_v17  ;;  %v1092_v17 = vld [vmem:[%s4066_s7 + $0x1b0] sm:$0xff]  ;;  %v1095_v18 = vld [vmem:[%s4066_s7 + $0x1c8] sm:$0xff] }
 0x3ab   :  { %1989 = vmatpush1.bf16.msra.mxu0 %v1988_v26  ;;  %v1099_v19 = vld [vmem:[%s4066_s7 + $0x1e8] sm:$0xff]  ;;  %v1094_v26 = vld [vmem:[%s4066_s7 + $0x1c0] sm:$0xff] }
 0x3ac   :  { %1973 = vmatpush1.bf16.msra.mxu1 %v1972_v24  ;;  %v1056_v24 = vld [vmem:[%s4066_s7 + $0x90] sm:$0xff] }
 0x3ad   :  { %1975 = vmatprep.subr.bf16.mxu1 %v1974_v25  ;;  %v1060_v25 = vld [vmem:[%s4066_s7 + $0xb0] sm:$0xff] }
 0x3b0   :  { %1977 = vmatpush1.bf16.msra.mxu1 %v1976_v28  ;;  %v1067_v28 = vld [vmem:[%s4066_s7 + $0xe8] sm:$0xff] }
 0x442   :  { %v737_v30 = vpop.f32.mrb[8].mxu1 }
 0x443   :  { %v739_v31 = vpop.f32.mrb[9].mxu1 }
 0x444   :  { %956 = vmatprep.mubr.f32.mxu1 %v739_v31  ;;  %v2052_v31 = vpack.c.bf16 %v1060_v25, %v1056_v24  ;;  %v2068_v24 = vpack.c.bf16 %v1092_v17, %v1088_v15  ;;  %v2006_v25 = vpack.c.bf16 %v1099_v19, %v1095_v18 }
 0x445   :  { %957 = vmatmul.mubr.f32.vlgmr.msra.gmra.mrb[12].mxu1 %v737_v30  ;;  %v1065_v30 = vld [vmem:[%s4066_s7 + $0xd8] sm:$0xff] }
 0x446   :  { %v811_v32 = vpop.f32.mrb[10].mxu1 }
 0x447   :  { %v813_v33 = vpop.f32.mrb[11].mxu1 }
 0x448   :  { %962 = vmatprep.mubr.f32.mxu1 %v813_v33  ;;  %v1069_v33 = vld [vmem:[%s4066_s7 + $0xf8] sm:$0xff] }
 0x449   :  { %963 = vmatmul.mubr.f32.gmra.mrb[14].mxu1 %v811_v32  ;;  %v1990_v32 = vpack.c.bf16 %v1067_v28, %v1063_v27  ;;  %v1098_v27 = vld [vmem:[%s4066_s7 + $0x1e0] sm:$0xff]  ;;  %v1096_v28 = vld [vmem:[%s4066_s7 + $0x1d0] sm:$0xff] }
 0x44b   :  { %1991 = vmatprep.subr.bf16.mxu0 %v1990_v32  ;;  %v1103_v32 = vld [vmem:[%s4066_s7 + $0x208] sm:$0xff] }
 0x518   :  { %v958_v37 = vpop.f32.mrb[12].mxu1 }
 0x519   :  { %v959_v38 = vadd.f32 %v958_v37, %v885_v35  ;;  %v960_v39 = vpop.f32.mrb[13].mxu1  ;;  %v1064_v37 = vld [vmem:[%s4066_s7 + $0xd0] sm:$0xff] }
 0x51a   :  { %v961_v40 = vadd.f32 %v960_v39, %v889_v36  ;;  %v1071_v39 = vld [vmem:[%s4066_s7 + $0x108] sm:$0xff] }
 0x51b   :  { %v3167_v42 = vadd.f32 %v959_v38, %v2629_v14  ;;  %v1068_v38 = vld [vmem:[%s4066_s7 + $0xf0] sm:$0xff] }
 0x51c   :  { %v3172_v44 = vadd.f32 %v2259_v43, %v961_v40  ;;  %v964_v47 = vpop.f32.mrb[14].mxu1  ;;  %v1075_v40 = vld [vmem:[%s4066_s7 + $0x128] sm:$0xff]  ;;  %v1073_v43 = vld [vmem:[%s4066_s7 + $0x118] sm:$0xff] }
 0x51d   :  { %v965_v41 = vadd.f32 %v964_v47, %v885_v35  ;;  %v966_v48 = vpop.f32.mrb[15].mxu1  ;;  %v1066_v35 = vld [vmem:[%s4066_s7 + $0xe0] sm:$0xff]  ;;  %v1077_v47 = vld [vmem:[%s4066_s7 + $0x138] sm:$0xff] }
 0x51e   :  { %v967_v49 = vadd.f32 %v966_v48, %v889_v36  ;;  %v975_v50 = vadd.f32 %v3172_v44, %v3167_v42  ;;  %v2054_v36 = vpack.c.bf16 %v1069_v33, %v1065_v30  ;;  %v2056_v48 = vpack.c.bf16 %v1068_v38, %v1064_v37  ;;  %v1107_v33 = vld [vmem:[%s4066_s7 + $0x228] sm:$0xff] }
 0x51f   :  { %v3177_v51 = vadd.f32 %v965_v41, %v2665_v29  ;;  %v1041_v29 = vld [vmem:[%s4066_s7 + $0x18] sm:$0xff]  ;;  %v1992_v41 = vpack.c.bf16 %v1066_v35, %v1062_v34  ;;  %v2058_v54 = vpack.c.bf16 %v1077_v47, %v1073_v43  ;;  %v2010_v38 = vpack.c.bf16 %v1107_v33, %v1103_v32  ;;  %v1104_v43 = vld [vmem:[%s4066_s7 + $0x210] sm:$0xff] }
 0x520   :  { %v3180_v52 = vadd.f32 %v967_v49, %v2643_v20  ;;  %976 = vadd.xlane.f32.xlu0 %v975_v50  ;;  %v1045_v20 = vld [vmem:[%s4066_s7 + $0x38] sm:$0xff]  ;;  %v1994_v49 = vpack.c.bf16 %v1075_v40, %v1071_v39  ;;  %v1070_v50 = vld [vmem:[%s4066_s7 + $0x100] sm:$0xff] }
 0x521   :  { %v2042_v58 = vpack.c.bf16 %v1045_v20, %v1041_v29  ;;  %v1076_v29 = vld [vmem:[%s4066_s7 + $0x130] sm:$0xff]  ;;  %v1083_v20 = vld [vmem:[%s4066_s7 + $0x168] sm:$0xff]  ;;  %1993 = vmatpush1.bf16.msra.mxu0 %v1992_v41  ;;  %v1105_v34 = vld [vmem:[%s4066_s7 + $0x218] sm:$0xff] }
 0x522   :  { %v978_v14 = vadd.f32 %v3180_v52, %v3177_v51  ;;  %1995 = vmatprep.subr.bf16.mxu0 %v1994_v49  ;;  %v2060_v59 = vpack.c.bf16 %v1076_v29, %v1072_v53  ;;  %v1998_v60 = vpack.c.bf16 %v1083_v20, %v1079_v55  ;;  %v1109_v35 = vld [vmem:[%s4066_s7 + $0x238] sm:$0xff]  ;;  %v1102_v39 = vld [vmem:[%s4066_s7 + $0x200] sm:$0xff]  ;;  %v1108_v41 = vld [vmem:[%s4066_s7 + $0x230] sm:$0xff] }
 0x523   :  { %2043 = vmatprep.subr.bf16.mxu1 %v2042_v58  ;;  %v1106_v40 = vld [vmem:[%s4066_s7 + $0x220] sm:$0xff]  ;;  %v2074_v47 = vpack.c.bf16 %v1109_v35, %v1105_v34  ;;  %v1115_v49 = vld [vmem:[%s4066_s7 + $0x268] sm:$0xff]  ;;  %v1128_v34 = vld [vmem:[%s4066_s7 + $0x2d0] sm:$0xff] }
 0x524   :  { %979 = vadd.xlane.f32.xlu1 %v978_v14  ;;  %2045 = vmatpush1.bf16.msra.mxu1 %v2044_v63  ;;  %v1074_v14 = vld [vmem:[%s4066_s7 + $0x120] sm:$0xff]  ;;  %v1080_v63 = vld [vmem:[%s4066_s7 + $0x150] sm:$0xff]  ;;  %v2012_v53 = vpack.c.bf16 %v1106_v40, %v1102_v39  ;;  %v1137_v39 = vld [vmem:[%s4066_s7 + $0x318] sm:$0xff] }
 0x525   :  { %2047 = vmatprep.subr.bf16.mxu1 %v2046_v7  ;;  %v1996_v58 = vpack.c.bf16 %v1074_v14, %v1070_v50  ;;  %v1089_v7 = vld [vmem:[%s4066_s7 + $0x198] sm:$0xff]  ;;  %v2064_v10 = vpack.c.bf16 %v1084_v1, %v1080_v63  ;;  %v1110_v55 = vld [vmem:[%s4066_s7 + $0x240] sm:$0xff]  ;;  %v1132_v35 = vld [vmem:[%s4066_s7 + $0x2f0] sm:$0xff] }
 0x526   :  { %v1113_v50 = vld [vmem:[%s4066_s7 + $0x258] sm:$0xff]  ;;  %v1114_v20 = vld [vmem:[%s4066_s7 + $0x260] sm:$0xff] }
 0x527   :  { %1997 = vmatpush1.bf16.msra.mxu0 %v1996_v58  ;;  %v1117_v14 = vld [vmem:[%s4066_s7 + $0x278] sm:$0xff]  ;;  %v1116_v58 = vld [vmem:[%s4066_s7 + $0x270] sm:$0xff]  ;;  %v2016_v63 = vpack.c.bf16 %v1114_v20, %v1110_v55 }
 0x528   :  { %2049 = vmatpush1.bf16.msra.mxu1 %v2048_v16  ;;  %1999 = vmatprep.subr.bf16.mxu0 %v1998_v60  ;;  %v2066_v16 = vpack.c.bf16 %v1093_v8, %v1089_v7  ;;  %v2078_v57 = vpack.c.bf16 %v1117_v14, %v1113_v50  ;;  %v1123_v60 = vld [vmem:[%s4066_s7 + $0x2a8] sm:$0xff]  ;;  %v2082_v7 = vpack.c.bf16 %v1125_v62, %v1121_v61  ;;  %v1120_v8 = vld [vmem:[%s4066_s7 + $0x290] sm:$0xff]  ;;  %v1145_v55 = vld [vmem:[%s4066_s7 + $0x358] sm:$0xff] }
 0x529   :  { %2051 = vmatprep.subr.bf16.mxu1 %v2050_v22  ;;  %v1101_v22 = vld [vmem:[%s4066_s7 + $0x1f8] sm:$0xff]  ;;  %v1136_v50 = vld [vmem:[%s4066_s7 + $0x310] sm:$0xff] }
 0x52a   :  { %v2070_v30 = vpack.c.bf16 %v1101_v22, %v1097_v21  ;;  %v1140_v14 = vld [vmem:[%s4066_s7 + $0x330] sm:$0xff] }
 0x52b   :  { %2001 = vmatpush1.bf16.msra.mxu0 %v2000_v9  ;;  %v1124_v9 = vld [vmem:[%s4066_s7 + $0x2b0] sm:$0xff] }
 0x52c   :  { %2053 = vmatpush1.bf16.msra.mxu1 %v2052_v31  ;;  %2003 = vmatprep.subr.bf16.mxu0 %v2002_v11  ;;  %v1100_v31 = vld [vmem:[%s4066_s7 + $0x1f0] sm:$0xff]  ;;  %v2084_v11 = vpack.c.bf16 %v1124_v9, %v1120_v8  ;;  %v1150_v9 = vld [vmem:[%s4066_s7 + $0x380] sm:$0xff] }
 0x52d   :  { %2055 = vmatprep.subr.bf16.mxu1 %v2054_v36  ;;  %v2008_v36 = vpack.c.bf16 %v1098_v27, %v1094_v26  ;;  %v2072_v37 = vpack.c.bf16 %v1100_v31, %v1096_v28  ;;  %v1127_v26 = vld [vmem:[%s4066_s7 + $0x2c8] sm:$0xff]  ;;  %v1133_v28 = vld [vmem:[%s4066_s7 + $0x2f8] sm:$0xff]  ;;  %v1130_v31 = vld [vmem:[%s4066_s7 + $0x2e0] sm:$0xff] }
 0x52e   :  { %v1144_v61 = vld [vmem:[%s4066_s7 + $0x350] sm:$0xff] }
 0x52f   :  { %2005 = vmatpush1.bf16.msra.mxu0 %v2004_v23  ;;  %v1148_v62 = vld [vmem:[%s4066_s7 + $0x370] sm:$0xff] }
 0x530   :  { %2057 = vmatpush1.bf16.msra.mxu1 %v2056_v48  ;;  %2007 = vmatprep.subr.bf16.mxu0 %v2006_v25  ;;  %v1111_v48 = vld [vmem:[%s4066_s7 + $0x248] sm:$0xff] }
 0x531   :  { %2059 = vmatprep.subr.bf16.mxu1 %v2058_v54  ;;  %v2076_v54 = vpack.c.bf16 %v1108_v41, %v1104_v43  ;;  %v2014_v29 = vpack.c.bf16 %v1115_v49, %v1111_v48  ;;  %v1141_v43 = vld [vmem:[%s4066_s7 + $0x338] sm:$0xff]  ;;  %v1138_v41 = vld [vmem:[%s4066_s7 + $0x320] sm:$0xff] }
 0x532   :  { %v2090_v48 = vpack.c.bf16 %v1141_v43, %v1137_v39  ;;  %v973_v39 = vld [vmem:[%s4068_s5] sm:$0x3] }
 0x533   :  { %2009 = vmatpush1.bf16.msra.mxu0 %v2008_v36  ;;  %v2088_v36 = vpack.c.bf16 %v1132_v35, %v1128_v34  ;;  %v1012_v43 = vrot.slane %v973_v39, %v2955_v4 }
 0x534   :  { %2061 = vmatpush1.bf16.msra.mxu1 %v2060_v59  ;;  %2011 = vmatprep.subr.bf16.mxu0 %v2010_v38  ;;  %v1119_v59 = vld [vmem:[%s4066_s7 + $0x288] sm:$0xff] }
 0x535   :  { %2063 = vmatprep.subr.bf16.mxu1 %v2062_v0  ;;  %v2080_v0 = vpack.c.bf16 %v1116_v58, %v1112_v56  ;;  %v2018_v1 = vpack.c.bf16 %v1123_v60, %v1119_v59  ;;  %v1139_v38 = vld [vmem:[%s4066_s7 + $0x328] sm:$0xff]  ;;  %v1149_v56 = vld [vmem:[%s4066_s7 + $0x378] sm:$0xff]  ;;  %v1146_v58 = vld [vmem:[%s4066_s7 + $0x360] sm:$0xff] }
 0x536   :  { %v2094_v59 = vpack.c.bf16 %v1149_v56, %v1145_v55 }
 0x537   :  { %2013 = vmatpush1.bf16.msra.mxu0 %v2012_v53  ;;  %v2092_v53 = vpack.c.bf16 %v1140_v14, %v1136_v50 }
 0x538   :  { %2065 = vmatpush1.bf16.msra.mxu1 %v2064_v10  ;;  %2015 = vmatprep.subr.bf16.mxu0 %v2014_v29  ;;  %v2020_v10 = vpack.c.bf16 %v1122_v6, %v1118_v5  ;;  %v1147_v29 = vld [vmem:[%s4066_s7 + $0x368] sm:$0xff]  ;;  %v1153_v5 = vld [vmem:[%s4066_s7 + $0x398] sm:$0xff] }
 0x539   :  { %2067 = vmatprep.subr.bf16.mxu1 %v2066_v16  ;;  %v1157_v6 = vld [vmem:[%s4066_s7 + $0x3b8] sm:$0xff] }
 0x53a   :  { %v2098_v8 = vpack.c.bf16 %v1157_v6, %v1153_v5 }
 0x53b   :  { %2017 = vmatpush1.bf16.msra.mxu0 %v2016_v63  ;;  %v1151_v63 = vld [vmem:[%s4066_s7 + $0x388] sm:$0xff] }
 0x53c   :  { %2069 = vmatpush1.bf16.msra.mxu1 %v2068_v24  ;;  %2019 = vmatprep.subr.bf16.mxu0 %v2018_v1  ;;  %v1155_v1 = vld [vmem:[%s4066_s7 + $0x3a8] sm:$0xff] }
 0x53d   :  { %2071 = vmatprep.subr.bf16.mxu1 %v2070_v30  ;;  %v1126_v30 = vld [vmem:[%s4066_s7 + $0x2c0] sm:$0xff] }
 0x53e   :  { %v2024_v33 = vpack.c.bf16 %v1130_v31, %v1126_v30  ;;  %v1351_v30 = vld [vmem:[%s4067_s9 + $0x8] sm:$0xff]  ;;  %v1353_v31 = vld [vmem:[%s4067_s9 + $0x18] sm:$0xff] }
 0x53f   :  { %2021 = vmatpush1.bf16.msra.mxu0 %v2020_v10  ;;  %v1154_v10 = vld [vmem:[%s4066_s7 + $0x3a0] sm:$0xff] }
 0x540   :  { %2073 = vmatpush1.bf16.msra.mxu1 %v2072_v37  ;;  %v1135_v37 = vld [vmem:[%s4066_s7 + $0x308] sm:$0xff] }
 0x541   :  { %2075 = vmatprep.subr.bf16.mxu1 %v2074_v47  ;;  %v2026_v40 = vpack.c.bf16 %v1139_v38, %v1135_v37  ;;  %v1134_v47 = vld [vmem:[%s4066_s7 + $0x300] sm:$0xff] }
 0x542   :  { %v2028_v49 = vpack.c.bf16 %v1138_v41, %v1134_v47  ;;  %v1016_v47 = vrot.slane %v973_v39, %v2942_v46  ;;  %v1381_v39 = vld [vmem:[%s4067_s9 + $0xf8] sm:$0xff] }
 0x544   :  { %2077 = vmatpush1.bf16.msra.mxu1 %v2076_v54  ;;  %v1143_v54 = vld [vmem:[%s4066_s7 + $0x348] sm:$0xff] }
 0x545   :  { %2079 = vmatprep.subr.bf16.mxu1 %v2078_v57  ;;  %v2030_v20 = vpack.c.bf16 %v1147_v29, %v1143_v54  ;;  %v1142_v57 = vld [vmem:[%s4066_s7 + $0x340] sm:$0xff]  ;;  %v1352_v54 = vld [vmem:[%s4067_s9 + $0x10] sm:$0xff] }
 0x546   :  { %v2032_v60 = vpack.c.bf16 %v1146_v58, %v1142_v57 }
 0x548   :  { %2081 = vmatpush1.bf16.msra.mxu1 %v2080_v0  ;;  %v2096_v0 = vpack.c.bf16 %v1148_v62, %v1144_v61  ;;  %v1354_v62 = vld [vmem:[%s4067_s9 + $0x20] sm:$0xff] }
 0x549   :  { %2083 = vmatprep.subr.bf16.mxu1 %v2082_v7  ;;  %v2034_v7 = vpack.c.bf16 %v1155_v1, %v1151_v63  ;;  %v1356_v63 = vld [vmem:[%s4067_s9 + $0x30] sm:$0xff] }
 0x54c   :  { %2085 = vmatpush1.bf16.msra.mxu1 %v2084_v11  ;;  %v1152_v11 = vld [vmem:[%s4066_s7 + $0x390] sm:$0xff] }
 0x5ad   :  { %v977_v12 = vpop.xlane.xlu0 %976 }
 0x5ae   :  { %v982_v13 = vmul.f32 0.00390625, %v977_v12  ;;  %v2036_v12 = vpack.c.bf16 %v1154_v10, %v1150_v9  ;;  %v1358_v9 = vld [vmem:[%s4067_s9 + $0x40] sm:$0xff]  ;;  %v1360_v10 = vld [vmem:[%s4067_s9 + $0x50] sm:$0xff] }
 0x5b0   :  { %v3449_v15 = vsub.f32 %v3167_v42, %v982_v13  ;;  %v3452_v16 = vsub.f32 %v3172_v44, %v982_v13  ;;  %v1156_v13 = vld [vmem:[%s4066_s7 + $0x3b0] sm:$0xff] }
 0x5b1   :  { %v980_v17 = vpop.xlane.xlu1 %979 }
 0x5b2   :  { %v983_v18 = vmul.f32 0.00390625, %v980_v17  ;;  %v988_v19 = vmul.f32 %v3449_v15, %v3449_v15  ;;  %v989_v21 = vmul.f32 %v3452_v16, %v3452_v16  ;;  %v1159_v17 = vld [vmem:[%s4066_s7 + $0x3c8] sm:$0xff] }
 0x5b4   :  { %v3459_v22 = vsub.f32 %v3177_v51, %v983_v18  ;;  %v3462_v23 = vsub.f32 %v3180_v52, %v983_v18  ;;  %v992_v24 = vadd.f32 %v989_v21, %v988_v19  ;;  %v1131_v51 = vld [vmem:[%s4066_s7 + $0x2e8] sm:$0xff]  ;;  %v1129_v52 = vld [vmem:[%s4066_s7 + $0x2d8] sm:$0xff]  ;;  %v2100_v19 = vpack.c.bf16 %v1156_v13, %v1152_v11 }
 0x5b5   :  { %v2022_v27 = vpack.c.bf16 %v1131_v51, %v1127_v26  ;;  %v2086_v32 = vpack.c.bf16 %v1133_v28, %v1129_v52  ;;  %v1163_v18 = vld [vmem:[%s4066_s7 + $0x3e8] sm:$0xff]  ;;  %v1162_v26 = vld [vmem:[%s4066_s7 + $0x3e0] sm:$0xff]  ;;  %v1160_v51 = vld [vmem:[%s4066_s7 + $0x3d0] sm:$0xff]  ;;  %v2116_v13 = vpack.c.bf16 %v1360_v10, %v1358_v9 }
 0x5b6   :  { %993 = vadd.xlane.f32.xlu0 %v992_v24  ;;  %v990_v42 = vmul.f32 %v3459_v22, %v3459_v22  ;;  %v991_v44 = vmul.f32 %v3462_v23, %v3462_v23  ;;  %v2038_v21 = vpack.c.bf16 %v1163_v18, %v1159_v17  ;;  %v1161_v24 = vld [vmem:[%s4066_s7 + $0x3d8] sm:$0xff]  ;;  %v1164_v52 = vld [vmem:[%s4066_s7 + $0x3f0] sm:$0xff]  ;;  %v1363_v11 = vld [vmem:[%s4067_s9 + $0x68] sm:$0xff] }
 0x5b7   :  { %2023 = vmatprep.subr.bf16.mxu0 %v2022_v27  ;;  %2087 = vmatprep.subr.bf16.mxu1 %v2086_v32  ;;  %v2104_v28 = vpack.c.bf16 %v1164_v52, %v1160_v51  ;;  %v2106_v32 = vpack.c.bf16 %v1353_v31, %v1351_v30  ;;  %v1362_v18 = vld [vmem:[%s4067_s9 + $0x60] sm:$0xff]  ;;  %v1371_v51 = vld [vmem:[%s4067_s9 + $0xa8] sm:$0xff]  ;;  %v1373_v52 = vld [vmem:[%s4067_s9 + $0xb8] sm:$0xff] }
 0x5b8   :  { %v995_v25 = vadd.f32 %v991_v44, %v990_v42  ;;  %2025 = vmatpush1.bf16.msra.mxu0 %v2024_v33  ;;  %2089 = vmatpush1.bf16.msra.mxu1 %v2088_v36  ;;  %v1165_v42 = vld [vmem:[%s4066_s7 + $0x3f8] sm:$0xff]  ;;  %v1158_v44 = vld [vmem:[%s4066_s7 + $0x3c0] sm:$0xff]  ;;  %v1372_v31 = vld [vmem:[%s4067_s9 + $0xb0] sm:$0xff] }
 0x5b9   :  { %2027 = vmatprep.subr.bf16.mxu0 %v2026_v40  ;;  %2091 = vmatprep.subr.bf16.mxu1 %v2090_v48  ;;  %v2040_v27 = vpack.c.bf16 %v1162_v26, %v1158_v44  ;;  %v974_v40 = vld [vmem:[%s4069_s6] sm:$0x3]  ;;  %v1368_v26 = vld [vmem:[%s4067_s9 + $0x90] sm:$0xff]  ;;  %v1399_v10 = vld [vmem:[%s4067_s9 + $0x188] sm:$0xff] }
 0x5ba   :  { %996 = vadd.xlane.f32.xlu1 %v995_v25  ;;  %v2102_v25 = vpack.c.bf16 %v1165_v42, %v1161_v24  ;;  %v1031_v50 = vrot.slane %v974_v40, %v2942_v46  ;;  %v1369_v24 = vld [vmem:[%s4067_s9 + $0x98] sm:$0xff]  ;;  %v1370_v30 = vld [vmem:[%s4067_s9 + $0xa0] sm:$0xff]  ;;  %v1396_v9 = vld [vmem:[%s4067_s9 + $0x170] sm:$0xff] }
 0x5bc   :  { %2029 = vmatpush1.bf16.msra.mxu0 %v2028_v49  ;;  %2093 = vmatpush1.bf16.msra.mxu1 %v2092_v53  ;;  %v1027_v49 = vrot.slane %v974_v40, %v2955_v4  ;;  %v1350_v53 = vld [vmem:[%s4067_s9] sm:$0xff] }
 0x5bd   :  { %2031 = vmatprep.subr.bf16.mxu0 %v2030_v20  ;;  %2095 = vmatprep.subr.bf16.mxu1 %v2094_v59  ;;  %v1357_v20 = vld [vmem:[%s4067_s9 + $0x38] sm:$0xff] }
 0x5c0   :  { %2033 = vmatpush1.bf16.msra.mxu0 %v2032_v60  ;;  %2097 = vmatpush1.bf16.msra.mxu1 %v2096_v0 }
 0x5c1   :  { %2035 = vmatprep.subr.bf16.mxu0 %v2034_v7  ;;  %2099 = vmatprep.subr.bf16.mxu1 %v2098_v8  ;;  %v2112_v7 = vpack.c.bf16 %v1356_v63, %v1354_v62  ;;  %v1390_v63 = vld [vmem:[%s4067_s9 + $0x140] sm:$0xff] }
 0x5c4   :  { %2037 = vmatpush1.bf16.msra.mxu0 %v2036_v12  ;;  %2101 = vmatpush1.bf16.msra.mxu1 %v2100_v19  ;;  %v1365_v12 = vld [vmem:[%s4067_s9 + $0x78] sm:$0xff]  ;;  %v1364_v19 = vld [vmem:[%s4067_s9 + $0x70] sm:$0xff] }
 0x5c5   :  { %2039 = vmatprep.subr.bf16.mxu0 %v2038_v21  ;;  %2103 = vmatprep.subr.bf16.mxu1 %v2102_v25  ;;  %v2118_v17 = vpack.c.bf16 %v1365_v12, %v1363_v11  ;;  %v1367_v21 = vld [vmem:[%s4067_s9 + $0x88] sm:$0xff]  ;;  %v2120_v42 = vpack.c.bf16 %v1364_v19, %v1362_v18  ;;  %v1366_v25 = vld [vmem:[%s4067_s9 + $0x80] sm:$0xff]  ;;  %v1401_v11 = vld [vmem:[%s4067_s9 + $0x198] sm:$0xff] }
 0x5c6   :  { %v2122_v44 = vpack.c.bf16 %v1369_v24, %v1367_v21  ;;  %v1400_v18 = vld [vmem:[%s4067_s9 + $0x190] sm:$0xff]  ;;  %v1403_v19 = vld [vmem:[%s4067_s9 + $0x1a8] sm:$0xff]  ;;  %v1405_v21 = vld [vmem:[%s4067_s9 + $0x1b8] sm:$0xff] }
 0x5c8   :  { %2041 = vmatpush1.bf16.msra.mxu0 %v2040_v27  ;;  %2105 = vmatpush1.bf16.msra.mxu1 %v2104_v28  ;;  %v2124_v27 = vpack.c.bf16 %v1368_v26, %v1366_v25  ;;  %v2126_v28 = vpack.c.bf16 %v1373_v52, %v1371_v51  ;;  %v1404_v25 = vld [vmem:[%s4067_s9 + $0x1b0] sm:$0xff]  ;;  %v1407_v26 = vld [vmem:[%s4067_s9 + $0x1c8] sm:$0xff]  ;;  %v1409_v51 = vld [vmem:[%s4067_s9 + $0x1d8] sm:$0xff] }
 0x5c9   :  { %2107 = vmatprep.subr.bf16.mxu0 %v2106_v32  ;;  %v1375_v32 = vld [vmem:[%s4067_s9 + $0xc8] sm:$0xff] }
 0x643   :  { %v994_v33 = vpop.xlane.xlu0 %993 }
 0x644   :  { %v998_v34 = vmul.f32 0.00390625, %v994_v33  ;;  %v1377_v33 = vld [vmem:[%s4067_s9 + $0xd8] sm:$0xff] }
 0x646   :  { %v1000_v35 = vadd.f32 1e-05, %v998_v34  ;;  %v2128_v34 = vpack.c.bf16 %v1372_v31, %v1370_v30  ;;  %v1408_v30 = vld [vmem:[%s4067_s9 + $0x1d0] sm:$0xff] }
 0x647   :  { %v997_v36 = vpop.xlane.xlu1 %996 }
 0x648   :  { %2251 = vrsqrt.f32 %v1000_v35  ;;  %v999_v37 = vmul.f32 0.00390625, %v997_v36  ;;  %v2130_v35 = vpack.c.bf16 %v1377_v33, %v1375_v32  ;;  %v1374_v36 = vld [vmem:[%s4067_s9 + $0xc0] sm:$0xff]  ;;  %v1411_v32 = vld [vmem:[%s4067_s9 + $0x1e8] sm:$0xff]  ;;  %v1413_v33 = vld [vmem:[%s4067_s9 + $0x1f8] sm:$0xff] }
 0x64a   :  { %v1001_v38 = vadd.f32 1e-05, %v999_v37  ;;  %v1376_v37 = vld [vmem:[%s4067_s9 + $0xd0] sm:$0xff] }
 0x64b   :  { %v2132_v40 = vpack.c.bf16 %v1376_v37, %v1374_v36  ;;  %v1412_v36 = vld [vmem:[%s4067_s9 + $0x1f0] sm:$0xff] }
 0x64c   :  { %2253 = vrsqrt.f32 %v1001_v38  ;;  %v1379_v38 = vld [vmem:[%s4067_s9 + $0xe8] sm:$0xff] }
 0x652   :  { %v2252_v41 = vpop.eup %2251 }
 0x653   :  { %v1005_v48 = vmul.f32 %v2252_v41, %v3452_v16  ;;  %v1004_v14 = vmul.f32 %v2252_v41, %v3449_v15  ;;  %v1355_v16 = vld [vmem:[%s4067_s9 + $0x28] sm:$0xff]  ;;  %v2108_v15 = vpack.c.bf16 %v1352_v54, %v1350_v53  ;;  %v1380_v41 = vld [vmem:[%s4067_s9 + $0xf0] sm:$0xff]  ;;  %v1382_v53 = vld [vmem:[%s4067_s9 + $0x100] sm:$0xff] }
 0x654   :  { %v2110_v61 = vpack.c.bf16 %v1357_v20, %v1355_v16  ;;  %v1384_v54 = vld [vmem:[%s4067_s9 + $0x110] sm:$0xff] }
 0x655   :  { %v1020_v29 = vmul.f32 %v1016_v47, %v1005_v48  ;;  %v1019_v55 = vmul.f32 %v1012_v43, %v1004_v14  ;;  %v1383_v48 = vld [vmem:[%s4067_s9 + $0x108] sm:$0xff]  ;;  %v2140_v16 = vpack.c.bf16 %v1384_v54, %v1382_v53  ;;  %v1414_v54 = vld [vmem:[%s4067_s9 + $0x200] sm:$0xff] }
 0x656   :  { %v2254_v56 = vpop.eup %2253 }
 0x657   :  { %v3618_v57 = vadd.f32 %v1031_v50, %v1020_v29  ;;  %v3620_v58 = vadd.f32 %v1027_v49, %v1019_v55  ;;  %v1007_v59 = vmul.f32 %v2254_v56, %v3462_v23  ;;  %v1006_v60 = vmul.f32 %v2254_v56, %v3459_v22  ;;  %v1359_v23 = vld [vmem:[%s4067_s9 + $0x48] sm:$0xff]  ;;  %v1361_v22 = vld [vmem:[%s4067_s9 + $0x58] sm:$0xff]  ;;  %v1386_v56 = vld [vmem:[%s4067_s9 + $0x120] sm:$0xff] }
 0x658   :  { %v2114_v8 = vpack.c.bf16 %v1361_v22, %v1359_v23  ;;  %v1387_v29 = vld [vmem:[%s4067_s9 + $0x128] sm:$0xff]  ;;  %v1389_v55 = vld [vmem:[%s4067_s9 + $0x138] sm:$0xff] }
 0x659   :  { %1252 = vmatprep.mubr.f32.mxu0 %v3618_v57  ;;  %1329 = vmatprep.mubr.f32.mxu1 %v3618_v57  ;;  %v1022_v0 = vmul.f32 %v1016_v47, %v1007_v59  ;;  %v1021_v1 = vmul.f32 %v1012_v43, %v1006_v60  ;;  %v2134_v43 = vpack.c.bf16 %v1381_v39, %v1379_v38  ;;  %v1378_v47 = vld [vmem:[%s4067_s9 + $0xe0] sm:$0xff]  ;;  %v1391_v59 = vld [vmem:[%s4067_s9 + $0x148] sm:$0xff]  ;;  %v1393_v60 = vld [vmem:[%s4067_s9 + $0x158] sm:$0xff] }
 0x65a   :  { %1253 = vmatmul.mubr.f32.vlgmr.msra.gmra.mrb[8].mxu0 %v3620_v58  ;;  %1330 = vmatmul.mubr.f32.vlgmr.msra.gmra.mrb[16].mxu1 %v3620_v58  ;;  %v2142_v20 = vpack.c.bf16 %v1389_v55, %v1387_v29  ;;  %v2146_v62 = vpack.c.bf16 %v1393_v60, %v1391_v59  ;;  %v1397_v23 = vld [vmem:[%s4067_s9 + $0x178] sm:$0xff]  ;;  %v1415_v38 = vld [vmem:[%s4067_s9 + $0x208] sm:$0xff]  ;;  %v1416_v29 = vld [vmem:[%s4067_s9 + $0x210] sm:$0xff] }
 0x65b   :  { %v3640_v5 = vadd.f32 %v1031_v50, %v1022_v0  ;;  %v3642_v6 = vadd.f32 %v1027_v49, %v1021_v1  ;;  %2109 = vmatpush1.bf16.msra.mxu0 %v2108_v15  ;;  %v1385_v49 = vld [vmem:[%s4067_s9 + $0x118] sm:$0xff]  ;;  %v2136_v50 = vpack.c.bf16 %v1380_v41, %v1378_v47  ;;  %v1388_v15 = vld [vmem:[%s4067_s9 + $0x130] sm:$0xff]  ;;  %v1395_v1 = vld [vmem:[%s4067_s9 + $0x168] sm:$0xff] }
 0x65c   :  { %2111 = vmatprep.subr.bf16.mxu0 %v2110_v61  ;;  %v2138_v14 = vpack.c.bf16 %v1385_v49, %v1383_v48  ;;  %v2144_v61 = vpack.c.bf16 %v1388_v15, %v1386_v56  ;;  %v1392_v0 = vld [vmem:[%s4067_s9 + $0x150] sm:$0xff]  ;;  %v1417_v39 = vld [vmem:[%s4067_s9 + $0x218] sm:$0xff] }
 0x65d   :  { %1258 = vmatprep.mubr.f32.mxu0 %v3640_v5  ;;  %1335 = vmatprep.mubr.f32.mxu1 %v3640_v5  ;;  %v2148_v22 = vpack.c.bf16 %v1392_v0, %v1390_v63  ;;  %v1421_v56 = vld [vmem:[%s4067_s9 + $0x238] sm:$0xff] }
 0x65e   :  { %1259 = vmatmul.mubr.f32.gmra.mrb[10].mxu0 %v3642_v6  ;;  %1336 = vmatmul.mubr.f32.gmra.mrb[18].mxu1 %v3642_v6 }
 0x65f   :  { %2113 = vmatpush1.bf16.msra.mxu0 %v2112_v7  ;;  %v2150_v7 = vpack.c.bf16 %v1397_v23, %v1395_v1  ;;  %v1418_v23 = vld [vmem:[%s4067_s9 + $0x220] sm:$0xff] }
 0x660   :  { %2115 = vmatprep.subr.bf16.mxu0 %v2114_v8  ;;  %v1394_v8 = vld [vmem:[%s4067_s9 + $0x160] sm:$0xff] }
 0x661   :  { %v2152_v12 = vpack.c.bf16 %v1396_v9, %v1394_v8  ;;  %v1423_v9 = vld [vmem:[%s4067_s9 + $0x248] sm:$0xff] }
 0x663   :  { %2117 = vmatpush1.bf16.msra.mxu0 %v2116_v13  ;;  %v2154_v13 = vpack.c.bf16 %v1401_v11, %v1399_v10  ;;  %v1425_v10 = vld [vmem:[%s4067_s9 + $0x258] sm:$0xff] }
 0x664   :  { %2119 = vmatprep.subr.bf16.mxu0 %v2118_v17  ;;  %v1398_v17 = vld [vmem:[%s4067_s9 + $0x180] sm:$0xff] }
 0x665   :  { %v2156_v24 = vpack.c.bf16 %v1400_v18, %v1398_v17  ;;  %v2178_v17 = vpack.c.bf16 %v1425_v10, %v1423_v9  ;;  %v1422_v18 = vld [vmem:[%s4067_s9 + $0x240] sm:$0xff]  ;;  %v1455_v9 = vld [vmem:[%s4067_s9 + $0x348] sm:$0xff]  ;;  %v1457_v10 = vld [vmem:[%s4067_s9 + $0x358] sm:$0xff] }
 0x667   :  { %2121 = vmatpush1.bf16.msra.mxu0 %v2120_v42  ;;  %v2158_v42 = vpack.c.bf16 %v1405_v21, %v1403_v19  ;;  %v1424_v19 = vld [vmem:[%s4067_s9 + $0x250] sm:$0xff] }
 0x668   :  { %2123 = vmatprep.subr.bf16.mxu0 %v2122_v44  ;;  %v1402_v44 = vld [vmem:[%s4067_s9 + $0x1a0] sm:$0xff] }
 0x669   :  { %v2160_v52 = vpack.c.bf16 %v1404_v25, %v1402_v44  ;;  %v2180_v44 = vpack.c.bf16 %v1424_v19, %v1422_v18  ;;  %v1459_v18 = vld [vmem:[%s4067_s9 + $0x368] sm:$0xff]  ;;  %v1461_v19 = vld [vmem:[%s4067_s9 + $0x378] sm:$0xff] }
 0x66b   :  { %2125 = vmatpush1.bf16.msra.mxu0 %v2124_v27  ;;  %v2162_v27 = vpack.c.bf16 %v1409_v51, %v1407_v26  ;;  %v1426_v26 = vld [vmem:[%s4067_s9 + $0x260] sm:$0xff]  ;;  %v1428_v51 = vld [vmem:[%s4067_s9 + $0x270] sm:$0xff] }
 0x66c   :  { %2127 = vmatprep.subr.bf16.mxu0 %v2126_v28  ;;  %v1406_v28 = vld [vmem:[%s4067_s9 + $0x1c0] sm:$0xff] }
 0x66d   :  { %v2164_v31 = vpack.c.bf16 %v1408_v30, %v1406_v28  ;;  %v2184_v28 = vpack.c.bf16 %v1428_v51, %v1426_v26  ;;  %v1465_v26 = vld [vmem:[%s4067_s9 + $0x398] sm:$0xff] }
 0x66f   :  { %2129 = vmatpush1.bf16.msra.mxu0 %v2128_v34  ;;  %v2166_v34 = vpack.c.bf16 %v1413_v33, %v1411_v32  ;;  %v1432_v32 = vld [vmem:[%s4067_s9 + $0x290] sm:$0xff]  ;;  %v1435_v33 = vld [vmem:[%s4067_s9 + $0x2a8] sm:$0xff] }
 0x670   :  { %2131 = vmatprep.subr.bf16.mxu0 %v2130_v35  ;;  %v1410_v35 = vld [vmem:[%s4067_s9 + $0x1e0] sm:$0xff] }
 0x671   :  { %v2168_v37 = vpack.c.bf16 %v1412_v36, %v1410_v35 }
 0x673   :  { %2133 = vmatpush1.bf16.msra.mxu0 %v2132_v40  ;;  %v2170_v40 = vpack.c.bf16 %v1417_v39, %v1415_v38  ;;  %v1436_v38 = vld [vmem:[%s4067_s9 + $0x2b0] sm:$0xff]  ;;  %v1439_v39 = vld [vmem:[%s4067_s9 + $0x2c8] sm:$0xff] }
 0x674   :  { %2135 = vmatprep.subr.bf16.mxu0 %v2134_v43  ;;  %v3819_v43 = vld [vmem:[%s4070_s8] sm:$0xf] }
 0x675   :  { %v1171_v47 = vrot.slane %v3819_v43, %v2955_v4  ;;  %v1175_v41 = vrot.slane %v3819_v43, %v2942_v46 }
 0x677   :  { %2137 = vmatpush1.bf16.msra.mxu0 %v2136_v50 }
 0x678   :  { %2139 = vmatprep.subr.bf16.mxu0 %v2138_v14 }
 0x67b   :  { %2141 = vmatpush1.bf16.msra.mxu0 %v2140_v16  ;;  %v3836_v16 = vrot.slane %v3819_v43, %v256_v2 }
 0x67c   :  { %2143 = vmatprep.subr.bf16.mxu0 %v2142_v20  ;;  %v1419_v20 = vld [vmem:[%s4067_s9 + $0x228] sm:$0xff] }
 0x67d   :  { %v2174_v2 = vpack.c.bf16 %v1421_v56, %v1419_v20  ;;  %v1444_v20 = vld [vmem:[%s4067_s9 + $0x2f0] sm:$0xff]  ;;  %v1447_v56 = vld [vmem:[%s4067_s9 + $0x308] sm:$0xff] }
 0x67f   :  { %2145 = vmatpush1.bf16.msra.mxu0 %v2144_v61  ;;  %v2172_v61 = vpack.c.bf16 %v1416_v29, %v1414_v54 }
 0x680   :  { %2147 = vmatprep.subr.bf16.mxu0 %v2146_v62 }
 0x683   :  { %2149 = vmatpush1.bf16.msra.mxu0 %v2148_v22  ;;  %v1420_v22 = vld [vmem:[%s4067_s9 + $0x230] sm:$0xff] }
 0x684   :  { %2151 = vmatprep.subr.bf16.mxu0 %v2150_v7 }
 0x687   :  { %2153 = vmatpush1.bf16.msra.mxu0 %v2152_v12  ;;  %v2176_v12 = vpack.c.bf16 %v1420_v22, %v1418_v23 }
 0x688   :  { %2155 = vmatprep.subr.bf16.mxu0 %v2154_v13 }
 0x68b   :  { %2157 = vmatpush1.bf16.msra.mxu0 %v2156_v24  ;;  %v1427_v24 = vld [vmem:[%s4067_s9 + $0x268] sm:$0xff] }
 0x68c   :  { %2159 = vmatprep.subr.bf16.mxu0 %v2158_v42  ;;  %v1429_v42 = vld [vmem:[%s4067_s9 + $0x278] sm:$0xff] }
 0x68d   :  { %v2182_v25 = vpack.c.bf16 %v1429_v42, %v1427_v24  ;;  %v2214_v24 = vpack.c.bf16 %v1461_v19, %v1459_v18  ;;  %v1458_v42 = vld [vmem:[%s4067_s9 + $0x360] sm:$0xff] }
 0x68f   :  { %2161 = vmatpush1.bf16.msra.mxu0 %v2160_v52  ;;  %v1431_v52 = vld [vmem:[%s4067_s9 + $0x288] sm:$0xff] }
 0x690   :  { %2163 = vmatprep.subr.bf16.mxu0 %v2162_v27  ;;  %v1433_v27 = vld [vmem:[%s4067_s9 + $0x298] sm:$0xff] }
 0x691   :  { %v2186_v30 = vpack.c.bf16 %v1433_v27, %v1431_v52  ;;  %v1462_v27 = vld [vmem:[%s4067_s9 + $0x380] sm:$0xff] }
 0x693   :  { %2165 = vmatpush1.bf16.msra.mxu0 %v2164_v31  ;;  %v1430_v31 = vld [vmem:[%s4067_s9 + $0x280] sm:$0xff] }
 0x694   :  { %2167 = vmatprep.subr.bf16.mxu0 %v2166_v34  ;;  %v1437_v34 = vld [vmem:[%s4067_s9 + $0x2b8] sm:$0xff]  ;;  %v2188_v35 = vpack.c.bf16 %v1432_v32, %v1430_v31 }
 0x695   :  { %v2190_v36 = vpack.c.bf16 %v1437_v34, %v1435_v33  ;;  %v1469_v31 = vld [vmem:[%s4067_s9 + $0x3b8] sm:$0xff]  ;;  %v1466_v34 = vld [vmem:[%s4067_s9 + $0x3a0] sm:$0xff] }
 0x697   :  { %2169 = vmatpush1.bf16.msra.mxu0 %v2168_v37  ;;  %v1434_v37 = vld [vmem:[%s4067_s9 + $0x2a0] sm:$0xff] }
 0x698   :  { %2171 = vmatprep.subr.bf16.mxu0 %v2170_v40  ;;  %v1441_v40 = vld [vmem:[%s4067_s9 + $0x2d8] sm:$0xff] }
 0x72d   :  { %v1254_v48 = vpop.f32.mrb[8].mxu0  ;;  %v3825_v49 = vpop.f32.mrb[16].mxu1 }
 0x72e   :  { %v1255_v50 = vadd.f32 %v1254_v48, %v1171_v47  ;;  %v1256_v14 = vpop.f32.mrb[9].mxu0  ;;  %v1333_v53 = vpop.f32.mrb[17].mxu1  ;;  %v1438_v48 = vld [vmem:[%s4067_s9 + $0x2c0] sm:$0xff] }
 0x72f   :  { %v1257_v55 = vadd.f32 %v1256_v14, %v1175_v41  ;;  %v1334_v7 = vadd.f32 %v1333_v53, %v3836_v16  ;;  %v1443_v14 = vld [vmem:[%s4067_s9 + $0x2e8] sm:$0xff]  ;;  %v1445_v53 = vld [vmem:[%s4067_s9 + $0x2f8] sm:$0xff] }
 0x730   :  { %v1342_v62 = vmax.f32 %v1255_v50, 0.0  ;;  %v1440_v50 = vld [vmem:[%s4067_s9 + $0x2d0] sm:$0xff]  ;;  %v2198_v29 = vpack.c.bf16 %v1445_v53, %v1443_v14  ;;  %v1179_v14 = vrot.slane %v3819_v43, %v252_v3 }
 0x731   :  { %v1343_v15 = vmax.f32 %v1257_v55, 0.0  ;;  %v1260_v59 = vpop.f32.mrb[10].mxu0  ;;  %v3844_v60 = vpop.f32.mrb[18].mxu1  ;;  %v1345_v21 = vmax.f32 %v1334_v7, 0.0  ;;  %v2196_v54 = vpack.c.bf16 %v1440_v50, %v1438_v48  ;;  %v1442_v55 = vld [vmem:[%s4067_s9 + $0x2e0] sm:$0xff]  ;;  %v1477_v48 = vld [vmem:[%s4067_s9 + $0x3f8] sm:$0xff] }
 0x732   :  { %v1261_v63 = vadd.f32 %v1260_v59, %v1171_v47  ;;  %v1262_v0 = vpop.f32.mrb[11].mxu0  ;;  %v3846_v1 = vpop.f32.mrb[19].mxu1  ;;  %v2192_v47 = vpack.c.bf16 %v1436_v38, %v1434_v37  ;;  %v2200_v59 = vpack.c.bf16 %v1444_v20, %v1442_v55  ;;  %v1450_v7 = vld [vmem:[%s4067_s9 + $0x320] sm:$0xff]  ;;  %v1473_v37 = vld [vmem:[%s4067_s9 + $0x3d8] sm:$0xff]  ;;  %v1332_v20 = vadd.f32 %v3825_v49, %v1179_v14 }
 0x733   :  { %v1263_v8 = vadd.f32 %v1262_v0, %v1175_v41  ;;  %1554 = vmatprep.mubr.f32.mxu0 %v1343_v15  ;;  %v2194_v41 = vpack.c.bf16 %v1441_v40, %v1439_v39  ;;  %v1449_v15 = vld [vmem:[%s4067_s9 + $0x318] sm:$0xff]  ;;  %v1451_v0 = vld [vmem:[%s4067_s9 + $0x328] sm:$0xff]  ;;  %v1470_v40 = vld [vmem:[%s4067_s9 + $0x3c0] sm:$0xff]  ;;  %v1340_v45 = vadd.f32 %v3846_v1, %v3836_v16  ;;  %v1338_v43 = vadd.f32 %v3844_v60, %v1179_v14 }
 0x734   :  { %1555 = vmatmul.mubr.f32.vlgmr.msra.gmra.mrb[12].mxu0 %v1342_v62  ;;  %v1346_v13 = vmax.f32 %v1261_v63, 0.0  ;;  %v1446_v62 = vld [vmem:[%s4067_s9 + $0x300] sm:$0xff]  ;;  %v1448_v63 = vld [vmem:[%s4067_s9 + $0x310] sm:$0xff]  ;;  %v1344_v3 = vmax.f32 %v1332_v20, 0.0 }
 0x735   :  { %v1347_v11 = vmax.f32 %v1263_v8, 0.0  ;;  %2173 = vmatpush1.bf16.msra.mxu0 %v2172_v61  ;;  %v2202_v61 = vpack.c.bf16 %v1449_v15, %v1447_v56  ;;  %v2204_v23 = vpack.c.bf16 %v1448_v63, %v1446_v62  ;;  %v1452_v8 = vld [vmem:[%s4067_s9 + $0x330] sm:$0xff]  ;;  %v1349_v56 = vmax.f32 %v1340_v45, 0.0 }
 0x736   :  { %2175 = vmatprep.subr.bf16.mxu0 %v2174_v2  ;;  %v1453_v2 = vld [vmem:[%s4067_s9 + $0x338] sm:$0xff]  ;;  %v1348_v15 = vmax.f32 %v1338_v43, 0.0 }
 0x737   :  { %1560 = vmatprep.mubr.f32.mxu0 %v1347_v11  ;;  %v2206_v22 = vpack.c.bf16 %v1453_v2, %v1451_v0  ;;  %v2208_v11 = vpack.c.bf16 %v1452_v8, %v1450_v7 }
 0x738   :  { %1561 = vmatmul.mubr.f32.gmra.mrb[14].mxu0 %v1346_v13  ;;  %v1454_v13 = vld [vmem:[%s4067_s9 + $0x340] sm:$0xff] }
 0x739   :  { %2177 = vmatpush1.bf16.msra.mxu0 %v2176_v12  ;;  %1631 = vmatprep.mubr.f32.mxu0 %v1345_v21  ;;  %v2210_v12 = vpack.c.bf16 %v1457_v10, %v1455_v9 }
 0x73a   :  { %2179 = vmatprep.subr.bf16.mxu0 %v2178_v17  ;;  %v1456_v17 = vld [vmem:[%s4067_s9 + $0x350] sm:$0xff] }
 0x73b   :  { %v2212_v21 = vpack.c.bf16 %v1456_v17, %v1454_v13 }
 0x73d   :  { %2181 = vmatpush1.bf16.msra.mxu0 %v2180_v44  ;;  %v1460_v44 = vld [vmem:[%s4067_s9 + $0x370] sm:$0xff] }
 0x73e   :  { %2183 = vmatprep.subr.bf16.mxu0 %v2182_v25  ;;  %v1463_v25 = vld [vmem:[%s4067_s9 + $0x388] sm:$0xff]  ;;  %v2216_v51 = vpack.c.bf16 %v1460_v44, %v1458_v42 }
 0x73f   :  { %v2218_v52 = vpack.c.bf16 %v1465_v26, %v1463_v25 }
 0x741   :  { %2185 = vmatpush1.bf16.msra.mxu0 %v2184_v28  ;;  %v1464_v28 = vld [vmem:[%s4067_s9 + $0x390] sm:$0xff] }
 0x742   :  { %2187 = vmatprep.subr.bf16.mxu0 %v2186_v30  ;;  %v1467_v30 = vld [vmem:[%s4067_s9 + $0x3a8] sm:$0xff]  ;;  %v2220_v32 = vpack.c.bf16 %v1464_v28, %v1462_v27 }
 0x743   :  { %v2222_v33 = vpack.c.bf16 %v1469_v31, %v1467_v30  ;;  %v1648_v31 = vld [vmem:[%s4072_s11] sm:$0x3] }
 0x745   :  { %2189 = vmatpush1.bf16.msra.mxu0 %v2188_v35  ;;  %v1468_v35 = vld [vmem:[%s4067_s9 + $0x3b0] sm:$0xff] }
 0x746   :  { %2191 = vmatprep.subr.bf16.mxu0 %v2190_v36  ;;  %v1471_v36 = vld [vmem:[%s4067_s9 + $0x3c8] sm:$0xff]  ;;  %v2224_v38 = vpack.c.bf16 %v1468_v35, %v1466_v34  ;;  %v1690_v34 = vrot.slane %v1648_v31, %v2942_v46 }
 0x747   :  { %v2226_v39 = vpack.c.bf16 %v1473_v37, %v1471_v36 }
 0x749   :  { %2193 = vmatpush1.bf16.msra.mxu0 %v2192_v47  ;;  %v1472_v47 = vld [vmem:[%s4067_s9 + $0x3d0] sm:$0xff] }
 0x74a   :  { %2195 = vmatprep.subr.bf16.mxu0 %v2194_v41  ;;  %v1475_v41 = vld [vmem:[%s4067_s9 + $0x3e8] sm:$0xff]  ;;  %v2228_v50 = vpack.c.bf16 %v1472_v47, %v1470_v40 }
 0x74b   :  { %v2230_v53 = vpack.c.bf16 %v1477_v48, %v1475_v41 }
 0x74d   :  { %2197 = vmatpush1.bf16.msra.mxu0 %v2196_v54  ;;  %v1474_v54 = vld [vmem:[%s4067_s9 + $0x3e0] sm:$0xff] }
 0x74e   :  { %2199 = vmatprep.subr.bf16.mxu0 %v2198_v29  ;;  %v1476_v29 = vld [vmem:[%s4067_s9 + $0x3f0] sm:$0xff] }
 0x74f   :  { %v2232_v55 = vpack.c.bf16 %v1476_v29, %v1474_v54 }
 0x751   :  { %2201 = vmatpush1.bf16.msra.mxu0 %v2200_v59  ;;  %v1478_v59 = vld [vmem:[%s4071_s10] sm:$0x3] }
 0x752   :  { %2203 = vmatprep.subr.bf16.mxu0 %v2202_v61  ;;  %v1483_v61 = vrot.slane %v1478_v59, %v2955_v4  ;;  %v1487_v49 = vrot.slane %v1478_v59, %v2942_v46 }
 0x755   :  { %2205 = vmatpush1.bf16.msra.mxu0 %v2204_v23 }
 0x756   :  { %2207 = vmatprep.subr.bf16.mxu0 %v2206_v22 }
 0x759   :  { %2209 = vmatpush1.bf16.msra.mxu0 %v2208_v11 }
 0x75a   :  { %2211 = vmatprep.subr.bf16.mxu0 %v2210_v12 }
 0x75d   :  { %2213 = vmatpush1.bf16.msra.mxu0 %v2212_v21 }
 0x75e   :  { %2215 = vmatprep.subr.bf16.mxu0 %v2214_v24 }
 0x761   :  { %2217 = vmatpush1.bf16.msra.mxu0 %v2216_v51 }
 0x762   :  { %2219 = vmatprep.subr.bf16.mxu0 %v2218_v52 }
 0x765   :  { %2221 = vmatpush1.bf16.msra.mxu0 %v2220_v32  ;;  %v1649_v32 = vld [vmem:[%s4073_s12] sm:$0x3] }
 0x766   :  { %2223 = vmatprep.subr.bf16.mxu0 %v2222_v33  ;;  %v1686_v33 = vrot.slane %v1648_v31, %v2955_v4  ;;  %v1701_v36 = vrot.slane %v1649_v32, %v2955_v4  ;;  %v1705_v37 = vrot.slane %v1649_v32, %v2942_v46 }
 0x769   :  { %2225 = vmatpush1.bf16.msra.mxu0 %v2224_v38 }
 0x76a   :  { %2227 = vmatprep.subr.bf16.mxu0 %v2226_v39 }
 0x76d   :  { %2229 = vmatpush1.bf16.msra.mxu0 %v2228_v50 }
 0x76e   :  { %2231 = vmatprep.subr.bf16.mxu0 %v2230_v53 }
 0x771   :  { %2233 = vmatpush1.bf16.msra.mxu0 %v2232_v55 }
 0x774   :  { %1632 = vmatmul.mubr.f32.vlgmr.msra.gmra.mrb[12].mxu0 %v1344_v3 }
 0x775   :  { %1637 = vmatprep.mubr.f32.mxu0 %v1349_v56 }
 0x778   :  { %1638 = vmatmul.mubr.f32.gmra.mrb[14].mxu0 %v1348_v15 }
 0x847   :  { %v1633_v62 = vpop.f32.mrb[12].mxu0 }
 0x848   :  { %v2234_v63 = vadd.f32 %v1633_v62, %v1483_v61  ;;  %v1635_v16 = vpop.f32.mrb[13].mxu0 }
 0x849   :  { %v2235_v1 = vadd.f32 %v1635_v16, %v1487_v49 }
 0x84a   :  { %v1644_v0 = vadd.f32 %v2234_v63, %v3620_v58 }
 0x84b   :  { %v1645_v60 = vadd.f32 %v2235_v1, %v3618_v57  ;;  %v1639_v2 = vpop.f32.mrb[14].mxu0 }
 0x84c   :  { %v2236_v23 = vadd.f32 %v1639_v2, %v1483_v61  ;;  %v1641_v22 = vpop.f32.mrb[15].mxu0 }
 0x84d   :  { %v2237_v7 = vadd.f32 %v1641_v22, %v1487_v49  ;;  %v1650_v8 = vadd.f32 %v1645_v60, %v1644_v0 }
 0x84e   :  { %v1646_v9 = vadd.f32 %v2236_v23, %v3642_v6 }
 0x84f   :  { %v1647_v10 = vadd.f32 %v2237_v7, %v3640_v5  ;;  %1651 = vadd.xlane.f32.xlu0 %v1650_v8 }
 0x851   :  { %v1653_v11 = vadd.f32 %v1647_v10, %v1646_v9 }
 0x853   :  { %1654 = vadd.xlane.f32.xlu1 %v1653_v11 }
 0x8dc   :  { %v1652_v12 = vpop.xlane.xlu0 %1651 }
 0x8dd   :  { %v1656_v13 = vmul.f32 0.00390625, %v1652_v12 }
 0x8df   :  { %v1658_v17 = vsub.f32 %v1644_v0, %v1656_v13  ;;  %v1659_v18 = vsub.f32 %v1645_v60, %v1656_v13 }
 0x8e0   :  { %v1655_v19 = vpop.xlane.xlu1 %1654 }
 0x8e1   :  { %v1657_v58 = vmul.f32 0.00390625, %v1655_v19  ;;  %v1662_v21 = vmul.f32 %v1658_v17, %v1658_v17  ;;  %v1663_v57 = vmul.f32 %v1659_v18, %v1659_v18 }
 0x8e3   :  { %v1660_v24 = vsub.f32 %v1646_v9, %v1657_v58  ;;  %v1661_v42 = vsub.f32 %v1647_v10, %v1657_v58  ;;  %v1666_v44 = vadd.f32 %v1663_v57, %v1662_v21 }
 0x8e5   :  { %1667 = vadd.xlane.f32.xlu0 %v1666_v44  ;;  %v1664_v25 = vmul.f32 %v1660_v24, %v1660_v24  ;;  %v1665_v26 = vmul.f32 %v1661_v42, %v1661_v42 }
 0x8e7   :  { %v1669_v6 = vadd.f32 %v1665_v26, %v1664_v25 }
 0x8e9   :  { %1670 = vadd.xlane.f32.xlu1 %v1669_v6 }
 0x972   :  { %v1668_v5 = vpop.xlane.xlu0 %1667 }
 0x973   :  { %v1672_v51 = vmul.f32 0.00390625, %v1668_v5 }
 0x975   :  { %v1674_v52 = vadd.f32 1e-05, %v1672_v51 }
 0x976   :  { %v1671_v27 = vpop.xlane.xlu1 %1670 }
 0x977   :  { %2255 = vrsqrt.f32 %v1674_v52  ;;  %v1673_v28 = vmul.f32 0.00390625, %v1671_v27 }
 0x979   :  { %v1675_v30 = vadd.f32 1e-05, %v1673_v28 }
 0x97b   :  { %2257 = vrsqrt.f32 %v1675_v30 }
 0x981   :  { %v2256_v35 = vpop.eup %2255 }
 0x982   :  { %v1678_v38 = vmul.f32 %v2256_v35, %v1658_v17  ;;  %v1679_v39 = vmul.f32 %v2256_v35, %v1659_v18 }
 0x984   :  { %v1693_v40 = vmul.f32 %v1686_v33, %v1678_v38  ;;  %v1694_v47 = vmul.f32 %v1690_v34, %v1679_v39 }
 0x985   :  { %v2258_v41 = vpop.eup %2257 }
 0x986   :  { %v1708_v48 = vadd.f32 %v1701_v36, %v1693_v40  ;;  %v1709_v50 = vadd.f32 %v1705_v37, %v1694_v47  ;;  %v1680_v14 = vmul.f32 %v2258_v41, %v1660_v24  ;;  %v1681_v53 = vmul.f32 %v2258_v41, %v1661_v42 }
 0x988   :  { %1712 = vst [vmem:[%s4074_s13] sm:$0xff] %v1708_v48  ;;  %1713 = vst [vmem:[%s4074_s13 + $0x8] sm:$0xff] %v1709_v50  ;;  %v1695_v4 = vmul.f32 %v1686_v33, %v1680_v14  ;;  %v1696_v54 = vmul.f32 %v1690_v34, %v1681_v53 }
 0x98a   :  { %v1710_v46 = vadd.f32 %v1701_v36, %v1695_v4  ;;  %v1711_v29 = vadd.f32 %v1705_v37, %v1696_v54 }
 0x98c   :  { %1714 = vst [vmem:[%s4074_s13 + $0x10] sm:$0xff] %v1710_v46  ;;  %1715 = vst [vmem:[%s4074_s13 + $0x18] sm:$0xff] %v1711_v29 }

</bundles_post_ra>
